<compile_context>
chip_gen: v7x
topology: tpu7x:2x2x1
jax: 0.10.0
libtpu: 0.0.40
codegen_flags: <defaults>
</compile_context>

<pallas_src>
import jax
import jax.numpy as jnp
from jax.experimental import pallas as pl
from jax.experimental.pallas import tpu as pltpu

GENRES = 7
NUM_LAYERS = 4
OUT_PAD = 128   # lane-dense classifier width; real logits live in [:GENRES]


def lstm_kernel(x_ref, wih0_ref, wih_rest_ref, whh_blk_ref, b_ref,
                wout_ref, bout_ref, out_ref, hcat_ref):
    """Entire sequence + all layers in one kernel invocation.

    x_ref:        (T, D)            whole sequence in VMEM
    wih0_ref:     (D, 4H)           layer-0 input weights
    wih_rest_ref: (L-1, H, 4H)      layers 1..L-1 input weights
    whh_blk_ref:  (L*H, L*4H)       block-diagonal recurrent weights
    b_ref:        (L, 1, 4H)        folded biases (b_ih + b_hh)
    wout_ref:     (H, OUT_PAD), bout_ref: (1, OUT_PAD)
    out_ref:      (1, OUT_PAD)
    hcat_ref:     (1, L*H)          VMEM scratch holding [h_0 .. h_{L-1}](t-1)
    """
    T = x_ref.shape[0]
    L = NUM_LAYERS
    H = wih_rest_ref.shape[1]
    G = 4 * H

    # Hoisted layer-0 input projection: one batched (T,D)x(D,4H) MXU pass,
    # layer-0 bias folded in.  (T,4H) = one vreg, cheap to keep live.
    gates0_all = (jnp.dot(x_ref[...], wih0_ref[...],
                          preferred_element_type=jnp.float32)
                  + b_ref[0])                                       # (T, 4H)

    def cell(gates, c_prev):
        # LSTM cell from pre-activation gates (1, 4H), PyTorch order [i,f,g,o].
        # 3 EUP pushes: tanh(0.5*gates) full width (sigmoid identity),
        # tanh on the g chunk, tanh(c_new).
        sig = 0.5 * jnp.tanh(0.5 * gates) + 0.5                     # (1, 4H)
        i_g = sig[:, 0 * H:1 * H]
        f_g = sig[:, 1 * H:2 * H]
        o_g = sig[:, 3 * H:4 * H]
        g_g = jnp.tanh(gates[:, 2 * H:3 * H])
        c_new = i_g * g_g if c_prev is None else f_g * c_prev + i_g * g_g
        h_new = o_g * jnp.tanh(c_new)
        return h_new, c_new

    h = [None] * L
    c = [None] * L

    # T and L are tiny static constants -> fully unrolled recurrence.
    for t in range(T):
        if t > 0:
            # All layers' recurrent projections in ONE MXU dot:
            # (1, L*H) x (L*H, L*4H) block-diagonal weight -> (1, L*4H).
            rec_all = jnp.dot(hcat_ref[...], whh_blk_ref[...],
                              preferred_element_type=jnp.float32)
        x_in = None
        for layer in range(L):
            if layer == 0:
                gates = gates0_all[t:t + 1, :]                      # (1, 4H)
            else:
                gates = (jnp.dot(x_in, wih_rest_ref[layer - 1],
                                 preferred_element_type=jnp.float32)
                         + b_ref[layer])
            if t > 0:
                gates = gates + rec_all[:, layer * G:(layer + 1) * G]

            h_new, c[layer] = cell(gates, c[layer])
            h[layer] = h_new
            x_in = h_new
            if t < T - 1:
                # Stash h_l(t) for the next step's batched recurrent dot.
                hcat_ref[:, layer * H:(layer + 1) * H] = h_new

    # Output projection on the last layer's final hidden state (lane-dense).
    out_ref[...] = (jnp.dot(h[L - 1], wout_ref[...],
                            preferred_element_type=jnp.float32)
                    + bout_ref[...])


@jax.jit
def lstm_forward(x, w_ih0, w_ih_rest, w_hh, b, w_out, b_out):
    L, H, G = w_hh.shape
    O = w_out.shape[1]

    # Block-diagonal recurrent weight (L*H, L*4H): lets the kernel batch all
    # layers' h(t-1) @ W_hh into one MXU dot per timestep (K = L*H = 128).
    whh_blk = jnp.zeros((L * H, L * G), jnp.float32)
    for l in range(L):
        whh_blk = whh_blk.at[l * H:(l + 1) * H, l * G:(l + 1) * G].set(w_hh[l])

    # Pad the classifier to a lane-dense 128-wide output; slice back after.
    w_out_p = jnp.pad(w_out, ((0, 0), (0, OUT_PAD - O)))
    b_out_p = jnp.pad(b_out, ((0, 0), (0, OUT_PAD - O)))

    vmem = pl.BlockSpec(memory_space=pltpu.MemorySpace.VMEM)
    out = pl.pallas_call(
        lstm_kernel,
        out_shape=jax.ShapeDtypeStruct((1, OUT_PAD), jnp.float32),
        in_specs=[vmem] * 7,
        out_specs=vmem,
        scratch_shapes=[pltpu.VMEM((1, L * H), jnp.float32)],
    )(x, w_ih0, w_ih_rest, whh_blk, b, w_out_p, b_out_p)

    return out[0, :O]   # (O,)  -- matches PyTorch `...[0]`


def init_params(key, input_dim, hidden_dim, output_dim):
    """Deterministic init mimicking PyTorch's U(-1/sqrt(H), 1/sqrt(H))."""
    H = hidden_dim
    k = 1.0 / jnp.sqrt(jnp.float32(H))
    keys = jax.random.split(key, 4 * NUM_LAYERS + 2)
    ki = iter(range(len(keys)))

    def u(shape):
        return jax.random.uniform(keys[next(ki)], shape, jnp.float32, -k, k)

    # Layer 0 input weight (transposed to (D, 4H)); layers 1..3 stacked (3, H, 4H).
    w_ih0 = u((input_dim, 4 * H))
    w_ih_rest = jnp.stack([u((H, 4 * H)) for _ in range(NUM_LAYERS - 1)])
    w_hh = jnp.stack([u((H, 4 * H)) for _ in range(NUM_LAYERS)])
    # PyTorch has separate b_ih and b_hh; fold their sum into one bias per layer.
    b = jnp.stack([(u((1, 4 * H)) + u((1, 4 * H))) for _ in range(NUM_LAYERS)])

    ko = 1.0 / jnp.sqrt(jnp.float32(H))
    w_out = jax.random.uniform(keys[next(ki)], (H, output_dim), jnp.float32, -ko, ko)
    b_out = jax.random.uniform(keys[next(ki)], (1, output_dim), jnp.float32, -ko, ko)
    return w_ih0, w_ih_rest, w_hh, b, w_out, b_out


if __name__ == "__main__":
    SEQ = 8
    INPUT_DIM = 32
    HIDDEN_DIM = 32
    OUTPUT_DIM = GENRES

    root = jax.random.PRNGKey(0)
    k_x, k_p = jax.random.split(root)

    # inp in PyTorch: shape (SEQ, INPUT_DIM); forward views it as (SEQ, 1, INPUT_DIM).
    x = jax.random.normal(k_x, (SEQ, INPUT_DIM), jnp.float32)

    params = init_params(k_p, INPUT_DIM, HIDDEN_DIM, OUTPUT_DIM)

    out = lstm_forward(x, *params)
    out = jax.block_until_ready(out)
    assert out.shape == (OUTPUT_DIM,), out.shape
    assert bool(jnp.all(jnp.isfinite(out)))
    print("KERNEL_OK")
</pallas_src>

<mosaic_0001>
module attributes {stable_mosaic.version = 11 : i64} {
  func.func @lstm_kernel(%arg0: memref<8x32xf32, #tpu.memory_space<vmem>>, %arg1: memref<32x128xf32, #tpu.memory_space<vmem>>, %arg2: memref<3x32x128xf32, #tpu.memory_space<vmem>>, %arg3: memref<128x512xf32, #tpu.memory_space<vmem>>, %arg4: memref<4x1x128xf32, #tpu.memory_space<vmem>>, %arg5: memref<32x128xf32, #tpu.memory_space<vmem>>, %arg6: memref<1x128xf32, #tpu.memory_space<vmem>>, %arg7: memref<1x128xf32, #tpu.memory_space<vmem>>, %arg8: memref<1x128xf32, #tpu.memory_space<vmem>>) attributes {dimension_semantics = [], scalar_prefetch = 0 : i64, scratch_operands = 1 : i64, tpu.core_type = #tpu.core_type<tc>} {
    %c0 = arith.constant 0 : index
    %c0_0 = arith.constant 0 : index
    %0 = vector.load %arg0[%c0, %c0_0] : memref<8x32xf32, #tpu.memory_space<vmem>>, vector<8x32xf32>
    %c0_1 = arith.constant 0 : index
    %c0_2 = arith.constant 0 : index
    %1 = vector.load %arg1[%c0_1, %c0_2] : memref<32x128xf32, #tpu.memory_space<vmem>>, vector<32x128xf32>
    %cst = arith.constant dense<0.000000e+00> : vector<8x128xf32>
    %2 = tpu.matmul %0, %1, %cst {dimension_numbers = #tpu.dot_dimension_numbers<[1], [0], [0], [1], [0, 0, 1, 1], [], []>} : vector<8x32xf32>, vector<32x128xf32>, vector<8x128xf32> -> vector<8x128xf32>
    %c0_3 = arith.constant 0 : index
    %c0_4 = arith.constant 0 : index
    %c0_5 = arith.constant 0 : index
    %3 = vector.load %arg4[%c0_3, %c0_4, %c0_5] : memref<4x1x128xf32, #tpu.memory_space<vmem>>, vector<1x1x128xf32>
    %4 = vector.shape_cast %3 : vector<1x1x128xf32> to vector<1x128xf32>
    %5 = vector.broadcast %4 : vector<1x128xf32> to vector<8x128xf32>
    %6 = arith.addf %2, %5 : vector<8x128xf32>
    %7 = vector.extract_strided_slice %6 {offsets = [0, 0], sizes = [1, 128], strides = [1, 1]} : vector<8x128xf32> to vector<1x128xf32>
    %cst_6 = arith.constant 5.000000e-01 : f32
    %8 = vector.broadcast %cst_6 : f32 to vector<1x128xf32>
    %9 = arith.mulf %8, %7 : vector<1x128xf32>
    %10 = math.tanh %9 : vector<1x128xf32>
    %cst_7 = arith.constant 5.000000e-01 : f32
    %11 = vector.broadcast %cst_7 : f32 to vector<1x128xf32>
    %12 = arith.mulf %11, %10 : vector<1x128xf32>
    %cst_8 = arith.constant 5.000000e-01 : f32
    %13 = vector.broadcast %cst_8 : f32 to vector<1x128xf32>
    %14 = arith.addf %12, %13 : vector<1x128xf32>
    %15 = vector.extract_strided_slice %14 {offsets = [0, 0], sizes = [1, 32], strides = [1, 1]} : vector<1x128xf32> to vector<1x32xf32>
    %16 = vector.extract_strided_slice %14 {offsets = [0, 96], sizes = [1, 32], strides = [1, 1]} : vector<1x128xf32> to vector<1x32xf32>
    %17 = vector.extract_strided_slice %7 {offsets = [0, 64], sizes = [1, 32], strides = [1, 1]} : vector<1x128xf32> to vector<1x32xf32>
    %18 = math.tanh %17 : vector<1x32xf32>
    %19 = arith.mulf %15, %18 : vector<1x32xf32>
    %20 = math.tanh %19 : vector<1x32xf32>
    %21 = arith.mulf %16, %20 : vector<1x32xf32>
    %c0_9 = arith.constant 0 : index
    %c0_10 = arith.constant 0 : index
    %22 = vector.load %arg8[%c0_9, %c0_10] : memref<1x128xf32, #tpu.memory_space<vmem>>, vector<1x32xf32>
    tpu.vector_store %arg8[%c0_9, %c0_10], %21 {strides = array<i32>} : memref<1x128xf32, #tpu.memory_space<vmem>>, vector<1x32xf32>,
    %c0_11 = arith.constant 0 : index
    %c0_12 = arith.constant 0 : index
    %c0_13 = arith.constant 0 : index
    %23 = vector.load %arg2[%c0_11, %c0_12, %c0_13] : memref<3x32x128xf32, #tpu.memory_space<vmem>>, vector<1x32x128xf32>
    %24 = vector.shape_cast %23 : vector<1x32x128xf32> to vector<32x128xf32>
    %cst_14 = arith.constant dense<0.000000e+00> : vector<1x128xf32>
    %25 = tpu.matmul %21, %24, %cst_14 {dimension_numbers = #tpu.dot_dimension_numbers<[1], [0], [0], [1], [0, 0, 1, 1], [], []>} : vector<1x32xf32>, vector<32x128xf32>, vector<1x128xf32> -> vector<1x128xf32>
    %c1 = arith.constant 1 : index
    %c0_15 = arith.constant 0 : index
    %c0_16 = arith.constant 0 : index
    %26 = vector.load %arg4[%c1, %c0_15, %c0_16] : memref<4x1x128xf32, #tpu.memory_space<vmem>>, vector<1x1x128xf32>
    %27 = vector.shape_cast %26 : vector<1x1x128xf32> to vector<1x128xf32>
    %28 = arith.addf %25, %27 : vector<1x128xf32>
    %cst_17 = arith.constant 5.000000e-01 : f32
    %29 = vector.broadcast %cst_17 : f32 to vector<1x128xf32>
    %30 = arith.mulf %29, %28 : vector<1x128xf32>
    %31 = math.tanh %30 : vector<1x128xf32>
    %cst_18 = arith.constant 5.000000e-01 : f32
    %32 = vector.broadcast %cst_18 : f32 to vector<1x128xf32>
    %33 = arith.mulf %32, %31 : vector<1x128xf32>
    %cst_19 = arith.constant 5.000000e-01 : f32
    %34 = vector.broadcast %cst_19 : f32 to vector<1x128xf32>
    %35 = arith.addf %33, %34 : vector<1x128xf32>
    %36 = vector.extract_strided_slice %35 {offsets = [0, 0], sizes = [1, 32], strides = [1, 1]} : vector<1x128xf32> to vector<1x32xf32>
    %37 = vector.extract_strided_slice %35 {offsets = [0, 96], sizes = [1, 32], strides = [1, 1]} : vector<1x128xf32> to vector<1x32xf32>
    %38 = vector.extract_strided_slice %28 {offsets = [0, 64], sizes = [1, 32], strides = [1, 1]} : vector<1x128xf32> to vector<1x32xf32>
    %39 = math.tanh %38 : vector<1x32xf32>
    %40 = arith.mulf %36, %39 : vector<1x32xf32>
    %41 = math.tanh %40 : vector<1x32xf32>
    %42 = arith.mulf %37, %41 : vector<1x32xf32>
    %c0_20 = arith.constant 0 : index
    %c32 = arith.constant 32 : index
    %43 = vector.load %arg8[%c0_20, %c32] : memref<1x128xf32, #tpu.memory_space<vmem>>, vector<1x32xf32>
    tpu.vector_store %arg8[%c0_20, %c32], %42 {strides = array<i32>} : memref<1x128xf32, #tpu.memory_space<vmem>>, vector<1x32xf32>,
    %c1_21 = arith.constant 1 : index
    %c0_22 = arith.constant 0 : index
    %c0_23 = arith.constant 0 : index
    %44 = vector.load %arg2[%c1_21, %c0_22, %c0_23] : memref<3x32x128xf32, #tpu.memory_space<vmem>>, vector<1x32x128xf32>
    %45 = vector.shape_cast %44 : vector<1x32x128xf32> to vector<32x128xf32>
    %cst_24 = arith.constant dense<0.000000e+00> : vector<1x128xf32>
    %46 = tpu.matmul %42, %45, %cst_24 {dimension_numbers = #tpu.dot_dimension_numbers<[1], [0], [0], [1], [0, 0, 1, 1], [], []>} : vector<1x32xf32>, vector<32x128xf32>, vector<1x128xf32> -> vector<1x128xf32>
    %c2 = arith.constant 2 : index
    %c0_25 = arith.constant 0 : index
    %c0_26 = arith.constant 0 : index
    %47 = vector.load %arg4[%c2, %c0_25, %c0_26] : memref<4x1x128xf32, #tpu.memory_space<vmem>>, vector<1x1x128xf32>
    %48 = vector.shape_cast %47 : vector<1x1x128xf32> to vector<1x128xf32>
    %49 = arith.addf %46, %48 : vector<1x128xf32>
    %cst_27 = arith.constant 5.000000e-01 : f32
    %50 = vector.broadcast %cst_27 : f32 to vector<1x128xf32>
    %51 = arith.mulf %50, %49 : vector<1x128xf32>
    %52 = math.tanh %51 : vector<1x128xf32>
    %cst_28 = arith.constant 5.000000e-01 : f32
    %53 = vector.broadcast %cst_28 : f32 to vector<1x128xf32>
    %54 = arith.mulf %53, %52 : vector<1x128xf32>
    %cst_29 = arith.constant 5.000000e-01 : f32
    %55 = vector.broadcast %cst_29 : f32 to vector<1x128xf32>
    %56 = arith.addf %54, %55 : vector<1x128xf32>
    %57 = vector.extract_strided_slice %56 {offsets = [0, 0], sizes = [1, 32], strides = [1, 1]} : vector<1x128xf32> to vector<1x32xf32>
    %58 = vector.extract_strided_slice %56 {offsets = [0, 96], sizes = [1, 32], strides = [1, 1]} : vector<1x128xf32> to vector<1x32xf32>
    %59 = vector.extract_strided_slice %49 {offsets = [0, 64], sizes = [1, 32], strides = [1, 1]} : vector<1x128xf32> to vector<1x32xf32>
    %60 = math.tanh %59 : vector<1x32xf32>
    %61 = arith.mulf %57, %60 : vector<1x32xf32>
    %62 = math.tanh %61 : vector<1x32xf32>
    %63 = arith.mulf %58, %62 : vector<1x32xf32>
    %c0_30 = arith.constant 0 : index
    %c64 = arith.constant 64 : index
    %64 = vector.load %arg8[%c0_30, %c64] : memref<1x128xf32, #tpu.memory_space<vmem>>, vector<1x32xf32>
    tpu.vector_store %arg8[%c0_30, %c64], %63 {strides = array<i32>} : memref<1x128xf32, #tpu.memory_space<vmem>>, vector<1x32xf32>,
    %c2_31 = arith.constant 2 : index
    %c0_32 = arith.constant 0 : index
    %c0_33 = arith.constant 0 : index
    %65 = vector.load %arg2[%c2_31, %c0_32, %c0_33] : memref<3x32x128xf32, #tpu.memory_space<vmem>>, vector<1x32x128xf32>
    %66 = vector.shape_cast %65 : vector<1x32x128xf32> to vector<32x128xf32>
    %cst_34 = arith.constant dense<0.000000e+00> : vector<1x128xf32>
    %67 = tpu.matmul %63, %66, %cst_34 {dimension_numbers = #tpu.dot_dimension_numbers<[1], [0], [0], [1], [0, 0, 1, 1], [], []>} : vector<1x32xf32>, vector<32x128xf32>, vector<1x128xf32> -> vector<1x128xf32>
    %c3 = arith.constant 3 : index
    %c0_35 = arith.constant 0 : index
    %c0_36 = arith.constant 0 : index
    %68 = vector.load %arg4[%c3, %c0_35, %c0_36] : memref<4x1x128xf32, #tpu.memory_space<vmem>>, vector<1x1x128xf32>
    %69 = vector.shape_cast %68 : vector<1x1x128xf32> to vector<1x128xf32>
    %70 = arith.addf %67, %69 : vector<1x128xf32>
    %cst_37 = arith.constant 5.000000e-01 : f32
    %71 = vector.broadcast %cst_37 : f32 to vector<1x128xf32>
    %72 = arith.mulf %71, %70 : vector<1x128xf32>
    %73 = math.tanh %72 : vector<1x128xf32>
    %cst_38 = arith.constant 5.000000e-01 : f32
    %74 = vector.broadcast %cst_38 : f32 to vector<1x128xf32>
    %75 = arith.mulf %74, %73 : vector<1x128xf32>
    %cst_39 = arith.constant 5.000000e-01 : f32
    %76 = vector.broadcast %cst_39 : f32 to vector<1x128xf32>
    %77 = arith.addf %75, %76 : vector<1x128xf32>
    %78 = vector.extract_strided_slice %77 {offsets = [0, 0], sizes = [1, 32], strides = [1, 1]} : vector<1x128xf32> to vector<1x32xf32>
    %79 = vector.extract_strided_slice %77 {offsets = [0, 96], sizes = [1, 32], strides = [1, 1]} : vector<1x128xf32> to vector<1x32xf32>
    %80 = vector.extract_strided_slice %70 {offsets = [0, 64], sizes = [1, 32], strides = [1, 1]} : vector<1x128xf32> to vector<1x32xf32>
    %81 = math.tanh %80 : vector<1x32xf32>
    %82 = arith.mulf %78, %81 : vector<1x32xf32>
    %83 = math.tanh %82 : vector<1x32xf32>
    %84 = arith.mulf %79, %83 : vector<1x32xf32>
    %c0_40 = arith.constant 0 : index
    %c96 = arith.constant 96 : index
    %85 = vector.load %arg8[%c0_40, %c96] : memref<1x128xf32, #tpu.memory_space<vmem>>, vector<1x32xf32>
    tpu.vector_store %arg8[%c0_40, %c96], %84 {strides = array<i32>} : memref<1x128xf32, #tpu.memory_space<vmem>>, vector<1x32xf32>,
    %c0_41 = arith.constant 0 : index
    %c0_42 = arith.constant 0 : index
    %86 = vector.load %arg8[%c0_41, %c0_42] : memref<1x128xf32, #tpu.memory_space<vmem>>, vector<1x128xf32>
    %c0_43 = arith.constant 0 : index
    %c0_44 = arith.constant 0 : index
    %87 = vector.load %arg3[%c0_43, %c0_44] : memref<128x512xf32, #tpu.memory_space<vmem>>, vector<128x512xf32>
    %cst_45 = arith.constant dense<0.000000e+00> : vector<1x512xf32>
    %88 = tpu.matmul %86, %87, %cst_45 {dimension_numbers = #tpu.dot_dimension_numbers<[1], [0], [0], [1], [0, 0, 1, 1], [], []>} : vector<1x128xf32>, vector<128x512xf32>, vector<1x512xf32> -> vector<1x512xf32>
    %89 = vector.extract_strided_slice %6 {offsets = [1, 0], sizes = [1, 128], strides = [1, 1]} : vector<8x128xf32> to vector<1x128xf32>
    %90 = vector.extract_strided_slice %88 {offsets = [0, 0], sizes = [1, 128], strides = [1, 1]} : vector<1x512xf32> to vector<1x128xf32>
    %91 = arith.addf %89, %90 : vector<1x128xf32>
    %cst_46 = arith.constant 5.000000e-01 : f32
    %92 = vector.broadcast %cst_46 : f32 to vector<1x128xf32>
    %93 = arith.mulf %92, %91 : vector<1x128xf32>
    %94 = math.tanh %93 : vector<1x128xf32>
    %cst_47 = arith.constant 5.000000e-01 : f32
    %95 = vector.broadcast %cst_47 : f32 to vector<1x128xf32>
    %96 = arith.mulf %95, %94 : vector<1x128xf32>
    %cst_48 = arith.constant 5.000000e-01 : f32
    %97 = vector.broadcast %cst_48 : f32 to vector<1x128xf32>
    %98 = arith.addf %96, %97 : vector<1x128xf32>
    %99 = vector.extract_strided_slice %98 {offsets = [0, 0], sizes = [1, 32], strides = [1, 1]} : vector<1x128xf32> to vector<1x32xf32>
    %100 = vector.extract_strided_slice %98 {offsets = [0, 32], sizes = [1, 32], strides = [1, 1]} : vector<1x128xf32> to vector<1x32xf32>
    %101 = vector.extract_strided_slice %98 {offsets = [0, 96], sizes = [1, 32], strides = [1, 1]} : vector<1x128xf32> to vector<1x32xf32>
    %102 = vector.extract_strided_slice %91 {offsets = [0, 64], sizes = [1, 32], strides = [1, 1]} : vector<1x128xf32> to vector<1x32xf32>
    %103 = math.tanh %102 : vector<1x32xf32>
    %104 = arith.mulf %100, %19 : vector<1x32xf32>
    %105 = arith.mulf %99, %103 : vector<1x32xf32>
    %106 = arith.addf %104, %105 : vector<1x32xf32>
    %107 = math.tanh %106 : vector<1x32xf32>
    %108 = arith.mulf %101, %107 : vector<1x32xf32>
    %c0_49 = arith.constant 0 : index
    %c0_50 = arith.constant 0 : index
    %109 = vector.load %arg8[%c0_49, %c0_50] : memref<1x128xf32, #tpu.memory_space<vmem>>, vector<1x32xf32>
    tpu.vector_store %arg8[%c0_49, %c0_50], %108 {strides = array<i32>} : memref<1x128xf32, #tpu.memory_space<vmem>>, vector<1x32xf32>,
    %c0_51 = arith.constant 0 : index
    %c0_52 = arith.constant 0 : index
    %c0_53 = arith.constant 0 : index
    %110 = vector.load %arg2[%c0_51, %c0_52, %c0_53] : memref<3x32x128xf32, #tpu.memory_space<vmem>>, vector<1x32x128xf32>
    %111 = vector.shape_cast %110 : vector<1x32x128xf32> to vector<32x128xf32>
    %cst_54 = arith.constant dense<0.000000e+00> : vector<1x128xf32>
    %112 = tpu.matmul %108, %111, %cst_54 {dimension_numbers = #tpu.dot_dimension_numbers<[1], [0], [0], [1], [0, 0, 1, 1], [], []>} : vector<1x32xf32>, vector<32x128xf32>, vector<1x128xf32> -> vector<1x128xf32>
    %c1_55 = arith.constant 1 : index
    %c0_56 = arith.constant 0 : index
    %c0_57 = arith.constant 0 : index
    %113 = vector.load %arg4[%c1_55, %c0_56, %c0_57] : memref<4x1x128xf32, #tpu.memory_space<vmem>>, vector<1x1x128xf32>
    %114 = vector.shape_cast %113 : vector<1x1x128xf32> to vector<1x128xf32>
    %115 = arith.addf %112, %114 : vector<1x128xf32>
    %116 = vector.extract_strided_slice %88 {offsets = [0, 128], sizes = [1, 128], strides = [1, 1]} : vector<1x512xf32> to vector<1x128xf32>
    %117 = arith.addf %115, %116 : vector<1x128xf32>
    %cst_58 = arith.constant 5.000000e-01 : f32
    %118 = vector.broadcast %cst_58 : f32 to vector<1x128xf32>
    %119 = arith.mulf %118, %117 : vector<1x128xf32>
    %120 = math.tanh %119 : vector<1x128xf32>
    %cst_59 = arith.constant 5.000000e-01 : f32
    %121 = vector.broadcast %cst_59 : f32 to vector<1x128xf32>
    %122 = arith.mulf %121, %120 : vector<1x128xf32>
    %cst_60 = arith.constant 5.000000e-01 : f32
    %123 = vector.broadcast %cst_60 : f32 to vector<1x128xf32>
    %124 = arith.addf %122, %123 : vector<1x128xf32>
    %125 = vector.extract_strided_slice %124 {offsets = [0, 0], sizes = [1, 32], strides = [1, 1]} : vector<1x128xf32> to vector<1x32xf32>
    %126 = vector.extract_strided_slice %124 {offsets = [0, 32], sizes = [1, 32], strides = [1, 1]} : vector<1x128xf32> to vector<1x32xf32>
    %127 = vector.extract_strided_slice %124 {offsets = [0, 96], sizes = [1, 32], strides = [1, 1]} : vector<1x128xf32> to vector<1x32xf32>
    %128 = vector.extract_strided_slice %117 {offsets = [0, 64], sizes = [1, 32], strides = [1, 1]} : vector<1x128xf32> to vector<1x32xf32>
    %129 = math.tanh %128 : vector<1x32xf32>
    %130 = arith.mulf %126, %40 : vector<1x32xf32>
    %131 = arith.mulf %125, %129 : vector<1x32xf32>
    %132 = arith.addf %130, %131 : vector<1x32xf32>
    %133 = math.tanh %132 : vector<1x32xf32>
    %134 = arith.mulf %127, %133 : vector<1x32xf32>
    %c0_61 = arith.constant 0 : index
    %c32_62 = arith.constant 32 : index
    %135 = vector.load %arg8[%c0_61, %c32_62] : memref<1x128xf32, #tpu.memory_space<vmem>>, vector<1x32xf32>
    tpu.vector_store %arg8[%c0_61, %c32_62], %134 {strides = array<i32>} : memref<1x128xf32, #tpu.memory_space<vmem>>, vector<1x32xf32>,
    %c1_63 = arith.constant 1 : index
    %c0_64 = arith.constant 0 : index
    %c0_65 = arith.constant 0 : index
    %136 = vector.load %arg2[%c1_63, %c0_64, %c0_65] : memref<3x32x128xf32, #tpu.memory_space<vmem>>, vector<1x32x128xf32>
    %137 = vector.shape_cast %136 : vector<1x32x128xf32> to vector<32x128xf32>
    %cst_66 = arith.constant dense<0.000000e+00> : vector<1x128xf32>
    %138 = tpu.matmul %134, %137, %cst_66 {dimension_numbers = #tpu.dot_dimension_numbers<[1], [0], [0], [1], [0, 0, 1, 1], [], []>} : vector<1x32xf32>, vector<32x128xf32>, vector<1x128xf32> -> vector<1x128xf32>
    %c2_67 = arith.constant 2 : index
    %c0_68 = arith.constant 0 : index
    %c0_69 = arith.constant 0 : index
    %139 = vector.load %arg4[%c2_67, %c0_68, %c0_69] : memref<4x1x128xf32, #tpu.memory_space<vmem>>, vector<1x1x128xf32>
    %140 = vector.shape_cast %139 : vector<1x1x128xf32> to vector<1x128xf32>
    %141 = arith.addf %138, %140 : vector<1x128xf32>
    %142 = vector.extract_strided_slice %88 {offsets = [0, 256], sizes = [1, 128], strides = [1, 1]} : vector<1x512xf32> to vector<1x128xf32>
    %143 = arith.addf %141, %142 : vector<1x128xf32>
    %cst_70 = arith.constant 5.000000e-01 : f32
    %144 = vector.broadcast %cst_70 : f32 to vector<1x128xf32>
    %145 = arith.mulf %144, %143 : vector<1x128xf32>
    %146 = math.tanh %145 : vector<1x128xf32>
    %cst_71 = arith.constant 5.000000e-01 : f32
    %147 = vector.broadcast %cst_71 : f32 to vector<1x128xf32>
    %148 = arith.mulf %147, %146 : vector<1x128xf32>
    %cst_72 = arith.constant 5.000000e-01 : f32
    %149 = vector.broadcast %cst_72 : f32 to vector<1x128xf32>
    %150 = arith.addf %148, %149 : vector<1x128xf32>
    %151 = vector.extract_strided_slice %150 {offsets = [0, 0], sizes = [1, 32], strides = [1, 1]} : vector<1x128xf32> to vector<1x32xf32>
    %152 = vector.extract_strided_slice %150 {offsets = [0, 32], sizes = [1, 32], strides = [1, 1]} : vector<1x128xf32> to vector<1x32xf32>
    %153 = vector.extract_strided_slice %150 {offsets = [0, 96], sizes = [1, 32], strides = [1, 1]} : vector<1x128xf32> to vector<1x32xf32>
    %154 = vector.extract_strided_slice %143 {offsets = [0, 64], sizes = [1, 32], strides = [1, 1]} : vector<1x128xf32> to vector<1x32xf32>
    %155 = math.tanh %154 : vector<1x32xf32>
    %156 = arith.mulf %152, %61 : vector<1x32xf32>
    %157 = arith.mulf %151, %155 : vector<1x32xf32>
    %158 = arith.addf %156, %157 : vector<1x32xf32>
    %159 = math.tanh %158 : vector<1x32xf32>
    %160 = arith.mulf %153, %159 : vector<1x32xf32>
    %c0_73 = arith.constant 0 : index
    %c64_74 = arith.constant 64 : index
    %161 = vector.load %arg8[%c0_73, %c64_74] : memref<1x128xf32, #tpu.memory_space<vmem>>, vector<1x32xf32>
    tpu.vector_store %arg8[%c0_73, %c64_74], %160 {strides = array<i32>} : memref<1x128xf32, #tpu.memory_space<vmem>>, vector<1x32xf32>,
    %c2_75 = arith.constant 2 : index
    %c0_76 = arith.constant 0 : index
    %c0_77 = arith.constant 0 : index
    %162 = vector.load %arg2[%c2_75, %c0_76, %c0_77] : memref<3x32x128xf32, #tpu.memory_space<vmem>>, vector<1x32x128xf32>
    %163 = vector.shape_cast %162 : vector<1x32x128xf32> to vector<32x128xf32>
    %cst_78 = arith.constant dense<0.000000e+00> : vector<1x128xf32>
    %164 = tpu.matmul %160, %163, %cst_78 {dimension_numbers = #tpu.dot_dimension_numbers<[1], [0], [0], [1], [0, 0, 1, 1], [], []>} : vector<1x32xf32>, vector<32x128xf32>, vector<1x128xf32> -> vector<1x128xf32>
    %c3_79 = arith.constant 3 : index
    %c0_80 = arith.constant 0 : index
    %c0_81 = arith.constant 0 : index
    %165 = vector.load %arg4[%c3_79, %c0_80, %c0_81] : memref<4x1x128xf32, #tpu.memory_space<vmem>>, vector<1x1x128xf32>
    %166 = vector.shape_cast %165 : vector<1x1x128xf32> to vector<1x128xf32>
    %167 = arith.addf %164, %166 : vector<1x128xf32>
    %168 = vector.extract_strided_slice %88 {offsets = [0, 384], sizes = [1, 128], strides = [1, 1]} : vector<1x512xf32> to vector<1x128xf32>
    %169 = arith.addf %167, %168 : vector<1x128xf32>
    %cst_82 = arith.constant 5.000000e-01 : f32
    %170 = vector.broadcast %cst_82 : f32 to vector<1x128xf32>
    %171 = arith.mulf %170, %169 : vector<1x128xf32>
    %172 = math.tanh %171 : vector<1x128xf32>
    %cst_83 = arith.constant 5.000000e-01 : f32
    %173 = vector.broadcast %cst_83 : f32 to vector<1x128xf32>
    %174 = arith.mulf %173, %172 : vector<1x128xf32>
    %cst_84 = arith.constant 5.000000e-01 : f32
    %175 = vector.broadcast %cst_84 : f32 to vector<1x128xf32>
    %176 = arith.addf %174, %175 : vector<1x128xf32>
    %177 = vector.extract_strided_slice %176 {offsets = [0, 0], sizes = [1, 32], strides = [1, 1]} : vector<1x128xf32> to vector<1x32xf32>
    %178 = vector.extract_strided_slice %176 {offsets = [0, 32], sizes = [1, 32], strides = [1, 1]} : vector<1x128xf32> to vector<1x32xf32>
    %179 = vector.extract_strided_slice %176 {offsets = [0, 96], sizes = [1, 32], strides = [1, 1]} : vector<1x128xf32> to vector<1x32xf32>
    %180 = vector.extract_strided_slice %169 {offsets = [0, 64], sizes = [1, 32], strides = [1, 1]} : vector<1x128xf32> to vector<1x32xf32>
    %181 = math.tanh %180 : vector<1x32xf32>
    %182 = arith.mulf %178, %82 : vector<1x32xf32>
    %183 = arith.mulf %177, %181 : vector<1x32xf32>
    %184 = arith.addf %182, %183 : vector<1x32xf32>
    %185 = math.tanh %184 : vector<1x32xf32>
    %186 = arith.mulf %179, %185 : vector<1x32xf32>
    %c0_85 = arith.constant 0 : index
    %c96_86 = arith.constant 96 : index
    %187 = vector.load %arg8[%c0_85, %c96_86] : memref<1x128xf32, #tpu.memory_space<vmem>>, vector<1x32xf32>
    tpu.vector_store %arg8[%c0_85, %c96_86], %186 {strides = array<i32>} : memref<1x128xf32, #tpu.memory_space<vmem>>, vector<1x32xf32>,
    %c0_87 = arith.constant 0 : index
    %c0_88 = arith.constant 0 : index
    %188 = vector.load %arg8[%c0_87, %c0_88] : memref<1x128xf32, #tpu.memory_space<vmem>>, vector<1x128xf32>
    %c0_89 = arith.constant 0 : index
    %c0_90 = arith.constant 0 : index
    %189 = vector.load %arg3[%c0_89, %c0_90] : memref<128x512xf32, #tpu.memory_space<vmem>>, vector<128x512xf32>
    %cst_91 = arith.constant dense<0.000000e+00> : vector<1x512xf32>
    %190 = tpu.matmul %188, %189, %cst_91 {dimension_numbers = #tpu.dot_dimension_numbers<[1], [0], [0], [1], [0, 0, 1, 1], [], []>} : vector<1x128xf32>, vector<128x512xf32>, vector<1x512xf32> -> vector<1x512xf32>
    %191 = vector.extract_strided_slice %6 {offsets = [2, 0], sizes = [1, 128], strides = [1, 1]} : vector<8x128xf32> to vector<1x128xf32>
    %192 = vector.extract_strided_slice %190 {offsets = [0, 0], sizes = [1, 128], strides = [1, 1]} : vector<1x512xf32> to vector<1x128xf32>
    %193 = arith.addf %191, %192 : vector<1x128xf32>
    %cst_92 = arith.constant 5.000000e-01 : f32
    %194 = vector.broadcast %cst_92 : f32 to vector<1x128xf32>
    %195 = arith.mulf %194, %193 : vector<1x128xf32>
    %196 = math.tanh %195 : vector<1x128xf32>
    %cst_93 = arith.constant 5.000000e-01 : f32
    %197 = vector.broadcast %cst_93 : f32 to vector<1x128xf32>
    %198 = arith.mulf %197, %196 : vector<1x128xf32>
    %cst_94 = arith.constant 5.000000e-01 : f32
    %199 = vector.broadcast %cst_94 : f32 to vector<1x128xf32>
    %200 = arith.addf %198, %199 : vector<1x128xf32>
    %201 = vector.extract_strided_slice %200 {offsets = [0, 0], sizes = [1, 32], strides = [1, 1]} : vector<1x128xf32> to vector<1x32xf32>
    %202 = vector.extract_strided_slice %200 {offsets = [0, 32], sizes = [1, 32], strides = [1, 1]} : vector<1x128xf32> to vector<1x32xf32>
    %203 = vector.extract_strided_slice %200 {offsets = [0, 96], sizes = [1, 32], strides = [1, 1]} : vector<1x128xf32> to vector<1x32xf32>
    %204 = vector.extract_strided_slice %193 {offsets = [0, 64], sizes = [1, 32], strides = [1, 1]} : vector<1x128xf32> to vector<1x32xf32>
    %205 = math.tanh %204 : vector<1x32xf32>
    %206 = arith.mulf %202, %106 : vector<1x32xf32>
    %207 = arith.mulf %201, %205 : vector<1x32xf32>
    %208 = arith.addf %206, %207 : vector<1x32xf32>
    %209 = math.tanh %208 : vector<1x32xf32>
    %210 = arith.mulf %203, %209 : vector<1x32xf32>
    %c0_95 = arith.constant 0 : index
    %c0_96 = arith.constant 0 : index
    %211 = vector.load %arg8[%c0_95, %c0_96] : memref<1x128xf32, #tpu.memory_space<vmem>>, vector<1x32xf32>
    tpu.vector_store %arg8[%c0_95, %c0_96], %210 {strides = array<i32>} : memref<1x128xf32, #tpu.memory_space<vmem>>, vector<1x32xf32>,
    %c0_97 = arith.constant 0 : index
    %c0_98 = arith.constant 0 : index
    %c0_99 = arith.constant 0 : index
    %212 = vector.load %arg2[%c0_97, %c0_98, %c0_99] : memref<3x32x128xf32, #tpu.memory_space<vmem>>, vector<1x32x128xf32>
    %213 = vector.shape_cast %212 : vector<1x32x128xf32> to vector<32x128xf32>
    %cst_100 = arith.constant dense<0.000000e+00> : vector<1x128xf32>
    %214 = tpu.matmul %210, %213, %cst_100 {dimension_numbers = #tpu.dot_dimension_numbers<[1], [0], [0], [1], [0, 0, 1, 1], [], []>} : vector<1x32xf32>, vector<32x128xf32>, vector<1x128xf32> -> vector<1x128xf32>
    %c1_101 = arith.constant 1 : index
    %c0_102 = arith.constant 0 : index
    %c0_103 = arith.constant 0 : index
    %215 = vector.load %arg4[%c1_101, %c0_102, %c0_103] : memref<4x1x128xf32, #tpu.memory_space<vmem>>, vector<1x1x128xf32>
    %216 = vector.shape_cast %215 : vector<1x1x128xf32> to vector<1x128xf32>
    %217 = arith.addf %214, %216 : vector<1x128xf32>
    %218 = vector.extract_strided_slice %190 {offsets = [0, 128], sizes = [1, 128], strides = [1, 1]} : vector<1x512xf32> to vector<1x128xf32>
    %219 = arith.addf %217, %218 : vector<1x128xf32>
    %cst_104 = arith.constant 5.000000e-01 : f32
    %220 = vector.broadcast %cst_104 : f32 to vector<1x128xf32>
    %221 = arith.mulf %220, %219 : vector<1x128xf32>
    %222 = math.tanh %221 : vector<1x128xf32>
    %cst_105 = arith.constant 5.000000e-01 : f32
    %223 = vector.broadcast %cst_105 : f32 to vector<1x128xf32>
    %224 = arith.mulf %223, %222 : vector<1x128xf32>
    %cst_106 = arith.constant 5.000000e-01 : f32
    %225 = vector.broadcast %cst_106 : f32 to vector<1x128xf32>
    %226 = arith.addf %224, %225 : vector<1x128xf32>
    %227 = vector.extract_strided_slice %226 {offsets = [0, 0], sizes = [1, 32], strides = [1, 1]} : vector<1x128xf32> to vector<1x32xf32>
    %228 = vector.extract_strided_slice %226 {offsets = [0, 32], sizes = [1, 32], strides = [1, 1]} : vector<1x128xf32> to vector<1x32xf32>
    %229 = vector.extract_strided_slice %226 {offsets = [0, 96], sizes = [1, 32], strides = [1, 1]} : vector<1x128xf32> to vector<1x32xf32>
    %230 = vector.extract_strided_slice %219 {offsets = [0, 64], sizes = [1, 32], strides = [1, 1]} : vector<1x128xf32> to vector<1x32xf32>
    %231 = math.tanh %230 : vector<1x32xf32>
    %232 = arith.mulf %228, %132 : vector<1x32xf32>
    %233 = arith.mulf %227, %231 : vector<1x32xf32>
    %234 = arith.addf %232, %233 : vector<1x32xf32>
    %235 = math.tanh %234 : vector<1x32xf32>
    %236 = arith.mulf %229, %235 : vector<1x32xf32>
    %c0_107 = arith.constant 0 : index
    %c32_108 = arith.constant 32 : index
    %237 = vector.load %arg8[%c0_107, %c32_108] : memref<1x128xf32, #tpu.memory_space<vmem>>, vector<1x32xf32>
    tpu.vector_store %arg8[%c0_107, %c32_108], %236 {strides = array<i32>} : memref<1x128xf32, #tpu.memory_space<vmem>>, vector<1x32xf32>,
    %c1_109 = arith.constant 1 : index
    %c0_110 = arith.constant 0 : index
    %c0_111 = arith.constant 0 : index
    %238 = vector.load %arg2[%c1_109, %c0_110, %c0_111] : memref<3x32x128xf32, #tpu.memory_space<vmem>>, vector<1x32x128xf32>
    %239 = vector.shape_cast %238 : vector<1x32x128xf32> to vector<32x128xf32>
    %cst_112 = arith.constant dense<0.000000e+00> : vector<1x128xf32>
    %240 = tpu.matmul %236, %239, %cst_112 {dimension_numbers = #tpu.dot_dimension_numbers<[1], [0], [0], [1], [0, 0, 1, 1], [], []>} : vector<1x32xf32>, vector<32x128xf32>, vector<1x128xf32> -> vector<1x128xf32>
    %c2_113 = arith.constant 2 : index
    %c0_114 = arith.constant 0 : index
    %c0_115 = arith.constant 0 : index
    %241 = vector.load %arg4[%c2_113, %c0_114, %c0_115] : memref<4x1x128xf32, #tpu.memory_space<vmem>>, vector<1x1x128xf32>
    %242 = vector.shape_cast %241 : vector<1x1x128xf32> to vector<1x128xf32>
    %243 = arith.addf %240, %242 : vector<1x128xf32>
    %244 = vector.extract_strided_slice %190 {offsets = [0, 256], sizes = [1, 128], strides = [1, 1]} : vector<1x512xf32> to vector<1x128xf32>
    %245 = arith.addf %243, %244 : vector<1x128xf32>
    %cst_116 = arith.constant 5.000000e-01 : f32
    %246 = vector.broadcast %cst_116 : f32 to vector<1x128xf32>
    %247 = arith.mulf %246, %245 : vector<1x128xf32>
    %248 = math.tanh %247 : vector<1x128xf32>
    %cst_117 = arith.constant 5.000000e-01 : f32
    %249 = vector.broadcast %cst_117 : f32 to vector<1x128xf32>
    %250 = arith.mulf %249, %248 : vector<1x128xf32>
    %cst_118 = arith.constant 5.000000e-01 : f32
    %251 = vector.broadcast %cst_118 : f32 to vector<1x128xf32>
    %252 = arith.addf %250, %251 : vector<1x128xf32>
    %253 = vector.extract_strided_slice %252 {offsets = [0, 0], sizes = [1, 32], strides = [1, 1]} : vector<1x128xf32> to vector<1x32xf32>
    %254 = vector.extract_strided_slice %252 {offsets = [0, 32], sizes = [1, 32], strides = [1, 1]} : vector<1x128xf32> to vector<1x32xf32>
    %255 = vector.extract_strided_slice %252 {offsets = [0, 96], sizes = [1, 32], strides = [1, 1]} : vector<1x128xf32> to vector<1x32xf32>
    %256 = vector.extract_strided_slice %245 {offsets = [0, 64], sizes = [1, 32], strides = [1, 1]} : vector<1x128xf32> to vector<1x32xf32>
    %257 = math.tanh %256 : vector<1x32xf32>
    %258 = arith.mulf %254, %158 : vector<1x32xf32>
    %259 = arith.mulf %253, %257 : vector<1x32xf32>
    %260 = arith.addf %258, %259 : vector<1x32xf32>
    %261 = math.tanh %260 : vector<1x32xf32>
    %262 = arith.mulf %255, %261 : vector<1x32xf32>
    %c0_119 = arith.constant 0 : index
    %c64_120 = arith.constant 64 : index
    %263 = vector.load %arg8[%c0_119, %c64_120] : memref<1x128xf32, #tpu.memory_space<vmem>>, vector<1x32xf32>
    tpu.vector_store %arg8[%c0_119, %c64_120], %262 {strides = array<i32>} : memref<1x128xf32, #tpu.memory_space<vmem>>, vector<1x32xf32>,
    %c2_121 = arith.constant 2 : index
    %c0_122 = arith.constant 0 : index
    %c0_123 = arith.constant 0 : index
    %264 = vector.load %arg2[%c2_121, %c0_122, %c0_123] : memref<3x32x128xf32, #tpu.memory_space<vmem>>, vector<1x32x128xf32>
    %265 = vector.shape_cast %264 : vector<1x32x128xf32> to vector<32x128xf32>
    %cst_124 = arith.constant dense<0.000000e+00> : vector<1x128xf32>
    %266 = tpu.matmul %262, %265, %cst_124 {dimension_numbers = #tpu.dot_dimension_numbers<[1], [0], [0], [1], [0, 0, 1, 1], [], []>} : vector<1x32xf32>, vector<32x128xf32>, vector<1x128xf32> -> vector<1x128xf32>
    %c3_125 = arith.constant 3 : index
    %c0_126 = arith.constant 0 : index
    %c0_127 = arith.constant 0 : index
    %267 = vector.load %arg4[%c3_125, %c0_126, %c0_127] : memref<4x1x128xf32, #tpu.memory_space<vmem>>, vector<1x1x128xf32>
    %268 = vector.shape_cast %267 : vector<1x1x128xf32> to vector<1x128xf32>
    %269 = arith.addf %266, %268 : vector<1x128xf32>
    %270 = vector.extract_strided_slice %190 {offsets = [0, 384], sizes = [1, 128], strides = [1, 1]} : vector<1x512xf32> to vector<1x128xf32>
    %271 = arith.addf %269, %270 : vector<1x128xf32>
    %cst_128 = arith.constant 5.000000e-01 : f32
    %272 = vector.broadcast %cst_128 : f32 to vector<1x128xf32>
    %273 = arith.mulf %272, %271 : vector<1x128xf32>
    %274 = math.tanh %273 : vector<1x128xf32>
    %cst_129 = arith.constant 5.000000e-01 : f32
    %275 = vector.broadcast %cst_129 : f32 to vector<1x128xf32>
    %276 = arith.mulf %275, %274 : vector<1x128xf32>
    %cst_130 = arith.constant 5.000000e-01 : f32
    %277 = vector.broadcast %cst_130 : f32 to vector<1x128xf32>
    %278 = arith.addf %276, %277 : vector<1x128xf32>
    %279 = vector.extract_strided_slice %278 {offsets = [0, 0], sizes = [1, 32], strides = [1, 1]} : vector<1x128xf32> to vector<1x32xf32>
    %280 = vector.extract_strided_slice %278 {offsets = [0, 32], sizes = [1, 32], strides = [1, 1]} : vector<1x128xf32> to vector<1x32xf32>
    %281 = vector.extract_strided_slice %278 {offsets = [0, 96], sizes = [1, 32], strides = [1, 1]} : vector<1x128xf32> to vector<1x32xf32>
    %282 = vector.extract_strided_slice %271 {offsets = [0, 64], sizes = [1, 32], strides = [1, 1]} : vector<1x128xf32> to vector<1x32xf32>
    %283 = math.tanh %282 : vector<1x32xf32>
    %284 = arith.mulf %280, %184 : vector<1x32xf32>
    %285 = arith.mulf %279, %283 : vector<1x32xf32>
    %286 = arith.addf %284, %285 : vector<1x32xf32>
    %287 = math.tanh %286 : vector<1x32xf32>
    %288 = arith.mulf %281, %287 : vector<1x32xf32>
    %c0_131 = arith.constant 0 : index
    %c96_132 = arith.constant 96 : index
    %289 = vector.load %arg8[%c0_131, %c96_132] : memref<1x128xf32, #tpu.memory_space<vmem>>, vector<1x32xf32>
    tpu.vector_store %arg8[%c0_131, %c96_132], %288 {strides = array<i32>} : memref<1x128xf32, #tpu.memory_space<vmem>>, vector<1x32xf32>,
    %c0_133 = arith.constant 0 : index
    %c0_134 = arith.constant 0 : index
    %290 = vector.load %arg8[%c0_133, %c0_134] : memref<1x128xf32, #tpu.memory_space<vmem>>, vector<1x128xf32>
    %c0_135 = arith.constant 0 : index
    %c0_136 = arith.constant 0 : index
    %291 = vector.load %arg3[%c0_135, %c0_136] : memref<128x512xf32, #tpu.memory_space<vmem>>, vector<128x512xf32>
    %cst_137 = arith.constant dense<0.000000e+00> : vector<1x512xf32>
    %292 = tpu.matmul %290, %291, %cst_137 {dimension_numbers = #tpu.dot_dimension_numbers<[1], [0], [0], [1], [0, 0, 1, 1], [], []>} : vector<1x128xf32>, vector<128x512xf32>, vector<1x512xf32> -> vector<1x512xf32>
    %293 = vector.extract_strided_slice %6 {offsets = [3, 0], sizes = [1, 128], strides = [1, 1]} : vector<8x128xf32> to vector<1x128xf32>
    %294 = vector.extract_strided_slice %292 {offsets = [0, 0], sizes = [1, 128], strides = [1, 1]} : vector<1x512xf32> to vector<1x128xf32>
    %295 = arith.addf %293, %294 : vector<1x128xf32>
    %cst_138 = arith.constant 5.000000e-01 : f32
    %296 = vector.broadcast %cst_138 : f32 to vector<1x128xf32>
    %297 = arith.mulf %296, %295 : vector<1x128xf32>
    %298 = math.tanh %297 : vector<1x128xf32>
    %cst_139 = arith.constant 5.000000e-01 : f32
    %299 = vector.broadcast %cst_139 : f32 to vector<1x128xf32>
    %300 = arith.mulf %299, %298 : vector<1x128xf32>
    %cst_140 = arith.constant 5.000000e-01 : f32
    %301 = vector.broadcast %cst_140 : f32 to vector<1x128xf32>
    %302 = arith.addf %300, %301 : vector<1x128xf32>
    %303 = vector.extract_strided_slice %302 {offsets = [0, 0], sizes = [1, 32], strides = [1, 1]} : vector<1x128xf32> to vector<1x32xf32>
    %304 = vector.extract_strided_slice %302 {offsets = [0, 32], sizes = [1, 32], strides = [1, 1]} : vector<1x128xf32> to vector<1x32xf32>
    %305 = vector.extract_strided_slice %302 {offsets = [0, 96], sizes = [1, 32], strides = [1, 1]} : vector<1x128xf32> to vector<1x32xf32>
    %306 = vector.extract_strided_slice %295 {offsets = [0, 64], sizes = [1, 32], strides = [1, 1]} : vector<1x128xf32> to vector<1x32xf32>
    %307 = math.tanh %306 : vector<1x32xf32>
    %308 = arith.mulf %304, %208 : vector<1x32xf32>
    %309 = arith.mulf %303, %307 : vector<1x32xf32>
    %310 = arith.addf %308, %309 : vector<1x32xf32>
    %311 = math.tanh %310 : vector<1x32xf32>
    %312 = arith.mulf %305, %311 : vector<1x32xf32>
    %c0_141 = arith.constant 0 : index
    %c0_142 = arith.constant 0 : index
    %313 = vector.load %arg8[%c0_141, %c0_142] : memref<1x128xf32, #tpu.memory_space<vmem>>, vector<1x32xf32>
    tpu.vector_store %arg8[%c0_141, %c0_142], %312 {strides = array<i32>} : memref<1x128xf32, #tpu.memory_space<vmem>>, vector<1x32xf32>,
    %c0_143 = arith.constant 0 : index
    %c0_144 = arith.constant 0 : index
    %c0_145 = arith.constant 0 : index
    %314 = vector.load %arg2[%c0_143, %c0_144, %c0_145] : memref<3x32x128xf32, #tpu.memory_space<vmem>>, vector<1x32x128xf32>
    %315 = vector.shape_cast %314 : vector<1x32x128xf32> to vector<32x128xf32>
    %cst_146 = arith.constant dense<0.000000e+00> : vector<1x128xf32>
    %316 = tpu.matmul %312, %315, %cst_146 {dimension_numbers = #tpu.dot_dimension_numbers<[1], [0], [0], [1], [0, 0, 1, 1], [], []>} : vector<1x32xf32>, vector<32x128xf32>, vector<1x128xf32> -> vector<1x128xf32>
    %c1_147 = arith.constant 1 : index
    %c0_148 = arith.constant 0 : index
    %c0_149 = arith.constant 0 : index
    %317 = vector.load %arg4[%c1_147, %c0_148, %c0_149] : memref<4x1x128xf32, #tpu.memory_space<vmem>>, vector<1x1x128xf32>
    %318 = vector.shape_cast %317 : vector<1x1x128xf32> to vector<1x128xf32>
    %319 = arith.addf %316, %318 : vector<1x128xf32>
    %320 = vector.extract_strided_slice %292 {offsets = [0, 128], sizes = [1, 128], strides = [1, 1]} : vector<1x512xf32> to vector<1x128xf32>
    %321 = arith.addf %319, %320 : vector<1x128xf32>
    %cst_150 = arith.constant 5.000000e-01 : f32
    %322 = vector.broadcast %cst_150 : f32 to vector<1x128xf32>
    %323 = arith.mulf %322, %321 : vector<1x128xf32>
    %324 = math.tanh %323 : vector<1x128xf32>
    %cst_151 = arith.constant 5.000000e-01 : f32
    %325 = vector.broadcast %cst_151 : f32 to vector<1x128xf32>
    %326 = arith.mulf %325, %324 : vector<1x128xf32>
    %cst_152 = arith.constant 5.000000e-01 : f32
    %327 = vector.broadcast %cst_152 : f32 to vector<1x128xf32>
    %328 = arith.addf %326, %327 : vector<1x128xf32>
    %329 = vector.extract_strided_slice %328 {offsets = [0, 0], sizes = [1, 32], strides = [1, 1]} : vector<1x128xf32> to vector<1x32xf32>
    %330 = vector.extract_strided_slice %328 {offsets = [0, 32], sizes = [1, 32], strides = [1, 1]} : vector<1x128xf32> to vector<1x32xf32>
    %331 = vector.extract_strided_slice %328 {offsets = [0, 96], sizes = [1, 32], strides = [1, 1]} : vector<1x128xf32> to vector<1x32xf32>
    %332 = vector.extract_strided_slice %321 {offsets = [0, 64], sizes = [1, 32], strides = [1, 1]} : vector<1x128xf32> to vector<1x32xf32>
    %333 = math.tanh %332 : vector<1x32xf32>
    %334 = arith.mulf %330, %234 : vector<1x32xf32>
    %335 = arith.mulf %329, %333 : vector<1x32xf32>
    %336 = arith.addf %334, %335 : vector<1x32xf32>
    %337 = math.tanh %336 : vector<1x32xf32>
    %338 = arith.mulf %331, %337 : vector<1x32xf32>
    %c0_153 = arith.constant 0 : index
    %c32_154 = arith.constant 32 : index
    %339 = vector.load %arg8[%c0_153, %c32_154] : memref<1x128xf32, #tpu.memory_space<vmem>>, vector<1x32xf32>
    tpu.vector_store %arg8[%c0_153, %c32_154], %338 {strides = array<i32>} : memref<1x128xf32, #tpu.memory_space<vmem>>, vector<1x32xf32>,
    %c1_155 = arith.constant 1 : index
    %c0_156 = arith.constant 0 : index
    %c0_157 = arith.constant 0 : index
    %340 = vector.load %arg2[%c1_155, %c0_156, %c0_157] : memref<3x32x128xf32, #tpu.memory_space<vmem>>, vector<1x32x128xf32>
    %341 = vector.shape_cast %340 : vector<1x32x128xf32> to vector<32x128xf32>
    %cst_158 = arith.constant dense<0.000000e+00> : vector<1x128xf32>
    %342 = tpu.matmul %338, %341, %cst_158 {dimension_numbers = #tpu.dot_dimension_numbers<[1], [0], [0], [1], [0, 0, 1, 1], [], []>} : vector<1x32xf32>, vector<32x128xf32>, vector<1x128xf32> -> vector<1x128xf32>
    %c2_159 = arith.constant 2 : index
    %c0_160 = arith.constant 0 : index
    %c0_161 = arith.constant 0 : index
    %343 = vector.load %arg4[%c2_159, %c0_160, %c0_161] : memref<4x1x128xf32, #tpu.memory_space<vmem>>, vector<1x1x128xf32>
    %344 = vector.shape_cast %343 : vector<1x1x128xf32> to vector<1x128xf32>
    %345 = arith.addf %342, %344 : vector<1x128xf32>
    %346 = vector.extract_strided_slice %292 {offsets = [0, 256], sizes = [1, 128], strides = [1, 1]} : vector<1x512xf32> to vector<1x128xf32>
    %347 = arith.addf %345, %346 : vector<1x128xf32>
    %cst_162 = arith.constant 5.000000e-01 : f32
    %348 = vector.broadcast %cst_162 : f32 to vector<1x128xf32>
    %349 = arith.mulf %348, %347 : vector<1x128xf32>
    %350 = math.tanh %349 : vector<1x128xf32>
    %cst_163 = arith.constant 5.000000e-01 : f32
    %351 = vector.broadcast %cst_163 : f32 to vector<1x128xf32>
    %352 = arith.mulf %351, %350 : vector<1x128xf32>
    %cst_164 = arith.constant 5.000000e-01 : f32
    %353 = vector.broadcast %cst_164 : f32 to vector<1x128xf32>
    %354 = arith.addf %352, %353 : vector<1x128xf32>
    %355 = vector.extract_strided_slice %354 {offsets = [0, 0], sizes = [1, 32], strides = [1, 1]} : vector<1x128xf32> to vector<1x32xf32>
    %356 = vector.extract_strided_slice %354 {offsets = [0, 32], sizes = [1, 32], strides = [1, 1]} : vector<1x128xf32> to vector<1x32xf32>
    %357 = vector.extract_strided_slice %354 {offsets = [0, 96], sizes = [1, 32], strides = [1, 1]} : vector<1x128xf32> to vector<1x32xf32>
    %358 = vector.extract_strided_slice %347 {offsets = [0, 64], sizes = [1, 32], strides = [1, 1]} : vector<1x128xf32> to vector<1x32xf32>
    %359 = math.tanh %358 : vector<1x32xf32>
    %360 = arith.mulf %356, %260 : vector<1x32xf32>
    %361 = arith.mulf %355, %359 : vector<1x32xf32>
    %362 = arith.addf %360, %361 : vector<1x32xf32>
    %363 = math.tanh %362 : vector<1x32xf32>
    %364 = arith.mulf %357, %363 : vector<1x32xf32>
    %c0_165 = arith.constant 0 : index
    %c64_166 = arith.constant 64 : index
    %365 = vector.load %arg8[%c0_165, %c64_166] : memref<1x128xf32, #tpu.memory_space<vmem>>, vector<1x32xf32>
    tpu.vector_store %arg8[%c0_165, %c64_166], %364 {strides = array<i32>} : memref<1x128xf32, #tpu.memory_space<vmem>>, vector<1x32xf32>,
    %c2_167 = arith.constant 2 : index
    %c0_168 = arith.constant 0 : index
    %c0_169 = arith.constant 0 : index
    %366 = vector.load %arg2[%c2_167, %c0_168, %c0_169] : memref<3x32x128xf32, #tpu.memory_space<vmem>>, vector<1x32x128xf32>
    %367 = vector.shape_cast %366 : vector<1x32x128xf32> to vector<32x128xf32>
    %cst_170 = arith.constant dense<0.000000e+00> : vector<1x128xf32>
    %368 = tpu.matmul %364, %367, %cst_170 {dimension_numbers = #tpu.dot_dimension_numbers<[1], [0], [0], [1], [0, 0, 1, 1], [], []>} : vector<1x32xf32>, vector<32x128xf32>, vector<1x128xf32> -> vector<1x128xf32>
    %c3_171 = arith.constant 3 : index
    %c0_172 = arith.constant 0 : index
    %c0_173 = arith.constant 0 : index
    %369 = vector.load %arg4[%c3_171, %c0_172, %c0_173] : memref<4x1x128xf32, #tpu.memory_space<vmem>>, vector<1x1x128xf32>
    %370 = vector.shape_cast %369 : vector<1x1x128xf32> to vector<1x128xf32>
    %371 = arith.addf %368, %370 : vector<1x128xf32>
    %372 = vector.extract_strided_slice %292 {offsets = [0, 384], sizes = [1, 128], strides = [1, 1]} : vector<1x512xf32> to vector<1x128xf32>
    %373 = arith.addf %371, %372 : vector<1x128xf32>
    %cst_174 = arith.constant 5.000000e-01 : f32
    %374 = vector.broadcast %cst_174 : f32 to vector<1x128xf32>
    %375 = arith.mulf %374, %373 : vector<1x128xf32>
    %376 = math.tanh %375 : vector<1x128xf32>
    %cst_175 = arith.constant 5.000000e-01 : f32
    %377 = vector.broadcast %cst_175 : f32 to vector<1x128xf32>
    %378 = arith.mulf %377, %376 : vector<1x128xf32>
    %cst_176 = arith.constant 5.000000e-01 : f32
    %379 = vector.broadcast %cst_176 : f32 to vector<1x128xf32>
    %380 = arith.addf %378, %379 : vector<1x128xf32>
    %381 = vector.extract_strided_slice %380 {offsets = [0, 0], sizes = [1, 32], strides = [1, 1]} : vector<1x128xf32> to vector<1x32xf32>
    %382 = vector.extract_strided_slice %380 {offsets = [0, 32], sizes = [1, 32], strides = [1, 1]} : vector<1x128xf32> to vector<1x32xf32>
    %383 = vector.extract_strided_slice %380 {offsets = [0, 96], sizes = [1, 32], strides = [1, 1]} : vector<1x128xf32> to vector<1x32xf32>
    %384 = vector.extract_strided_slice %373 {offsets = [0, 64], sizes = [1, 32], strides = [1, 1]} : vector<1x128xf32> to vector<1x32xf32>
    %385 = math.tanh %384 : vector<1x32xf32>
    %386 = arith.mulf %382, %286 : vector<1x32xf32>
    %387 = arith.mulf %381, %385 : vector<1x32xf32>
    %388 = arith.addf %386, %387 : vector<1x32xf32>
    %389 = math.tanh %388 : vector<1x32xf32>
    %390 = arith.mulf %383, %389 : vector<1x32xf32>
    %c0_177 = arith.constant 0 : index
    %c96_178 = arith.constant 96 : index
    %391 = vector.load %arg8[%c0_177, %c96_178] : memref<1x128xf32, #tpu.memory_space<vmem>>, vector<1x32xf32>
    tpu.vector_store %arg8[%c0_177, %c96_178], %390 {strides = array<i32>} : memref<1x128xf32, #tpu.memory_space<vmem>>, vector<1x32xf32>,
    %c0_179 = arith.constant 0 : index
    %c0_180 = arith.constant 0 : index
    %392 = vector.load %arg8[%c0_179, %c0_180] : memref<1x128xf32, #tpu.memory_space<vmem>>, vector<1x128xf32>
    %c0_181 = arith.constant 0 : index
    %c0_182 = arith.constant 0 : index
    %393 = vector.load %arg3[%c0_181, %c0_182] : memref<128x512xf32, #tpu.memory_space<vmem>>, vector<128x512xf32>
    %cst_183 = arith.constant dense<0.000000e+00> : vector<1x512xf32>
    %394 = tpu.matmul %392, %393, %cst_183 {dimension_numbers = #tpu.dot_dimension_numbers<[1], [0], [0], [1], [0, 0, 1, 1], [], []>} : vector<1x128xf32>, vector<128x512xf32>, vector<1x512xf32> -> vector<1x512xf32>
    %395 = vector.extract_strided_slice %6 {offsets = [4, 0], sizes = [1, 128], strides = [1, 1]} : vector<8x128xf32> to vector<1x128xf32>
    %396 = vector.extract_strided_slice %394 {offsets = [0, 0], sizes = [1, 128], strides = [1, 1]} : vector<1x512xf32> to vector<1x128xf32>
    %397 = arith.addf %395, %396 : vector<1x128xf32>
    %cst_184 = arith.constant 5.000000e-01 : f32
    %398 = vector.broadcast %cst_184 : f32 to vector<1x128xf32>
    %399 = arith.mulf %398, %397 : vector<1x128xf32>
    %400 = math.tanh %399 : vector<1x128xf32>
    %cst_185 = arith.constant 5.000000e-01 : f32
    %401 = vector.broadcast %cst_185 : f32 to vector<1x128xf32>
    %402 = arith.mulf %401, %400 : vector<1x128xf32>
    %cst_186 = arith.constant 5.000000e-01 : f32
    %403 = vector.broadcast %cst_186 : f32 to vector<1x128xf32>
    %404 = arith.addf %402, %403 : vector<1x128xf32>
    %405 = vector.extract_strided_slice %404 {offsets = [0, 0], sizes = [1, 32], strides = [1, 1]} : vector<1x128xf32> to vector<1x32xf32>
    %406 = vector.extract_strided_slice %404 {offsets = [0, 32], sizes = [1, 32], strides = [1, 1]} : vector<1x128xf32> to vector<1x32xf32>
    %407 = vector.extract_strided_slice %404 {offsets = [0, 96], sizes = [1, 32], strides = [1, 1]} : vector<1x128xf32> to vector<1x32xf32>
    %408 = vector.extract_strided_slice %397 {offsets = [0, 64], sizes = [1, 32], strides = [1, 1]} : vector<1x128xf32> to vector<1x32xf32>
    %409 = math.tanh %408 : vector<1x32xf32>
    %410 = arith.mulf %406, %310 : vector<1x32xf32>
    %411 = arith.mulf %405, %409 : vector<1x32xf32>
    %412 = arith.addf %410, %411 : vector<1x32xf32>
    %413 = math.tanh %412 : vector<1x32xf32>
    %414 = arith.mulf %407, %413 : vector<1x32xf32>
    %c0_187 = arith.constant 0 : index
    %c0_188 = arith.constant 0 : index
    %415 = vector.load %arg8[%c0_187, %c0_188] : memref<1x128xf32, #tpu.memory_space<vmem>>, vector<1x32xf32>
    tpu.vector_store %arg8[%c0_187, %c0_188], %414 {strides = array<i32>} : memref<1x128xf32, #tpu.memory_space<vmem>>, vector<1x32xf32>,
    %c0_189 = arith.constant 0 : index
    %c0_190 = arith.constant 0 : index
    %c0_191 = arith.constant 0 : index
    %416 = vector.load %arg2[%c0_189, %c0_190, %c0_191] : memref<3x32x128xf32, #tpu.memory_space<vmem>>, vector<1x32x128xf32>
    %417 = vector.shape_cast %416 : vector<1x32x128xf32> to vector<32x128xf32>
    %cst_192 = arith.constant dense<0.000000e+00> : vector<1x128xf32>
    %418 = tpu.matmul %414, %417, %cst_192 {dimension_numbers = #tpu.dot_dimension_numbers<[1], [0], [0], [1], [0, 0, 1, 1], [], []>} : vector<1x32xf32>, vector<32x128xf32>, vector<1x128xf32> -> vector<1x128xf32>
    %c1_193 = arith.constant 1 : index
    %c0_194 = arith.constant 0 : index
    %c0_195 = arith.constant 0 : index
    %419 = vector.load %arg4[%c1_193, %c0_194, %c0_195] : memref<4x1x128xf32, #tpu.memory_space<vmem>>, vector<1x1x128xf32>
    %420 = vector.shape_cast %419 : vector<1x1x128xf32> to vector<1x128xf32>
    %421 = arith.addf %418, %420 : vector<1x128xf32>
    %422 = vector.extract_strided_slice %394 {offsets = [0, 128], sizes = [1, 128], strides = [1, 1]} : vector<1x512xf32> to vector<1x128xf32>
    %423 = arith.addf %421, %422 : vector<1x128xf32>
    %cst_196 = arith.constant 5.000000e-01 : f32
    %424 = vector.broadcast %cst_196 : f32 to vector<1x128xf32>
    %425 = arith.mulf %424, %423 : vector<1x128xf32>
    %426 = math.tanh %425 : vector<1x128xf32>
    %cst_197 = arith.constant 5.000000e-01 : f32
    %427 = vector.broadcast %cst_197 : f32 to vector<1x128xf32>
    %428 = arith.mulf %427, %426 : vector<1x128xf32>
    %cst_198 = arith.constant 5.000000e-01 : f32
    %429 = vector.broadcast %cst_198 : f32 to vector<1x128xf32>
    %430 = arith.addf %428, %429 : vector<1x128xf32>
    %431 = vector.extract_strided_slice %430 {offsets = [0, 0], sizes = [1, 32], strides = [1, 1]} : vector<1x128xf32> to vector<1x32xf32>
    %432 = vector.extract_strided_slice %430 {offsets = [0, 32], sizes = [1, 32], strides = [1, 1]} : vector<1x128xf32> to vector<1x32xf32>
    %433 = vector.extract_strided_slice %430 {offsets = [0, 96], sizes = [1, 32], strides = [1, 1]} : vector<1x128xf32> to vector<1x32xf32>
    %434 = vector.extract_strided_slice %423 {offsets = [0, 64], sizes = [1, 32], strides = [1, 1]} : vector<1x128xf32> to vector<1x32xf32>
    %435 = math.tanh %434 : vector<1x32xf32>
    %436 = arith.mulf %432, %336 : vector<1x32xf32>
    %437 = arith.mulf %431, %435 : vector<1x32xf32>
    %438 = arith.addf %436, %437 : vector<1x32xf32>
    %439 = math.tanh %438 : vector<1x32xf32>
    %440 = arith.mulf %433, %439 : vector<1x32xf32>
    %c0_199 = arith.constant 0 : index
    %c32_200 = arith.constant 32 : index
    %441 = vector.load %arg8[%c0_199, %c32_200] : memref<1x128xf32, #tpu.memory_space<vmem>>, vector<1x32xf32>
    tpu.vector_store %arg8[%c0_199, %c32_200], %440 {strides = array<i32>} : memref<1x128xf32, #tpu.memory_space<vmem>>, vector<1x32xf32>,
    %c1_201 = arith.constant 1 : index
    %c0_202 = arith.constant 0 : index
    %c0_203 = arith.constant 0 : index
    %442 = vector.load %arg2[%c1_201, %c0_202, %c0_203] : memref<3x32x128xf32, #tpu.memory_space<vmem>>, vector<1x32x128xf32>
    %443 = vector.shape_cast %442 : vector<1x32x128xf32> to vector<32x128xf32>
    %cst_204 = arith.constant dense<0.000000e+00> : vector<1x128xf32>
    %444 = tpu.matmul %440, %443, %cst_204 {dimension_numbers = #tpu.dot_dimension_numbers<[1], [0], [0], [1], [0, 0, 1, 1], [], []>} : vector<1x32xf32>, vector<32x128xf32>, vector<1x128xf32> -> vector<1x128xf32>
    %c2_205 = arith.constant 2 : index
    %c0_206 = arith.constant 0 : index
    %c0_207 = arith.constant 0 : index
    %445 = vector.load %arg4[%c2_205, %c0_206, %c0_207] : memref<4x1x128xf32, #tpu.memory_space<vmem>>, vector<1x1x128xf32>
    %446 = vector.shape_cast %445 : vector<1x1x128xf32> to vector<1x128xf32>
    %447 = arith.addf %444, %446 : vector<1x128xf32>
    %448 = vector.extract_strided_slice %394 {offsets = [0, 256], sizes = [1, 128], strides = [1, 1]} : vector<1x512xf32> to vector<1x128xf32>
    %449 = arith.addf %447, %448 : vector<1x128xf32>
    %cst_208 = arith.constant 5.000000e-01 : f32
    %450 = vector.broadcast %cst_208 : f32 to vector<1x128xf32>
    %451 = arith.mulf %450, %449 : vector<1x128xf32>
    %452 = math.tanh %451 : vector<1x128xf32>
    %cst_209 = arith.constant 5.000000e-01 : f32
    %453 = vector.broadcast %cst_209 : f32 to vector<1x128xf32>
    %454 = arith.mulf %453, %452 : vector<1x128xf32>
    %cst_210 = arith.constant 5.000000e-01 : f32
    %455 = vector.broadcast %cst_210 : f32 to vector<1x128xf32>
    %456 = arith.addf %454, %455 : vector<1x128xf32>
    %457 = vector.extract_strided_slice %456 {offsets = [0, 0], sizes = [1, 32], strides = [1, 1]} : vector<1x128xf32> to vector<1x32xf32>
    %458 = vector.extract_strided_slice %456 {offsets = [0, 32], sizes = [1, 32], strides = [1, 1]} : vector<1x128xf32> to vector<1x32xf32>
    %459 = vector.extract_strided_slice %456 {offsets = [0, 96], sizes = [1, 32], strides = [1, 1]} : vector<1x128xf32> to vector<1x32xf32>
    %460 = vector.extract_strided_slice %449 {offsets = [0, 64], sizes = [1, 32], strides = [1, 1]} : vector<1x128xf32> to vector<1x32xf32>
    %461 = math.tanh %460 : vector<1x32xf32>
    %462 = arith.mulf %458, %362 : vector<1x32xf32>
    %463 = arith.mulf %457, %461 : vector<1x32xf32>
    %464 = arith.addf %462, %463 : vector<1x32xf32>
    %465 = math.tanh %464 : vector<1x32xf32>
    %466 = arith.mulf %459, %465 : vector<1x32xf32>
    %c0_211 = arith.constant 0 : index
    %c64_212 = arith.constant 64 : index
    %467 = vector.load %arg8[%c0_211, %c64_212] : memref<1x128xf32, #tpu.memory_space<vmem>>, vector<1x32xf32>
    tpu.vector_store %arg8[%c0_211, %c64_212], %466 {strides = array<i32>} : memref<1x128xf32, #tpu.memory_space<vmem>>, vector<1x32xf32>,
    %c2_213 = arith.constant 2 : index
    %c0_214 = arith.constant 0 : index
    %c0_215 = arith.constant 0 : index
    %468 = vector.load %arg2[%c2_213, %c0_214, %c0_215] : memref<3x32x128xf32, #tpu.memory_space<vmem>>, vector<1x32x128xf32>
    %469 = vector.shape_cast %468 : vector<1x32x128xf32> to vector<32x128xf32>
    %cst_216 = arith.constant dense<0.000000e+00> : vector<1x128xf32>
    %470 = tpu.matmul %466, %469, %cst_216 {dimension_numbers = #tpu.dot_dimension_numbers<[1], [0], [0], [1], [0, 0, 1, 1], [], []>} : vector<1x32xf32>, vector<32x128xf32>, vector<1x128xf32> -> vector<1x128xf32>
    %c3_217 = arith.constant 3 : index
    %c0_218 = arith.constant 0 : index
    %c0_219 = arith.constant 0 : index
    %471 = vector.load %arg4[%c3_217, %c0_218, %c0_219] : memref<4x1x128xf32, #tpu.memory_space<vmem>>, vector<1x1x128xf32>
    %472 = vector.shape_cast %471 : vector<1x1x128xf32> to vector<1x128xf32>
    %473 = arith.addf %470, %472 : vector<1x128xf32>
    %474 = vector.extract_strided_slice %394 {offsets = [0, 384], sizes = [1, 128], strides = [1, 1]} : vector<1x512xf32> to vector<1x128xf32>
    %475 = arith.addf %473, %474 : vector<1x128xf32>
    %cst_220 = arith.constant 5.000000e-01 : f32
    %476 = vector.broadcast %cst_220 : f32 to vector<1x128xf32>
    %477 = arith.mulf %476, %475 : vector<1x128xf32>
    %478 = math.tanh %477 : vector<1x128xf32>
    %cst_221 = arith.constant 5.000000e-01 : f32
    %479 = vector.broadcast %cst_221 : f32 to vector<1x128xf32>
    %480 = arith.mulf %479, %478 : vector<1x128xf32>
    %cst_222 = arith.constant 5.000000e-01 : f32
    %481 = vector.broadcast %cst_222 : f32 to vector<1x128xf32>
    %482 = arith.addf %480, %481 : vector<1x128xf32>
    %483 = vector.extract_strided_slice %482 {offsets = [0, 0], sizes = [1, 32], strides = [1, 1]} : vector<1x128xf32> to vector<1x32xf32>
    %484 = vector.extract_strided_slice %482 {offsets = [0, 32], sizes = [1, 32], strides = [1, 1]} : vector<1x128xf32> to vector<1x32xf32>
    %485 = vector.extract_strided_slice %482 {offsets = [0, 96], sizes = [1, 32], strides = [1, 1]} : vector<1x128xf32> to vector<1x32xf32>
    %486 = vector.extract_strided_slice %475 {offsets = [0, 64], sizes = [1, 32], strides = [1, 1]} : vector<1x128xf32> to vector<1x32xf32>
    %487 = math.tanh %486 : vector<1x32xf32>
    %488 = arith.mulf %484, %388 : vector<1x32xf32>
    %489 = arith.mulf %483, %487 : vector<1x32xf32>
    %490 = arith.addf %488, %489 : vector<1x32xf32>
    %491 = math.tanh %490 : vector<1x32xf32>
    %492 = arith.mulf %485, %491 : vector<1x32xf32>
    %c0_223 = arith.constant 0 : index
    %c96_224 = arith.constant 96 : index
    %493 = vector.load %arg8[%c0_223, %c96_224] : memref<1x128xf32, #tpu.memory_space<vmem>>, vector<1x32xf32>
    tpu.vector_store %arg8[%c0_223, %c96_224], %492 {strides = array<i32>} : memref<1x128xf32, #tpu.memory_space<vmem>>, vector<1x32xf32>,
    %c0_225 = arith.constant 0 : index
    %c0_226 = arith.constant 0 : index
    %494 = vector.load %arg8[%c0_225, %c0_226] : memref<1x128xf32, #tpu.memory_space<vmem>>, vector<1x128xf32>
    %c0_227 = arith.constant 0 : index
    %c0_228 = arith.constant 0 : index
    %495 = vector.load %arg3[%c0_227, %c0_228] : memref<128x512xf32, #tpu.memory_space<vmem>>, vector<128x512xf32>
    %cst_229 = arith.constant dense<0.000000e+00> : vector<1x512xf32>
    %496 = tpu.matmul %494, %495, %cst_229 {dimension_numbers = #tpu.dot_dimension_numbers<[1], [0], [0], [1], [0, 0, 1, 1], [], []>} : vector<1x128xf32>, vector<128x512xf32>, vector<1x512xf32> -> vector<1x512xf32>
    %497 = vector.extract_strided_slice %6 {offsets = [5, 0], sizes = [1, 128], strides = [1, 1]} : vector<8x128xf32> to vector<1x128xf32>
    %498 = vector.extract_strided_slice %496 {offsets = [0, 0], sizes = [1, 128], strides = [1, 1]} : vector<1x512xf32> to vector<1x128xf32>
    %499 = arith.addf %497, %498 : vector<1x128xf32>
    %cst_230 = arith.constant 5.000000e-01 : f32
    %500 = vector.broadcast %cst_230 : f32 to vector<1x128xf32>
    %501 = arith.mulf %500, %499 : vector<1x128xf32>
    %502 = math.tanh %501 : vector<1x128xf32>
    %cst_231 = arith.constant 5.000000e-01 : f32
    %503 = vector.broadcast %cst_231 : f32 to vector<1x128xf32>
    %504 = arith.mulf %503, %502 : vector<1x128xf32>
    %cst_232 = arith.constant 5.000000e-01 : f32
    %505 = vector.broadcast %cst_232 : f32 to vector<1x128xf32>
    %506 = arith.addf %504, %505 : vector<1x128xf32>
    %507 = vector.extract_strided_slice %506 {offsets = [0, 0], sizes = [1, 32], strides = [1, 1]} : vector<1x128xf32> to vector<1x32xf32>
    %508 = vector.extract_strided_slice %506 {offsets = [0, 32], sizes = [1, 32], strides = [1, 1]} : vector<1x128xf32> to vector<1x32xf32>
    %509 = vector.extract_strided_slice %506 {offsets = [0, 96], sizes = [1, 32], strides = [1, 1]} : vector<1x128xf32> to vector<1x32xf32>
    %510 = vector.extract_strided_slice %499 {offsets = [0, 64], sizes = [1, 32], strides = [1, 1]} : vector<1x128xf32> to vector<1x32xf32>
    %511 = math.tanh %510 : vector<1x32xf32>
    %512 = arith.mulf %508, %412 : vector<1x32xf32>
    %513 = arith.mulf %507, %511 : vector<1x32xf32>
    %514 = arith.addf %512, %513 : vector<1x32xf32>
    %515 = math.tanh %514 : vector<1x32xf32>
    %516 = arith.mulf %509, %515 : vector<1x32xf32>
    %c0_233 = arith.constant 0 : index
    %c0_234 = arith.constant 0 : index
    %517 = vector.load %arg8[%c0_233, %c0_234] : memref<1x128xf32, #tpu.memory_space<vmem>>, vector<1x32xf32>
    tpu.vector_store %arg8[%c0_233, %c0_234], %516 {strides = array<i32>} : memref<1x128xf32, #tpu.memory_space<vmem>>, vector<1x32xf32>,
    %c0_235 = arith.constant 0 : index
    %c0_236 = arith.constant 0 : index
    %c0_237 = arith.constant 0 : index
    %518 = vector.load %arg2[%c0_235, %c0_236, %c0_237] : memref<3x32x128xf32, #tpu.memory_space<vmem>>, vector<1x32x128xf32>
    %519 = vector.shape_cast %518 : vector<1x32x128xf32> to vector<32x128xf32>
    %cst_238 = arith.constant dense<0.000000e+00> : vector<1x128xf32>
    %520 = tpu.matmul %516, %519, %cst_238 {dimension_numbers = #tpu.dot_dimension_numbers<[1], [0], [0], [1], [0, 0, 1, 1], [], []>} : vector<1x32xf32>, vector<32x128xf32>, vector<1x128xf32> -> vector<1x128xf32>
    %c1_239 = arith.constant 1 : index
    %c0_240 = arith.constant 0 : index
    %c0_241 = arith.constant 0 : index
    %521 = vector.load %arg4[%c1_239, %c0_240, %c0_241] : memref<4x1x128xf32, #tpu.memory_space<vmem>>, vector<1x1x128xf32>
    %522 = vector.shape_cast %521 : vector<1x1x128xf32> to vector<1x128xf32>
    %523 = arith.addf %520, %522 : vector<1x128xf32>
    %524 = vector.extract_strided_slice %496 {offsets = [0, 128], sizes = [1, 128], strides = [1, 1]} : vector<1x512xf32> to vector<1x128xf32>
    %525 = arith.addf %523, %524 : vector<1x128xf32>
    %cst_242 = arith.constant 5.000000e-01 : f32
    %526 = vector.broadcast %cst_242 : f32 to vector<1x128xf32>
    %527 = arith.mulf %526, %525 : vector<1x128xf32>
    %528 = math.tanh %527 : vector<1x128xf32>
    %cst_243 = arith.constant 5.000000e-01 : f32
    %529 = vector.broadcast %cst_243 : f32 to vector<1x128xf32>
    %530 = arith.mulf %529, %528 : vector<1x128xf32>
    %cst_244 = arith.constant 5.000000e-01 : f32
    %531 = vector.broadcast %cst_244 : f32 to vector<1x128xf32>
    %532 = arith.addf %530, %531 : vector<1x128xf32>
    %533 = vector.extract_strided_slice %532 {offsets = [0, 0], sizes = [1, 32], strides = [1, 1]} : vector<1x128xf32> to vector<1x32xf32>
    %534 = vector.extract_strided_slice %532 {offsets = [0, 32], sizes = [1, 32], strides = [1, 1]} : vector<1x128xf32> to vector<1x32xf32>
    %535 = vector.extract_strided_slice %532 {offsets = [0, 96], sizes = [1, 32], strides = [1, 1]} : vector<1x128xf32> to vector<1x32xf32>
    %536 = vector.extract_strided_slice %525 {offsets = [0, 64], sizes = [1, 32], strides = [1, 1]} : vector<1x128xf32> to vector<1x32xf32>
    %537 = math.tanh %536 : vector<1x32xf32>
    %538 = arith.mulf %534, %438 : vector<1x32xf32>
    %539 = arith.mulf %533, %537 : vector<1x32xf32>
    %540 = arith.addf %538, %539 : vector<1x32xf32>
    %541 = math.tanh %540 : vector<1x32xf32>
    %542 = arith.mulf %535, %541 : vector<1x32xf32>
    %c0_245 = arith.constant 0 : index
    %c32_246 = arith.constant 32 : index
    %543 = vector.load %arg8[%c0_245, %c32_246] : memref<1x128xf32, #tpu.memory_space<vmem>>, vector<1x32xf32>
    tpu.vector_store %arg8[%c0_245, %c32_246], %542 {strides = array<i32>} : memref<1x128xf32, #tpu.memory_space<vmem>>, vector<1x32xf32>,
    %c1_247 = arith.constant 1 : index
    %c0_248 = arith.constant 0 : index
    %c0_249 = arith.constant 0 : index
    %544 = vector.load %arg2[%c1_247, %c0_248, %c0_249] : memref<3x32x128xf32, #tpu.memory_space<vmem>>, vector<1x32x128xf32>
    %545 = vector.shape_cast %544 : vector<1x32x128xf32> to vector<32x128xf32>
    %cst_250 = arith.constant dense<0.000000e+00> : vector<1x128xf32>
    %546 = tpu.matmul %542, %545, %cst_250 {dimension_numbers = #tpu.dot_dimension_numbers<[1], [0], [0], [1], [0, 0, 1, 1], [], []>} : vector<1x32xf32>, vector<32x128xf32>, vector<1x128xf32> -> vector<1x128xf32>
    %c2_251 = arith.constant 2 : index
    %c0_252 = arith.constant 0 : index
    %c0_253 = arith.constant 0 : index
    %547 = vector.load %arg4[%c2_251, %c0_252, %c0_253] : memref<4x1x128xf32, #tpu.memory_space<vmem>>, vector<1x1x128xf32>
    %548 = vector.shape_cast %547 : vector<1x1x128xf32> to vector<1x128xf32>
    %549 = arith.addf %546, %548 : vector<1x128xf32>
    %550 = vector.extract_strided_slice %496 {offsets = [0, 256], sizes = [1, 128], strides = [1, 1]} : vector<1x512xf32> to vector<1x128xf32>
    %551 = arith.addf %549, %550 : vector<1x128xf32>
    %cst_254 = arith.constant 5.000000e-01 : f32
    %552 = vector.broadcast %cst_254 : f32 to vector<1x128xf32>
    %553 = arith.mulf %552, %551 : vector<1x128xf32>
    %554 = math.tanh %553 : vector<1x128xf32>
    %cst_255 = arith.constant 5.000000e-01 : f32
    %555 = vector.broadcast %cst_255 : f32 to vector<1x128xf32>
    %556 = arith.mulf %555, %554 : vector<1x128xf32>
    %cst_256 = arith.constant 5.000000e-01 : f32
    %557 = vector.broadcast %cst_256 : f32 to vector<1x128xf32>
    %558 = arith.addf %556, %557 : vector<1x128xf32>
    %559 = vector.extract_strided_slice %558 {offsets = [0, 0], sizes = [1, 32], strides = [1, 1]} : vector<1x128xf32> to vector<1x32xf32>
    %560 = vector.extract_strided_slice %558 {offsets = [0, 32], sizes = [1, 32], strides = [1, 1]} : vector<1x128xf32> to vector<1x32xf32>
    %561 = vector.extract_strided_slice %558 {offsets = [0, 96], sizes = [1, 32], strides = [1, 1]} : vector<1x128xf32> to vector<1x32xf32>
    %562 = vector.extract_strided_slice %551 {offsets = [0, 64], sizes = [1, 32], strides = [1, 1]} : vector<1x128xf32> to vector<1x32xf32>
    %563 = math.tanh %562 : vector<1x32xf32>
    %564 = arith.mulf %560, %464 : vector<1x32xf32>
    %565 = arith.mulf %559, %563 : vector<1x32xf32>
    %566 = arith.addf %564, %565 : vector<1x32xf32>
    %567 = math.tanh %566 : vector<1x32xf32>
    %568 = arith.mulf %561, %567 : vector<1x32xf32>
    %c0_257 = arith.constant 0 : index
    %c64_258 = arith.constant 64 : index
    %569 = vector.load %arg8[%c0_257, %c64_258] : memref<1x128xf32, #tpu.memory_space<vmem>>, vector<1x32xf32>
    tpu.vector_store %arg8[%c0_257, %c64_258], %568 {strides = array<i32>} : memref<1x128xf32, #tpu.memory_space<vmem>>, vector<1x32xf32>,
    %c2_259 = arith.constant 2 : index
    %c0_260 = arith.constant 0 : index
    %c0_261 = arith.constant 0 : index
    %570 = vector.load %arg2[%c2_259, %c0_260, %c0_261] : memref<3x32x128xf32, #tpu.memory_space<vmem>>, vector<1x32x128xf32>
    %571 = vector.shape_cast %570 : vector<1x32x128xf32> to vector<32x128xf32>
    %cst_262 = arith.constant dense<0.000000e+00> : vector<1x128xf32>
    %572 = tpu.matmul %568, %571, %cst_262 {dimension_numbers = #tpu.dot_dimension_numbers<[1], [0], [0], [1], [0, 0, 1, 1], [], []>} : vector<1x32xf32>, vector<32x128xf32>, vector<1x128xf32> -> vector<1x128xf32>
    %c3_263 = arith.constant 3 : index
    %c0_264 = arith.constant 0 : index
    %c0_265 = arith.constant 0 : index
    %573 = vector.load %arg4[%c3_263, %c0_264, %c0_265] : memref<4x1x128xf32, #tpu.memory_space<vmem>>, vector<1x1x128xf32>
    %574 = vector.shape_cast %573 : vector<1x1x128xf32> to vector<1x128xf32>
    %575 = arith.addf %572, %574 : vector<1x128xf32>
    %576 = vector.extract_strided_slice %496 {offsets = [0, 384], sizes = [1, 128], strides = [1, 1]} : vector<1x512xf32> to vector<1x128xf32>
    %577 = arith.addf %575, %576 : vector<1x128xf32>
    %cst_266 = arith.constant 5.000000e-01 : f32
    %578 = vector.broadcast %cst_266 : f32 to vector<1x128xf32>
    %579 = arith.mulf %578, %577 : vector<1x128xf32>
    %580 = math.tanh %579 : vector<1x128xf32>
    %cst_267 = arith.constant 5.000000e-01 : f32
    %581 = vector.broadcast %cst_267 : f32 to vector<1x128xf32>
    %582 = arith.mulf %581, %580 : vector<1x128xf32>
    %cst_268 = arith.constant 5.000000e-01 : f32
    %583 = vector.broadcast %cst_268 : f32 to vector<1x128xf32>
    %584 = arith.addf %582, %583 : vector<1x128xf32>
    %585 = vector.extract_strided_slice %584 {offsets = [0, 0], sizes = [1, 32], strides = [1, 1]} : vector<1x128xf32> to vector<1x32xf32>
    %586 = vector.extract_strided_slice %584 {offsets = [0, 32], sizes = [1, 32], strides = [1, 1]} : vector<1x128xf32> to vector<1x32xf32>
    %587 = vector.extract_strided_slice %584 {offsets = [0, 96], sizes = [1, 32], strides = [1, 1]} : vector<1x128xf32> to vector<1x32xf32>
    %588 = vector.extract_strided_slice %577 {offsets = [0, 64], sizes = [1, 32], strides = [1, 1]} : vector<1x128xf32> to vector<1x32xf32>
    %589 = math.tanh %588 : vector<1x32xf32>
    %590 = arith.mulf %586, %490 : vector<1x32xf32>
    %591 = arith.mulf %585, %589 : vector<1x32xf32>
    %592 = arith.addf %590, %591 : vector<1x32xf32>
    %593 = math.tanh %592 : vector<1x32xf32>
    %594 = arith.mulf %587, %593 : vector<1x32xf32>
    %c0_269 = arith.constant 0 : index
    %c96_270 = arith.constant 96 : index
    %595 = vector.load %arg8[%c0_269, %c96_270] : memref<1x128xf32, #tpu.memory_space<vmem>>, vector<1x32xf32>
    tpu.vector_store %arg8[%c0_269, %c96_270], %594 {strides = array<i32>} : memref<1x128xf32, #tpu.memory_space<vmem>>, vector<1x32xf32>,
    %c0_271 = arith.constant 0 : index
    %c0_272 = arith.constant 0 : index
    %596 = vector.load %arg8[%c0_271, %c0_272] : memref<1x128xf32, #tpu.memory_space<vmem>>, vector<1x128xf32>
    %c0_273 = arith.constant 0 : index
    %c0_274 = arith.constant 0 : index
    %597 = vector.load %arg3[%c0_273, %c0_274] : memref<128x512xf32, #tpu.memory_space<vmem>>, vector<128x512xf32>
    %cst_275 = arith.constant dense<0.000000e+00> : vector<1x512xf32>
    %598 = tpu.matmul %596, %597, %cst_275 {dimension_numbers = #tpu.dot_dimension_numbers<[1], [0], [0], [1], [0, 0, 1, 1], [], []>} : vector<1x128xf32>, vector<128x512xf32>, vector<1x512xf32> -> vector<1x512xf32>
    %599 = vector.extract_strided_slice %6 {offsets = [6, 0], sizes = [1, 128], strides = [1, 1]} : vector<8x128xf32> to vector<1x128xf32>
    %600 = vector.extract_strided_slice %598 {offsets = [0, 0], sizes = [1, 128], strides = [1, 1]} : vector<1x512xf32> to vector<1x128xf32>
    %601 = arith.addf %599, %600 : vector<1x128xf32>
    %cst_276 = arith.constant 5.000000e-01 : f32
    %602 = vector.broadcast %cst_276 : f32 to vector<1x128xf32>
    %603 = arith.mulf %602, %601 : vector<1x128xf32>
    %604 = math.tanh %603 : vector<1x128xf32>
    %cst_277 = arith.constant 5.000000e-01 : f32
    %605 = vector.broadcast %cst_277 : f32 to vector<1x128xf32>
    %606 = arith.mulf %605, %604 : vector<1x128xf32>
    %cst_278 = arith.constant 5.000000e-01 : f32
    %607 = vector.broadcast %cst_278 : f32 to vector<1x128xf32>
    %608 = arith.addf %606, %607 : vector<1x128xf32>
    %609 = vector.extract_strided_slice %608 {offsets = [0, 0], sizes = [1, 32], strides = [1, 1]} : vector<1x128xf32> to vector<1x32xf32>
    %610 = vector.extract_strided_slice %608 {offsets = [0, 32], sizes = [1, 32], strides = [1, 1]} : vector<1x128xf32> to vector<1x32xf32>
    %611 = vector.extract_strided_slice %608 {offsets = [0, 96], sizes = [1, 32], strides = [1, 1]} : vector<1x128xf32> to vector<1x32xf32>
    %612 = vector.extract_strided_slice %601 {offsets = [0, 64], sizes = [1, 32], strides = [1, 1]} : vector<1x128xf32> to vector<1x32xf32>
    %613 = math.tanh %612 : vector<1x32xf32>
    %614 = arith.mulf %610, %514 : vector<1x32xf32>
    %615 = arith.mulf %609, %613 : vector<1x32xf32>
    %616 = arith.addf %614, %615 : vector<1x32xf32>
    %617 = math.tanh %616 : vector<1x32xf32>
    %618 = arith.mulf %611, %617 : vector<1x32xf32>
    %c0_279 = arith.constant 0 : index
    %c0_280 = arith.constant 0 : index
    %619 = vector.load %arg8[%c0_279, %c0_280] : memref<1x128xf32, #tpu.memory_space<vmem>>, vector<1x32xf32>
    tpu.vector_store %arg8[%c0_279, %c0_280], %618 {strides = array<i32>} : memref<1x128xf32, #tpu.memory_space<vmem>>, vector<1x32xf32>,
    %c0_281 = arith.constant 0 : index
    %c0_282 = arith.constant 0 : index
    %c0_283 = arith.constant 0 : index
    %620 = vector.load %arg2[%c0_281, %c0_282, %c0_283] : memref<3x32x128xf32, #tpu.memory_space<vmem>>, vector<1x32x128xf32>
    %621 = vector.shape_cast %620 : vector<1x32x128xf32> to vector<32x128xf32>
    %cst_284 = arith.constant dense<0.000000e+00> : vector<1x128xf32>
    %622 = tpu.matmul %618, %621, %cst_284 {dimension_numbers = #tpu.dot_dimension_numbers<[1], [0], [0], [1], [0, 0, 1, 1], [], []>} : vector<1x32xf32>, vector<32x128xf32>, vector<1x128xf32> -> vector<1x128xf32>
    %c1_285 = arith.constant 1 : index
    %c0_286 = arith.constant 0 : index
    %c0_287 = arith.constant 0 : index
    %623 = vector.load %arg4[%c1_285, %c0_286, %c0_287] : memref<4x1x128xf32, #tpu.memory_space<vmem>>, vector<1x1x128xf32>
    %624 = vector.shape_cast %623 : vector<1x1x128xf32> to vector<1x128xf32>
    %625 = arith.addf %622, %624 : vector<1x128xf32>
    %626 = vector.extract_strided_slice %598 {offsets = [0, 128], sizes = [1, 128], strides = [1, 1]} : vector<1x512xf32> to vector<1x128xf32>
    %627 = arith.addf %625, %626 : vector<1x128xf32>
    %cst_288 = arith.constant 5.000000e-01 : f32
    %628 = vector.broadcast %cst_288 : f32 to vector<1x128xf32>
    %629 = arith.mulf %628, %627 : vector<1x128xf32>
    %630 = math.tanh %629 : vector<1x128xf32>
    %cst_289 = arith.constant 5.000000e-01 : f32
    %631 = vector.broadcast %cst_289 : f32 to vector<1x128xf32>
    %632 = arith.mulf %631, %630 : vector<1x128xf32>
    %cst_290 = arith.constant 5.000000e-01 : f32
    %633 = vector.broadcast %cst_290 : f32 to vector<1x128xf32>
    %634 = arith.addf %632, %633 : vector<1x128xf32>
    %635 = vector.extract_strided_slice %634 {offsets = [0, 0], sizes = [1, 32], strides = [1, 1]} : vector<1x128xf32> to vector<1x32xf32>
    %636 = vector.extract_strided_slice %634 {offsets = [0, 32], sizes = [1, 32], strides = [1, 1]} : vector<1x128xf32> to vector<1x32xf32>
    %637 = vector.extract_strided_slice %634 {offsets = [0, 96], sizes = [1, 32], strides = [1, 1]} : vector<1x128xf32> to vector<1x32xf32>
    %638 = vector.extract_strided_slice %627 {offsets = [0, 64], sizes = [1, 32], strides = [1, 1]} : vector<1x128xf32> to vector<1x32xf32>
    %639 = math.tanh %638 : vector<1x32xf32>
    %640 = arith.mulf %636, %540 : vector<1x32xf32>
    %641 = arith.mulf %635, %639 : vector<1x32xf32>
    %642 = arith.addf %640, %641 : vector<1x32xf32>
    %643 = math.tanh %642 : vector<1x32xf32>
    %644 = arith.mulf %637, %643 : vector<1x32xf32>
    %c0_291 = arith.constant 0 : index
    %c32_292 = arith.constant 32 : index
    %645 = vector.load %arg8[%c0_291, %c32_292] : memref<1x128xf32, #tpu.memory_space<vmem>>, vector<1x32xf32>
    tpu.vector_store %arg8[%c0_291, %c32_292], %644 {strides = array<i32>} : memref<1x128xf32, #tpu.memory_space<vmem>>, vector<1x32xf32>,
    %c1_293 = arith.constant 1 : index
    %c0_294 = arith.constant 0 : index
    %c0_295 = arith.constant 0 : index
    %646 = vector.load %arg2[%c1_293, %c0_294, %c0_295] : memref<3x32x128xf32, #tpu.memory_space<vmem>>, vector<1x32x128xf32>
    %647 = vector.shape_cast %646 : vector<1x32x128xf32> to vector<32x128xf32>
    %cst_296 = arith.constant dense<0.000000e+00> : vector<1x128xf32>
    %648 = tpu.matmul %644, %647, %cst_296 {dimension_numbers = #tpu.dot_dimension_numbers<[1], [0], [0], [1], [0, 0, 1, 1], [], []>} : vector<1x32xf32>, vector<32x128xf32>, vector<1x128xf32> -> vector<1x128xf32>
    %c2_297 = arith.constant 2 : index
    %c0_298 = arith.constant 0 : index
    %c0_299 = arith.constant 0 : index
    %649 = vector.load %arg4[%c2_297, %c0_298, %c0_299] : memref<4x1x128xf32, #tpu.memory_space<vmem>>, vector<1x1x128xf32>
    %650 = vector.shape_cast %649 : vector<1x1x128xf32> to vector<1x128xf32>
    %651 = arith.addf %648, %650 : vector<1x128xf32>
    %652 = vector.extract_strided_slice %598 {offsets = [0, 256], sizes = [1, 128], strides = [1, 1]} : vector<1x512xf32> to vector<1x128xf32>
    %653 = arith.addf %651, %652 : vector<1x128xf32>
    %cst_300 = arith.constant 5.000000e-01 : f32
    %654 = vector.broadcast %cst_300 : f32 to vector<1x128xf32>
    %655 = arith.mulf %654, %653 : vector<1x128xf32>
    %656 = math.tanh %655 : vector<1x128xf32>
    %cst_301 = arith.constant 5.000000e-01 : f32
    %657 = vector.broadcast %cst_301 : f32 to vector<1x128xf32>
    %658 = arith.mulf %657, %656 : vector<1x128xf32>
    %cst_302 = arith.constant 5.000000e-01 : f32
    %659 = vector.broadcast %cst_302 : f32 to vector<1x128xf32>
    %660 = arith.addf %658, %659 : vector<1x128xf32>
    %661 = vector.extract_strided_slice %660 {offsets = [0, 0], sizes = [1, 32], strides = [1, 1]} : vector<1x128xf32> to vector<1x32xf32>
    %662 = vector.extract_strided_slice %660 {offsets = [0, 32], sizes = [1, 32], strides = [1, 1]} : vector<1x128xf32> to vector<1x32xf32>
    %663 = vector.extract_strided_slice %660 {offsets = [0, 96], sizes = [1, 32], strides = [1, 1]} : vector<1x128xf32> to vector<1x32xf32>
    %664 = vector.extract_strided_slice %653 {offsets = [0, 64], sizes = [1, 32], strides = [1, 1]} : vector<1x128xf32> to vector<1x32xf32>
    %665 = math.tanh %664 : vector<1x32xf32>
    %666 = arith.mulf %662, %566 : vector<1x32xf32>
    %667 = arith.mulf %661, %665 : vector<1x32xf32>
    %668 = arith.addf %666, %667 : vector<1x32xf32>
    %669 = math.tanh %668 : vector<1x32xf32>
    %670 = arith.mulf %663, %669 : vector<1x32xf32>
    %c0_303 = arith.constant 0 : index
    %c64_304 = arith.constant 64 : index
    %671 = vector.load %arg8[%c0_303, %c64_304] : memref<1x128xf32, #tpu.memory_space<vmem>>, vector<1x32xf32>
    tpu.vector_store %arg8[%c0_303, %c64_304], %670 {strides = array<i32>} : memref<1x128xf32, #tpu.memory_space<vmem>>, vector<1x32xf32>,
    %c2_305 = arith.constant 2 : index
    %c0_306 = arith.constant 0 : index
    %c0_307 = arith.constant 0 : index
    %672 = vector.load %arg2[%c2_305, %c0_306, %c0_307] : memref<3x32x128xf32, #tpu.memory_space<vmem>>, vector<1x32x128xf32>
    %673 = vector.shape_cast %672 : vector<1x32x128xf32> to vector<32x128xf32>
    %cst_308 = arith.constant dense<0.000000e+00> : vector<1x128xf32>
    %674 = tpu.matmul %670, %673, %cst_308 {dimension_numbers = #tpu.dot_dimension_numbers<[1], [0], [0], [1], [0, 0, 1, 1], [], []>} : vector<1x32xf32>, vector<32x128xf32>, vector<1x128xf32> -> vector<1x128xf32>
    %c3_309 = arith.constant 3 : index
    %c0_310 = arith.constant 0 : index
    %c0_311 = arith.constant 0 : index
    %675 = vector.load %arg4[%c3_309, %c0_310, %c0_311] : memref<4x1x128xf32, #tpu.memory_space<vmem>>, vector<1x1x128xf32>
    %676 = vector.shape_cast %675 : vector<1x1x128xf32> to vector<1x128xf32>
    %677 = arith.addf %674, %676 : vector<1x128xf32>
    %678 = vector.extract_strided_slice %598 {offsets = [0, 384], sizes = [1, 128], strides = [1, 1]} : vector<1x512xf32> to vector<1x128xf32>
    %679 = arith.addf %677, %678 : vector<1x128xf32>
    %cst_312 = arith.constant 5.000000e-01 : f32
    %680 = vector.broadcast %cst_312 : f32 to vector<1x128xf32>
    %681 = arith.mulf %680, %679 : vector<1x128xf32>
    %682 = math.tanh %681 : vector<1x128xf32>
    %cst_313 = arith.constant 5.000000e-01 : f32
    %683 = vector.broadcast %cst_313 : f32 to vector<1x128xf32>
    %684 = arith.mulf %683, %682 : vector<1x128xf32>
    %cst_314 = arith.constant 5.000000e-01 : f32
    %685 = vector.broadcast %cst_314 : f32 to vector<1x128xf32>
    %686 = arith.addf %684, %685 : vector<1x128xf32>
    %687 = vector.extract_strided_slice %686 {offsets = [0, 0], sizes = [1, 32], strides = [1, 1]} : vector<1x128xf32> to vector<1x32xf32>
    %688 = vector.extract_strided_slice %686 {offsets = [0, 32], sizes = [1, 32], strides = [1, 1]} : vector<1x128xf32> to vector<1x32xf32>
    %689 = vector.extract_strided_slice %686 {offsets = [0, 96], sizes = [1, 32], strides = [1, 1]} : vector<1x128xf32> to vector<1x32xf32>
    %690 = vector.extract_strided_slice %679 {offsets = [0, 64], sizes = [1, 32], strides = [1, 1]} : vector<1x128xf32> to vector<1x32xf32>
    %691 = math.tanh %690 : vector<1x32xf32>
    %692 = arith.mulf %688, %592 : vector<1x32xf32>
    %693 = arith.mulf %687, %691 : vector<1x32xf32>
    %694 = arith.addf %692, %693 : vector<1x32xf32>
    %695 = math.tanh %694 : vector<1x32xf32>
    %696 = arith.mulf %689, %695 : vector<1x32xf32>
    %c0_315 = arith.constant 0 : index
    %c96_316 = arith.constant 96 : index
    %697 = vector.load %arg8[%c0_315, %c96_316] : memref<1x128xf32, #tpu.memory_space<vmem>>, vector<1x32xf32>
    tpu.vector_store %arg8[%c0_315, %c96_316], %696 {strides = array<i32>} : memref<1x128xf32, #tpu.memory_space<vmem>>, vector<1x32xf32>,
    %c0_317 = arith.constant 0 : index
    %c0_318 = arith.constant 0 : index
    %698 = vector.load %arg8[%c0_317, %c0_318] : memref<1x128xf32, #tpu.memory_space<vmem>>, vector<1x128xf32>
    %c0_319 = arith.constant 0 : index
    %c0_320 = arith.constant 0 : index
    %699 = vector.load %arg3[%c0_319, %c0_320] : memref<128x512xf32, #tpu.memory_space<vmem>>, vector<128x512xf32>
    %cst_321 = arith.constant dense<0.000000e+00> : vector<1x512xf32>
    %700 = tpu.matmul %698, %699, %cst_321 {dimension_numbers = #tpu.dot_dimension_numbers<[1], [0], [0], [1], [0, 0, 1, 1], [], []>} : vector<1x128xf32>, vector<128x512xf32>, vector<1x512xf32> -> vector<1x512xf32>
    %701 = vector.extract_strided_slice %6 {offsets = [7, 0], sizes = [1, 128], strides = [1, 1]} : vector<8x128xf32> to vector<1x128xf32>
    %702 = vector.extract_strided_slice %700 {offsets = [0, 0], sizes = [1, 128], strides = [1, 1]} : vector<1x512xf32> to vector<1x128xf32>
    %703 = arith.addf %701, %702 : vector<1x128xf32>
    %cst_322 = arith.constant 5.000000e-01 : f32
    %704 = vector.broadcast %cst_322 : f32 to vector<1x128xf32>
    %705 = arith.mulf %704, %703 : vector<1x128xf32>
    %706 = math.tanh %705 : vector<1x128xf32>
    %cst_323 = arith.constant 5.000000e-01 : f32
    %707 = vector.broadcast %cst_323 : f32 to vector<1x128xf32>
    %708 = arith.mulf %707, %706 : vector<1x128xf32>
    %cst_324 = arith.constant 5.000000e-01 : f32
    %709 = vector.broadcast %cst_324 : f32 to vector<1x128xf32>
    %710 = arith.addf %708, %709 : vector<1x128xf32>
    %711 = vector.extract_strided_slice %710 {offsets = [0, 0], sizes = [1, 32], strides = [1, 1]} : vector<1x128xf32> to vector<1x32xf32>
    %712 = vector.extract_strided_slice %710 {offsets = [0, 32], sizes = [1, 32], strides = [1, 1]} : vector<1x128xf32> to vector<1x32xf32>
    %713 = vector.extract_strided_slice %710 {offsets = [0, 96], sizes = [1, 32], strides = [1, 1]} : vector<1x128xf32> to vector<1x32xf32>
    %714 = vector.extract_strided_slice %703 {offsets = [0, 64], sizes = [1, 32], strides = [1, 1]} : vector<1x128xf32> to vector<1x32xf32>
    %715 = math.tanh %714 : vector<1x32xf32>
    %716 = arith.mulf %712, %616 : vector<1x32xf32>
    %717 = arith.mulf %711, %715 : vector<1x32xf32>
    %718 = arith.addf %716, %717 : vector<1x32xf32>
    %719 = math.tanh %718 : vector<1x32xf32>
    %720 = arith.mulf %713, %719 : vector<1x32xf32>
    %c0_325 = arith.constant 0 : index
    %c0_326 = arith.constant 0 : index
    %c0_327 = arith.constant 0 : index
    %721 = vector.load %arg2[%c0_325, %c0_326, %c0_327] : memref<3x32x128xf32, #tpu.memory_space<vmem>>, vector<1x32x128xf32>
    %722 = vector.shape_cast %721 : vector<1x32x128xf32> to vector<32x128xf32>
    %cst_328 = arith.constant dense<0.000000e+00> : vector<1x128xf32>
    %723 = tpu.matmul %720, %722, %cst_328 {dimension_numbers = #tpu.dot_dimension_numbers<[1], [0], [0], [1], [0, 0, 1, 1], [], []>} : vector<1x32xf32>, vector<32x128xf32>, vector<1x128xf32> -> vector<1x128xf32>
    %c1_329 = arith.constant 1 : index
    %c0_330 = arith.constant 0 : index
    %c0_331 = arith.constant 0 : index
    %724 = vector.load %arg4[%c1_329, %c0_330, %c0_331] : memref<4x1x128xf32, #tpu.memory_space<vmem>>, vector<1x1x128xf32>
    %725 = vector.shape_cast %724 : vector<1x1x128xf32> to vector<1x128xf32>
    %726 = arith.addf %723, %725 : vector<1x128xf32>
    %727 = vector.extract_strided_slice %700 {offsets = [0, 128], sizes = [1, 128], strides = [1, 1]} : vector<1x512xf32> to vector<1x128xf32>
    %728 = arith.addf %726, %727 : vector<1x128xf32>
    %cst_332 = arith.constant 5.000000e-01 : f32
    %729 = vector.broadcast %cst_332 : f32 to vector<1x128xf32>
    %730 = arith.mulf %729, %728 : vector<1x128xf32>
    %731 = math.tanh %730 : vector<1x128xf32>
    %cst_333 = arith.constant 5.000000e-01 : f32
    %732 = vector.broadcast %cst_333 : f32 to vector<1x128xf32>
    %733 = arith.mulf %732, %731 : vector<1x128xf32>
    %cst_334 = arith.constant 5.000000e-01 : f32
    %734 = vector.broadcast %cst_334 : f32 to vector<1x128xf32>
    %735 = arith.addf %733, %734 : vector<1x128xf32>
    %736 = vector.extract_strided_slice %735 {offsets = [0, 0], sizes = [1, 32], strides = [1, 1]} : vector<1x128xf32> to vector<1x32xf32>
    %737 = vector.extract_strided_slice %735 {offsets = [0, 32], sizes = [1, 32], strides = [1, 1]} : vector<1x128xf32> to vector<1x32xf32>
    %738 = vector.extract_strided_slice %735 {offsets = [0, 96], sizes = [1, 32], strides = [1, 1]} : vector<1x128xf32> to vector<1x32xf32>
    %739 = vector.extract_strided_slice %728 {offsets = [0, 64], sizes = [1, 32], strides = [1, 1]} : vector<1x128xf32> to vector<1x32xf32>
    %740 = math.tanh %739 : vector<1x32xf32>
    %741 = arith.mulf %737, %642 : vector<1x32xf32>
    %742 = arith.mulf %736, %740 : vector<1x32xf32>
    %743 = arith.addf %741, %742 : vector<1x32xf32>
    %744 = math.tanh %743 : vector<1x32xf32>
    %745 = arith.mulf %738, %744 : vector<1x32xf32>
    %c1_335 = arith.constant 1 : index
    %c0_336 = arith.constant 0 : index
    %c0_337 = arith.constant 0 : index
    %746 = vector.load %arg2[%c1_335, %c0_336, %c0_337] : memref<3x32x128xf32, #tpu.memory_space<vmem>>, vector<1x32x128xf32>
    %747 = vector.shape_cast %746 : vector<1x32x128xf32> to vector<32x128xf32>
    %cst_338 = arith.constant dense<0.000000e+00> : vector<1x128xf32>
    %748 = tpu.matmul %745, %747, %cst_338 {dimension_numbers = #tpu.dot_dimension_numbers<[1], [0], [0], [1], [0, 0, 1, 1], [], []>} : vector<1x32xf32>, vector<32x128xf32>, vector<1x128xf32> -> vector<1x128xf32>
    %c2_339 = arith.constant 2 : index
    %c0_340 = arith.constant 0 : index
    %c0_341 = arith.constant 0 : index
    %749 = vector.load %arg4[%c2_339, %c0_340, %c0_341] : memref<4x1x128xf32, #tpu.memory_space<vmem>>, vector<1x1x128xf32>
    %750 = vector.shape_cast %749 : vector<1x1x128xf32> to vector<1x128xf32>
    %751 = arith.addf %748, %750 : vector<1x128xf32>
    %752 = vector.extract_strided_slice %700 {offsets = [0, 256], sizes = [1, 128], strides = [1, 1]} : vector<1x512xf32> to vector<1x128xf32>
    %753 = arith.addf %751, %752 : vector<1x128xf32>
    %cst_342 = arith.constant 5.000000e-01 : f32
    %754 = vector.broadcast %cst_342 : f32 to vector<1x128xf32>
    %755 = arith.mulf %754, %753 : vector<1x128xf32>
    %756 = math.tanh %755 : vector<1x128xf32>
    %cst_343 = arith.constant 5.000000e-01 : f32
    %757 = vector.broadcast %cst_343 : f32 to vector<1x128xf32>
    %758 = arith.mulf %757, %756 : vector<1x128xf32>
    %cst_344 = arith.constant 5.000000e-01 : f32
    %759 = vector.broadcast %cst_344 : f32 to vector<1x128xf32>
    %760 = arith.addf %758, %759 : vector<1x128xf32>
    %761 = vector.extract_strided_slice %760 {offsets = [0, 0], sizes = [1, 32], strides = [1, 1]} : vector<1x128xf32> to vector<1x32xf32>
    %762 = vector.extract_strided_slice %760 {offsets = [0, 32], sizes = [1, 32], strides = [1, 1]} : vector<1x128xf32> to vector<1x32xf32>
    %763 = vector.extract_strided_slice %760 {offsets = [0, 96], sizes = [1, 32], strides = [1, 1]} : vector<1x128xf32> to vector<1x32xf32>
    %764 = vector.extract_strided_slice %753 {offsets = [0, 64], sizes = [1, 32], strides = [1, 1]} : vector<1x128xf32> to vector<1x32xf32>
    %765 = math.tanh %764 : vector<1x32xf32>
    %766 = arith.mulf %762, %668 : vector<1x32xf32>
    %767 = arith.mulf %761, %765 : vector<1x32xf32>
    %768 = arith.addf %766, %767 : vector<1x32xf32>
    %769 = math.tanh %768 : vector<1x32xf32>
    %770 = arith.mulf %763, %769 : vector<1x32xf32>
    %c2_345 = arith.constant 2 : index
    %c0_346 = arith.constant 0 : index
    %c0_347 = arith.constant 0 : index
    %771 = vector.load %arg2[%c2_345, %c0_346, %c0_347] : memref<3x32x128xf32, #tpu.memory_space<vmem>>, vector<1x32x128xf32>
    %772 = vector.shape_cast %771 : vector<1x32x128xf32> to vector<32x128xf32>
    %cst_348 = arith.constant dense<0.000000e+00> : vector<1x128xf32>
    %773 = tpu.matmul %770, %772, %cst_348 {dimension_numbers = #tpu.dot_dimension_numbers<[1], [0], [0], [1], [0, 0, 1, 1], [], []>} : vector<1x32xf32>, vector<32x128xf32>, vector<1x128xf32> -> vector<1x128xf32>
    %c3_349 = arith.constant 3 : index
    %c0_350 = arith.constant 0 : index
    %c0_351 = arith.constant 0 : index
    %774 = vector.load %arg4[%c3_349, %c0_350, %c0_351] : memref<4x1x128xf32, #tpu.memory_space<vmem>>, vector<1x1x128xf32>
    %775 = vector.shape_cast %774 : vector<1x1x128xf32> to vector<1x128xf32>
    %776 = arith.addf %773, %775 : vector<1x128xf32>
    %777 = vector.extract_strided_slice %700 {offsets = [0, 384], sizes = [1, 128], strides = [1, 1]} : vector<1x512xf32> to vector<1x128xf32>
    %778 = arith.addf %776, %777 : vector<1x128xf32>
    %cst_352 = arith.constant 5.000000e-01 : f32
    %779 = vector.broadcast %cst_352 : f32 to vector<1x128xf32>
    %780 = arith.mulf %779, %778 : vector<1x128xf32>
    %781 = math.tanh %780 : vector<1x128xf32>
    %cst_353 = arith.constant 5.000000e-01 : f32
    %782 = vector.broadcast %cst_353 : f32 to vector<1x128xf32>
    %783 = arith.mulf %782, %781 : vector<1x128xf32>
    %cst_354 = arith.constant 5.000000e-01 : f32
    %784 = vector.broadcast %cst_354 : f32 to vector<1x128xf32>
    %785 = arith.addf %783, %784 : vector<1x128xf32>
    %786 = vector.extract_strided_slice %785 {offsets = [0, 0], sizes = [1, 32], strides = [1, 1]} : vector<1x128xf32> to vector<1x32xf32>
    %787 = vector.extract_strided_slice %785 {offsets = [0, 32], sizes = [1, 32], strides = [1, 1]} : vector<1x128xf32> to vector<1x32xf32>
    %788 = vector.extract_strided_slice %785 {offsets = [0, 96], sizes = [1, 32], strides = [1, 1]} : vector<1x128xf32> to vector<1x32xf32>
    %789 = vector.extract_strided_slice %778 {offsets = [0, 64], sizes = [1, 32], strides = [1, 1]} : vector<1x128xf32> to vector<1x32xf32>
    %790 = math.tanh %789 : vector<1x32xf32>
    %791 = arith.mulf %787, %694 : vector<1x32xf32>
    %792 = arith.mulf %786, %790 : vector<1x32xf32>
    %793 = arith.addf %791, %792 : vector<1x32xf32>
    %794 = math.tanh %793 : vector<1x32xf32>
    %795 = arith.mulf %788, %794 : vector<1x32xf32>
    %c0_355 = arith.constant 0 : index
    %c0_356 = arith.constant 0 : index
    %796 = vector.load %arg5[%c0_355, %c0_356] : memref<32x128xf32, #tpu.memory_space<vmem>>, vector<32x128xf32>
    %cst_357 = arith.constant dense<0.000000e+00> : vector<1x128xf32>
    %797 = tpu.matmul %795, %796, %cst_357 {dimension_numbers = #tpu.dot_dimension_numbers<[1], [0], [0], [1], [0, 0, 1, 1], [], []>} : vector<1x32xf32>, vector<32x128xf32>, vector<1x128xf32> -> vector<1x128xf32>
    %c0_358 = arith.constant 0 : index
    %c0_359 = arith.constant 0 : index
    %798 = vector.load %arg6[%c0_358, %c0_359] : memref<1x128xf32, #tpu.memory_space<vmem>>, vector<1x128xf32>
    %799 = arith.addf %797, %798 : vector<1x128xf32>
    %c0_360 = arith.constant 0 : index
    %c0_361 = arith.constant 0 : index
    %800 = vector.load %arg7[%c0_360, %c0_361] : memref<1x128xf32, #tpu.memory_space<vmem>>, vector<1x128xf32>
    tpu.vector_store %arg7[%c0_360, %c0_361], %799 {strides = array<i32>} : memref<1x128xf32, #tpu.memory_space<vmem>>, vector<1x128xf32>,
    return
  }
}

</mosaic_0001>

<bundles_post_ra>
// kernel: lstm_forward.1
= control target key start
LH: loop header
LB: loop body
LE: loop exit
PB: predicated region body
PF: predicated region fallthrough
CT: control target
= control target key end

     0   :  { %v5774_v0 = vmov 0.0|0.0   ;;  %vm5775_vm0 = vmmov 0   ;;  %v5776_v4 = vmov 0.0   ;;  %vm38_vm1 = vcmask 261120   ;;  %s5778_s20 = smov 96   ;;  %s5779_s21 = smov 32   ;;  %s7870_s1 = inlined_call_operand.vmem [shape: f32[32,128], index: 1, kind: input, shape index: {}]   ;;  %s7871_s0 = inlined_call_operand.vmem [shape: f32[8,32], index: 0, kind: input, shape index: {}]   ;;  %s7872_s4 = inlined_call_operand.vmem [shape: f32[4,1,128], index: 4, kind: input, shape index: {}]   ;;  %s7873_s2 = inlined_call_operand.vmem [shape: f32[3,32,128], index: 2, kind: input, shape index: {}]   ;;  %s7874_s3 = inlined_call_operand.vmem [shape: f32[128,512], index: 3, kind: input, shape index: {}]   ;;  %s7875_s5 = inlined_call_operand.vmem [shape: f32[32,128], index: 5, kind: input, shape index: {}]   ;;  %s7876_s6 = inlined_call_operand.vmem [shape: f32[1,128], index: 6, kind: input, shape index: {}]   ;;  %s7877_s7 = inlined_call_operand.vmem [shape: f32[1,128], index: 7, kind: output, shape index: {}]  }
   0x1   :  { %4972 = vmatprep.subr.bf16.mxu0 %v5774_v0  ;;  %v27_v1 = vld [vmem:[%s7870_s1] sm:$0xff]  ;;  %v28_v2 = vld [vmem:[%s7870_s1 + $0x8] sm:$0xff]  ;;  %v29_v3 = vld [vmem:[%s7870_s1 + $0x10] sm:$0xff]  ;;  %4694 = vmatprep.mubr.msk.f32.mxu0 %vm5775_vm0, %v5776_v4  ;;  %vm132_vm2 = vcmask 253952   ;;  %vm232_vm3 = vcmask 516352   ;;  %vm335_vm4 = vcmask 778752  }
   0x2   :  { %v4973_v5 = vpack.c.bf16 %v28_v2, %v27_v1  ;;  %v30_v6 = vld [vmem:[%s7870_s1 + $0x18] sm:$0xff]  ;;  %4978 = vmatprep.subr.bf16.mxu1 %v5774_v0  ;;  %4705 = vmatprep.mubr.msk.f32.mxu1 %vm5775_vm0, %v5776_v4  ;;  %v26_v8 = vld [vmem:[%s7871_s0] sm:$0xff]  ;;  %s5777_s0 = smov 64   ;;  %v135_v21 = vld [vmem:[%s7873_s2 + $0x8] sm:$0xff]  ;;  %vm434_vm5 = vcmask 1041152   ;;  %vm678_vm6 = vcmask 254977  }
   0x3   :  { %v4976_v7 = vpack.c.bf16 %v30_v6, %v29_v3  ;;  %v4441_v9 = vld [vmem:[%s7872_s4] ss:$0 sm:$0xff]  ;;  %v136_v22 = vld [vmem:[%s7873_s2 + $0x10] sm:$0xff]  ;;  %v137_v24 = vld [vmem:[%s7873_s2 + $0x18] sm:$0xff]  ;;  %vm1250_vm7 = vcmask 256002   ;;  %vm1810_vm8 = vcmask 257027  }
   0x4   :  { %4974 = vmatpush3.bf16.msra.mxu0 %v4973_v5  ;;  %v134_v20 = vld [vmem:[%s7873_s2] sm:$0xff]  ;;  %v5872_v25 = vpack.c.bf16 %v137_v24, %v136_v22  ;;  %v4446_v42 = vld [vmem:[%s7873_s2 + $0x28] sm:$0xff]  ;;  %v4447_v43 = vld [vmem:[%s7873_s2 + $0x30] sm:$0xff]  ;;  %vm2370_vm9 = vcmask 258052   ;;  %vm2930_vm10 = vcmask 259077   ;;  %vm3490_vm11 = vcmask 260102  }
   0x5   :  { %4975 = vmatprep.subr.bf16.mxu0 %v5774_v0  ;;  %v5866_v23 = vpack.c.bf16 %v135_v21, %v134_v20  ;;  %v4443_v30 = vld [vmem:[%s7872_s4 + $0x1] sm:$0x1]  ;;  %v4448_v45 = vld [vmem:[%s7873_s2 + $0x38] sm:$0xff]  ;;  %v4449_v51 = vld [vmem:[%s7872_s4 + $0x2] sm:$0x1] }
   0x6   :  { %v4445_v41 = vld [vmem:[%s7873_s2 + $0x20] sm:$0xff]  ;;  %v5904_v46 = vpack.c.bf16 %v4448_v45, %v4447_v43  ;;  %v4452_v1 = vld [vmem:[%s7873_s2 + $0x48] sm:$0xff]  ;;  %v4453_v2 = vld [vmem:[%s7873_s2 + $0x50] sm:$0xff] }
   0x7   :  { %4980 = vmatpush3.bf16.msra.mxu1 %v5866_v23  ;;  %v5898_v44 = vpack.c.bf16 %v4446_v42, %v4445_v41  ;;  %v4451_v63 = vld [vmem:[%s7873_s2 + $0x40] sm:$0xff]  ;;  %v4454_v5 = vld [vmem:[%s7873_s2 + $0x58] sm:$0xff]  ;;  %v442_v20 = vld [vmem:[%s7874_s3 + $0x28] sm:$0xff] }
   0x8   :  { %4977 = vmatpush3.bf16.msra.mxu0 %v4976_v7  ;;  %4981 = vmatprep.subr.bf16.mxu1 %v5774_v0  ;;  %v5929_v3 = vpack.c.bf16 %v4452_v1, %v4451_v63  ;;  %v5935_v6 = vpack.c.bf16 %v4454_v5, %v4453_v2  ;;  %v440_v21 = vld [vmem:[%s7874_s3 + $0x18] sm:$0xff]  ;;  %v449_v41 = vld [vmem:[%s7874_s3 + $0x60] sm:$0xff]  ;;  %v447_v42 = vld [vmem:[%s7874_s3 + $0x50] sm:$0xff] }
   0x9   :  { %4984 = vmatprep.subr.bf16.mxu0 %v5774_v0  ;;  %v444_v24 = vld [vmem:[%s7874_s3 + $0x38] sm:$0xff]  ;;  %v451_v45 = vld [vmem:[%s7874_s3 + $0x70] sm:$0xff]  ;;  %v461_v5 = vld [vmem:[%s7874_s3 + $0xc0] sm:$0xff] }
   0xa   :  { %v468_v2 = vld [vmem:[%s7874_s3 + $0xf8] sm:$0xff] }
   0xb   :  { %4695 = vmatmul.mubr.msk.f32.vlgmr.msra.gmra.mrb[0].mxu0 %vm38_vm1, %v26_v8  ;;  %4983 = vmatpush3.bf16.msra.mxu1 %v5872_v25 }
   0xc   :  { %4716 = vmatprep.mubr.msk.f32.mxu0 %vm5775_vm0, %v5776_v4  ;;  %4990 = vmatprep.subr.bf16.mxu1 %v5774_v0 }
   0xd   :  { %4986 = vmatpush3.bf16.msra.mxu0 %v5898_v44 }
   0xe   :  { %4987 = vmatprep.subr.bf16.mxu0 %v5774_v0 }
  0x11   :  { %4989 = vmatpush3.bf16.msra.mxu0 %v5904_v46 }
  0xde   :  { %v108_v10 = vpop.f32.mrb[0].mxu0 }
  0xdf   :  { %v5849_v11 = vadd.f32 %v4441_v9, %v108_v10  ;;  %v4696_v12 = vpop.f32.mrb[1].mxu0 }
  0xe1   :  { %5582 = vtanh.f32 %v5849_v11  ;;  %v112_v14 = vmul.f32 0.5, %v5849_v11 }
  0xe3   :  { %5584 = vtanh.f32 %v112_v14  ;;  %v4455_v14 = vld [vmem:[%s7872_s4 + $0x3] sm:$0x1] }
  0xeb   :  { %v5583_v13 = vpop.eup %5582 }
  0xec   :  { %118 = vrot.lane.b32.xlu0 %v5583_v13, %s5777_s0 }
  0xed   :  { %v5585_v15 = vpop.eup %5584 }
  0xee   :  { %v114_v16 = vmul.f32 0.5, %v5585_v15 }
  0xf0   :  { %v115_v17 = vadd.f32 0.5, %v114_v16 }
 0x15e   :  { %v119_v18 = vpop.permute.xlu0 %118 }
 0x15f   :  { %v5854_v19 = vmul.f32 %v119_v18, %v115_v17 }
 0x161   :  { %5586 = vtanh.f32 %v5854_v19  ;;  %v653_v9 = vrot.slane %v5854_v19, 7  ;;  %v438_v19 = vld [vmem:[%s7874_s3 + $0x8] sm:$0xff] }
 0x162   :  { %v5964_v22 = vpack.c.bf16 %v442_v20, %v438_v19  ;;  %v469_v20 = vld [vmem:[%s7874_s3 + $0x100] sm:$0xff] }
 0x164   :  { %4997 = vmatprep.subr.bf16.mxu0 %v5964_v22 }
 0x16b   :  { %v5587_v26 = vpop.eup %5586 }
 0x16c   :  { %124 = vrot.lane.b32.xlu0 %v5587_v26, %s5778_s20  ;;  %v437_v26 = vld [vmem:[%s7874_s3] sm:$0xff] }
 0x1de   :  { %v125_v27 = vpop.permute.xlu0 %124 }
 0x1df   :  { %v127_v28 = vmul.f32 %v125_v27, %v115_v17  ;;  %v441_v27 = vld [vmem:[%s7874_s3 + $0x20] sm:$0xff] }
 0x1e1   :  { %129 = vrot.lane.b32.xlu1 %v127_v28, %s5779_s21  ;;  %v5975_v28 = vpack.c.bf16 %v444_v24, %v440_v21  ;;  %v473_v21 = vld [vmem:[%s7874_s3 + $0x120] sm:$0xff]  ;;  %v471_v24 = vld [vmem:[%s7874_s3 + $0x110] sm:$0xff] }
 0x253   :  { %v130_v29 = vpop.permute.xlu1 %129 }
 0x254   :  { %133 = vst.msk [vmem:[#allocation2] sm:$0x1] %vm132_vm2, %v130_v29  ;;  %4706 = vmatmul.mubr.msk.f32.vlgmr.msra.gmra.mrb[0].mxu1 %vm38_vm1, %v130_v29  ;;  %v5977_v29 = vpack.c.bf16 %v441_v27, %v437_v26  ;;  %v475_v27 = vld [vmem:[%s7874_s3 + $0x130] sm:$0xff] }
 0x255   :  { %4727 = vmatprep.mubr.msk.f32.mxu1 %vm5775_vm0, %v5776_v4  ;;  %4992 = vmatpush3.bf16.msra.mxu1 %v5929_v3 }
 0x256   :  { %4993 = vmatprep.subr.bf16.mxu1 %v5774_v0 }
 0x259   :  { %4995 = vmatpush3.bf16.msra.mxu1 %v5935_v6 }
 0x25a   :  { %5029 = vmatprep.subr.bf16.mxu1 %v5975_v28 }
 0x327   :  { %v208_v31 = vpop.f32.mrb[0].mxu1 }
 0x328   :  { %v209_v32 = vadd.f32 %v4443_v30, %v208_v31  ;;  %v4707_v33 = vpop.f32.mrb[1].mxu1  ;;  %v439_v30 = vld [vmem:[%s7874_s3 + $0x10] sm:$0xff] }
 0x329   :  { %v443_v31 = vld [vmem:[%s7874_s3 + $0x30] sm:$0xff] }
 0x32a   :  { %5588 = vtanh.f32 %v209_v32  ;;  %v212_v35 = vmul.f32 0.5, %v209_v32  ;;  %v446_v32 = vld [vmem:[%s7874_s3 + $0x48] sm:$0xff]  ;;  %v5989_v33 = vpack.c.bf16 %v443_v31, %v439_v30 }
 0x32b   :  { %v478_v30 = vld [vmem:[%s7874_s3 + $0x148] sm:$0xff] }
 0x32c   :  { %5590 = vtanh.f32 %v212_v35  ;;  %v448_v35 = vld [vmem:[%s7874_s3 + $0x58] sm:$0xff]  ;;  %v482_v31 = vld [vmem:[%s7874_s3 + $0x168] sm:$0xff] }
 0x334   :  { %v5589_v34 = vpop.eup %5588 }
 0x335   :  { %218 = vrot.lane.b32.xlu1 %v5589_v34, %s5777_s0  ;;  %v450_v34 = vld [vmem:[%s7874_s3 + $0x68] sm:$0xff] }
 0x336   :  { %v5591_v36 = vpop.eup %5590 }
 0x337   :  { %v214_v37 = vmul.f32 0.5, %v5591_v36  ;;  %v452_v36 = vld [vmem:[%s7874_s3 + $0x78] sm:$0xff] }
 0x339   :  { %v215_v38 = vadd.f32 0.5, %v214_v37  ;;  %v6002_v37 = vpack.c.bf16 %v450_v34, %v446_v32  ;;  %v480_v32 = vld [vmem:[%s7874_s3 + $0x158] sm:$0xff] }
 0x33a   :  { %v484_v34 = vld [vmem:[%s7874_s3 + $0x178] sm:$0xff] }
 0x3a7   :  { %v219_v39 = vpop.permute.xlu1 %218 }
 0x3a8   :  { %v5886_v40 = vmul.f32 %v219_v39, %v215_v38  ;;  %v445_v39 = vld [vmem:[%s7874_s3 + $0x40] sm:$0xff] }
 0x3a9   :  { %v6016_v43 = vpack.c.bf16 %v449_v41, %v445_v39  ;;  %v6144_v39 = vpack.c.bf16 %v482_v31, %v478_v30  ;;  %v477_v41 = vld [vmem:[%s7874_s3 + $0x140] sm:$0xff]  ;;  %v500_v31 = vld [vmem:[%s7874_s3 + $0x1f8] sm:$0xff] }
 0x3aa   :  { %5592 = vtanh.f32 %v5886_v40 }
 0x3b4   :  { %v5593_v47 = vpop.eup %5592 }
 0x3b5   :  { %224 = vrot.lane.b32.xlu0 %v5593_v47, %s5778_s20  ;;  %v454_v47 = vld [vmem:[%s7874_s3 + $0x88] sm:$0xff] }
 0x427   :  { %v225_v48 = vpop.permute.xlu0 %224 }
 0x428   :  { %v227_v49 = vmul.f32 %v225_v48, %v215_v38  ;;  %v6004_v38 = vpack.c.bf16 %v452_v36, %v448_v35  ;;  %v458_v48 = vld [vmem:[%s7874_s3 + $0xa8] sm:$0xff]  ;;  %v6138_v35 = vpack.c.bf16 %v473_v21, %v469_v20  ;;  %v6142_v36 = vpack.c.bf16 %v475_v27, %v471_v24  ;;  %v496_v27 = vld [vmem:[%s7874_s3 + $0x1d8] sm:$0xff] }
 0x429   :  { %v494_v21 = vld [vmem:[%s7874_s3 + $0x1c8] sm:$0xff] }
 0x42a   :  { %241 = vrot.lane.b32.xlu1 %v227_v49, %s5779_s21  ;;  %v498_v24 = vld [vmem:[%s7874_s3 + $0x1e8] sm:$0xff] }
 0x42b   :  { %v6220_v30 = vpack.c.bf16 %v498_v24, %v494_v21 }
 0x49c   :  { %v242_v50 = vpop.permute.xlu1 %241 }
 0x49d   :  { %4717 = vmatmul.mubr.msk.f32.vlgmr.msra.gmra.mrb[2].mxu0 %vm38_vm1, %v242_v50  ;;  %v6031_v50 = vpack.c.bf16 %v458_v48, %v454_v47  ;;  %v479_v47 = vld [vmem:[%s7874_s3 + $0x150] sm:$0xff] }
 0x49e   :  { %565 = vmatprep.mubr.f32.mxu0 %v5776_v4  ;;  %4999 = vmatpush1.bf16.msra.mxu0 %v5977_v29  ;;  %v483_v48 = vld [vmem:[%s7874_s3 + $0x170] sm:$0xff] }
 0x49f   :  { %5001 = vmatprep.subr.bf16.mxu0 %v6002_v37 }
 0x4a2   :  { %5003 = vmatpush1.bf16.msra.mxu0 %v6016_v43 }
 0x4a3   :  { %5005 = vmatprep.subr.bf16.mxu0 %v6031_v50 }
 0x570   :  { %v311_v52 = vpop.f32.mrb[2].mxu0 }
 0x571   :  { %v312_v53 = vadd.f32 %v4449_v51, %v311_v52  ;;  %v4718_v54 = vpop.f32.mrb[3].mxu0  ;;  %v456_v51 = vld [vmem:[%s7874_s3 + $0x98] sm:$0xff] }
 0x572   :  { %v460_v52 = vld [vmem:[%s7874_s3 + $0xb8] sm:$0xff] }
 0x573   :  { %5594 = vtanh.f32 %v312_v53  ;;  %v315_v56 = vmul.f32 0.5, %v312_v53  ;;  %v453_v53 = vld [vmem:[%s7874_s3 + $0x80] sm:$0xff]  ;;  %v6042_v54 = vpack.c.bf16 %v460_v52, %v456_v51  ;;  %v6166_v52 = vpack.c.bf16 %v483_v48, %v479_v47  ;;  %v495_v47 = vld [vmem:[%s7874_s3 + $0x1d0] sm:$0xff] }
 0x574   :  { %v499_v48 = vld [vmem:[%s7874_s3 + $0x1f0] sm:$0xff] }
 0x575   :  { %5596 = vtanh.f32 %v315_v56  ;;  %v455_v56 = vld [vmem:[%s7874_s3 + $0x90] sm:$0xff] }
 0x57d   :  { %v5595_v55 = vpop.eup %5594 }
 0x57e   :  { %321 = vrot.lane.b32.xlu0 %v5595_v55, %s5777_s0  ;;  %v457_v55 = vld [vmem:[%s7874_s3 + $0xa0] sm:$0xff] }
 0x57f   :  { %v5597_v57 = vpop.eup %5596 }
 0x580   :  { %v317_v58 = vmul.f32 0.5, %v5597_v57  ;;  %v459_v57 = vld [vmem:[%s7874_s3 + $0xb0] sm:$0xff] }
 0x581   :  { %v6067_v63 = vpack.c.bf16 %v459_v57, %v455_v56 }
 0x582   :  { %v318_v59 = vadd.f32 0.5, %v317_v58  ;;  %v6054_v58 = vpack.c.bf16 %v457_v55, %v453_v53 }
 0x584   :  { %5007 = vmatpush1.bf16.msra.mxu0 %v6054_v58 }
 0x5f0   :  { %v322_v60 = vpop.permute.xlu0 %321 }
 0x5f1   :  { %v5916_v61 = vmul.f32 %v322_v60, %v318_v59  ;;  %v466_v60 = vld [vmem:[%s7874_s3 + $0xe8] sm:$0xff] }
 0x5f3   :  { %5598 = vtanh.f32 %v5916_v61 }
 0x5fd   :  { %v5599_v62 = vpop.eup %5598 }
 0x5fe   :  { %327 = vrot.lane.b32.xlu1 %v5599_v62, %s5778_s20  ;;  %v464_v62 = vld [vmem:[%s7874_s3 + $0xd8] sm:$0xff] }
 0x670   :  { %v328_v7 = vpop.permute.xlu1 %327 }
 0x671   :  { %v330_v8 = vmul.f32 %v328_v7, %v318_v59  ;;  %v462_v59 = vld [vmem:[%s7874_s3 + $0xc8] sm:$0xff]  ;;  %v465_v7 = vld [vmem:[%s7874_s3 + $0xe0] sm:$0xff] }
 0x672   :  { %v6069_v1 = vpack.c.bf16 %v466_v60, %v462_v59  ;;  %v486_v60 = vld [vmem:[%s7874_s3 + $0x188] sm:$0xff] }
 0x673   :  { %344 = vrot.lane.b32.xlu0 %v330_v8, %s5779_s21 }
 0x674   :  { %5009 = vmatprep.subr.bf16.mxu0 %v6069_v1 }
 0x677   :  { %229 = vrot.lane.b32.xlu0 %v227_v49, %s5777_s0  ;;  %v6029_v49 = vpack.c.bf16 %v451_v45, %v447_v42  ;;  %v481_v42 = vld [vmem:[%s7874_s3 + $0x160] sm:$0xff]  ;;  %v6153_v45 = vpack.c.bf16 %v484_v34, %v480_v32 }
 0x678   :  { %v6162_v51 = vpack.c.bf16 %v481_v42, %v477_v41  ;;  %v493_v32 = vld [vmem:[%s7874_s3 + $0x1c0] sm:$0xff]  ;;  %v6231_v41 = vpack.c.bf16 %v500_v31, %v496_v27 }
 0x679   :  { %v497_v34 = vld [vmem:[%s7874_s3 + $0x1e0] sm:$0xff] }
 0x67a   :  { %v6233_v42 = vpack.c.bf16 %v497_v34, %v493_v32 }
 0x67b   :  { %332 = vrot.lane.b32.xlu0 %v330_v8, %s5778_s20  ;;  %v6081_v8 = vpack.c.bf16 %v468_v2, %v464_v62  ;;  %v490_v62 = vld [vmem:[%s7874_s3 + $0x1a8] sm:$0xff]  ;;  %v488_v2 = vld [vmem:[%s7874_s3 + $0x198] sm:$0xff] }
 0x67f   :  { %654 = vrot.lane.b32.xlu0 %v653_v9, %s5779_s21  ;;  %v463_v9 = vld [vmem:[%s7874_s3 + $0xd0] sm:$0xff] }
 0x6e5   :  { %v345_v10 = vpop.permute.xlu0 %344 }
 0x6e6   :  { %4728 = vmatmul.mubr.msk.f32.vlgmr.msra.gmra.mrb[2].mxu1 %vm38_vm1, %v345_v10  ;;  %v467_v10 = vld [vmem:[%s7874_s3 + $0xf0] sm:$0xff] }
 0x6e7   :  { %636 = vmatprep.mubr.f32.mxu1 %v5776_v4  ;;  %5031 = vmatpush1.bf16.msra.mxu1 %v5989_v33 }
 0x6e8   :  { %5033 = vmatprep.subr.bf16.mxu1 %v6004_v38 }
 0x6e9   :  { %v230_v12 = vpop.permute.xlu0 %229 }
 0x6ea   :  { %233 = vst.msk [vmem:[#allocation2] sm:$0x1] %vm232_vm3, %v230_v12  ;;  %v470_v12 = vld [vmem:[%s7874_s3 + $0x108] sm:$0xff] }
 0x6eb   :  { %5035 = vmatpush1.bf16.msra.mxu1 %v6029_v49 }
 0x6ec   :  { %5037 = vmatprep.subr.bf16.mxu1 %v6042_v54 }
 0x6ed   :  { %v333_v13 = vpop.permute.xlu0 %332 }
 0x6ee   :  { %336 = vst.msk [vmem:[#allocation2] sm:$0x1] %vm335_vm4, %v333_v13  ;;  %v474_v13 = vld [vmem:[%s7874_s3 + $0x128] sm:$0xff] }
 0x6ef   :  { %5039 = vmatpush1.bf16.msra.mxu1 %v6067_v63  ;;  %v6108_v19 = vpack.c.bf16 %v474_v13, %v470_v12 }
 0x6f0   :  { %5041 = vmatprep.subr.bf16.mxu1 %v6081_v8 }
 0x6f1   :  { %v655_v21 = vpop.permute.xlu0 %654 }
 0x7b9   :  { %v414_v15 = vpop.f32.mrb[2].mxu1 }
 0x7ba   :  { %v5951_v16 = vadd.f32 %v4455_v14, %v414_v15  ;;  %v4729_v17 = vpop.f32.mrb[3].mxu1  ;;  %v472_v14 = vld [vmem:[%s7874_s3 + $0x118] sm:$0xff] }
 0x7bb   :  { %v476_v15 = vld [vmem:[%s7874_s3 + $0x138] sm:$0xff]  ;;  %v6102_v17 = vpack.c.bf16 %v465_v7, %v461_v5 }
 0x7bc   :  { %5600 = vtanh.f32 %v5951_v16  ;;  %v6120_v26 = vpack.c.bf16 %v476_v15, %v472_v14  ;;  %v418_v53 = vmul.f32 0.5, %v5951_v16  ;;  %v6183_v16 = vpack.c.bf16 %v490_v62, %v486_v60  ;;  %v492_v7 = vld [vmem:[%s7874_s3 + $0x1b8] sm:$0xff]  ;;  %v487_v14 = vld [vmem:[%s7874_s3 + $0x190] sm:$0xff] }
 0x7bd   :  { %5011 = vmatpush1.bf16.msra.mxu0 %v6102_v17  ;;  %v6194_v12 = vpack.c.bf16 %v492_v7, %v488_v2  ;;  %v491_v15 = vld [vmem:[%s7874_s3 + $0x1b0] sm:$0xff] }
 0x7be   :  { %5013 = vmatprep.subr.bf16.mxu0 %v6108_v19  ;;  %5602 = vtanh.f32 %v418_v53  ;;  %v6206_v20 = vpack.c.bf16 %v491_v15, %v487_v14  ;;  %v6242_v53 = vpack.c.bf16 %v499_v48, %v495_v47 }
 0x7c1   :  { %5015 = vmatpush1.bf16.msra.mxu0 %v6138_v35 }
 0x7c2   :  { %5017 = vmatprep.subr.bf16.mxu0 %v6144_v39 }
 0x7c5   :  { %5019 = vmatpush1.bf16.msra.mxu0 %v6162_v51 }
 0x7c6   :  { %v5601_v18 = vpop.eup %5600  ;;  %5021 = vmatprep.subr.bf16.mxu0 %v6183_v16 }
 0x7c7   :  { %424 = vrot.lane.b32.xlu1 %v5601_v18, %s5777_s0  ;;  %v6106_v18 = vpack.c.bf16 %v467_v10, %v463_v9  ;;  %v485_v9 = vld [vmem:[%s7874_s3 + $0x180] sm:$0xff] }
 0x7c8   :  { %v5603_v55 = vpop.eup %5602  ;;  %v489_v10 = vld [vmem:[%s7874_s3 + $0x1a0] sm:$0xff] }
 0x7c9   :  { %5043 = vmatpush1.bf16.msra.mxu1 %v6106_v18  ;;  %v420_v56 = vmul.f32 0.5, %v5603_v55  ;;  %v6196_v13 = vpack.c.bf16 %v489_v10, %v485_v9 }
 0x7ca   :  { %5045 = vmatprep.subr.bf16.mxu1 %v6120_v26 }
 0x7cb   :  { %v421_v57 = vadd.f32 0.5, %v420_v56  ;;  %5023 = vmatpush1.bf16.msra.mxu0 %v6196_v13 }
 0x7cc   :  { %5025 = vmatprep.subr.bf16.mxu0 %v6220_v30 }
 0x7cd   :  { %5047 = vmatpush1.bf16.msra.mxu1 %v6142_v36 }
 0x7ce   :  { %5049 = vmatprep.subr.bf16.mxu1 %v6153_v45 }
 0x7cf   :  { %5027 = vmatpush1.bf16.msra.mxu0 %v6233_v42 }
 0x7d0   :  { %5060 = vmatprep.subr.bf16.mxu0 %v5774_v0 }
 0x7d1   :  { %5051 = vmatpush1.bf16.msra.mxu1 %v6166_v52 }
 0x7d2   :  { %5053 = vmatprep.subr.bf16.mxu1 %v6194_v12 }
 0x7d5   :  { %5055 = vmatpush1.bf16.msra.mxu1 %v6206_v20 }
 0x7d6   :  { %5057 = vmatprep.subr.bf16.mxu1 %v6231_v41 }
 0x7d9   :  { %5059 = vmatpush1.bf16.msra.mxu1 %v6242_v53 }
 0x7da   :  { %5066 = vmatprep.subr.bf16.mxu1 %v5774_v0 }
 0x839   :  { %v425_v59 = vpop.permute.xlu1 %424 }
 0x83a   :  { %v6181_v5 = vmul.f32 %v425_v59, %v421_v57 }
 0x83c   :  { %5604 = vtanh.f32 %v6181_v5 }
 0x846   :  { %v5605_v55 = vpop.eup %5604 }
 0x847   :  { %430 = vrot.lane.b32.xlu1 %v5605_v55, %s5778_s20 }
 0x8b9   :  { %v431_v56 = vpop.permute.xlu1 %430 }
 0x8ba   :  { %v433_v59 = vmul.f32 %v431_v56, %v421_v57  ;;  %v4457_v56 = vld [vmem:[%s7872_s4 + $0x1] sm:$0x1] }
 0x8bc   :  { %435 = vst.msk [vmem:[#allocation2] sm:$0x1] %vm434_vm5, %v433_v59 }
 0x8c3   :  { %v436_v60 = vld [vmem:[#allocation2] sm:$0x1] }
 0x8c4   :  { %566 = vmatmul.mubr.f32.vlgmr.msra.gmra.mrb[4].mxu0 %v436_v60  ;;  %637 = vmatmul.mubr.f32.vlgmr.msra.gmra.mrb[4].mxu1 %v436_v60 }
 0x8c5   :  { %5062 = vmatpush3.bf16.msra.mxu0 %v5866_v23  ;;  %4738 = vmatprep.mubr.msk.f32.mxu0 %vm5775_vm0, %v5776_v4 }
 0x8c6   :  { %5063 = vmatprep.subr.bf16.mxu0 %v5774_v0  ;;  %5068 = vmatpush3.bf16.msra.mxu1 %v5898_v44 }
 0x8c7   :  { %5069 = vmatprep.subr.bf16.mxu1 %v5774_v0  ;;  %4749 = vmatprep.mubr.msk.f32.mxu1 %vm5775_vm0, %v5776_v4 }
 0x8c9   :  { %5065 = vmatpush3.bf16.msra.mxu0 %v5872_v25 }
 0x8ca   :  { %5071 = vmatpush3.bf16.msra.mxu1 %v5904_v46  ;;  %5072 = vmatprep.subr.bf16.mxu0 %v5774_v0 }
 0x8cb   :  { %5079 = vmatprep.subr.bf16.mxu1 %v5964_v22 }
 0x997   :  { %v567_v23 = vpop.f32.mrb[4].mxu0  ;;  %v6263_v57 = vpop.f32.mrb[4].mxu1 }
 0x998   :  { %v644_v62 = vrot.slane %v567_v23, 7  ;;  %v569_v2 = vpop.f32.mrb[5].mxu0  ;;  %v6265_v7 = vpop.f32.mrb[5].mxu1 }
 0x99a   :  { %v646_v44 = vadd.f32 %v644_v62, %v5849_v11 }
 0x99c   :  { %5606 = vtanh.f32 %v646_v44  ;;  %v647_v25 = vmul.f32 0.5, %v646_v44 }
 0x99e   :  { %5608 = vtanh.f32 %v647_v25 }
 0x9a6   :  { %v5607_v9 = vpop.eup %5606 }
 0x9a7   :  { %659 = vrot.lane.b32.xlu1 %v5607_v9, %s5777_s0 }
 0x9a8   :  { %v5609_v46 = vpop.eup %5608 }
 0x9a9   :  { %v649_v10 = vmul.f32 0.5, %v5609_v46 }
 0x9ab   :  { %v650_v14 = vadd.f32 0.5, %v649_v10 }
 0x9ad   :  { %v657_v24 = vmul.f32 %v655_v21, %v650_v14 }
 0xa19   :  { %v660_v15 = vpop.permute.xlu1 %659 }
 0xa1a   :  { %v662_v22 = vmul.f32 %v660_v15, %v650_v14 }
 0xa1c   :  { %664 = vrot.lane.b32.xlu1 %v662_v22, %s5779_s21 }
 0xa8e   :  { %v665_v27 = vpop.permute.xlu1 %664 }
 0xa8f   :  { %v6270_v31 = vadd.f32 %v665_v27, %v657_v24 }
 0xa91   :  { %5610 = vtanh.f32 %v6270_v31 }
 0xa9b   :  { %v5611_v32 = vpop.eup %5610 }
 0xa9c   :  { %670 = vrot.lane.b32.xlu0 %v5611_v32, %s5777_s0 }
 0xb0e   :  { %v671_v34 = vpop.permute.xlu0 %670 }
 0xb0f   :  { %v6274_v47 = vmul.f32 %v671_v34, %v650_v14 }
 0xb11   :  { %v685_v48 = vrot.slane %v6274_v47, 1 }
 0xb13   :  { %686 = vrot.lane.b32.xlu1 %v685_v48, %s5779_s21 }
 0xb17   :  { %767 = vrot.lane.b32.xlu1 %v5886_v40, %s5779_s21 }
 0xb85   :  { %v687_v55 = vpop.permute.xlu1 %686 }
 0xb86   :  { %4739 = vmatmul.mubr.msk.f32.vlgmr.msra.gmra.mrb[6].mxu0 %vm38_vm1, %v687_v55 }
 0xb87   :  { %5074 = vmatpush3.bf16.msra.mxu0 %v5929_v3  ;;  %4760 = vmatprep.mubr.msk.f32.mxu0 %vm5775_vm0, %v5776_v4 }
 0xb88   :  { %5075 = vmatprep.subr.bf16.mxu0 %v5774_v0 }
 0xb8b   :  { %5077 = vmatpush3.bf16.msra.mxu0 %v5935_v6 }
 0xb8c   :  { %5111 = vmatprep.subr.bf16.mxu0 %v5975_v28  ;;  %v768_v28 = vpop.permute.xlu1 %767 }
 0xc59   :  { %v756_v59 = vpop.f32.mrb[6].mxu0 }
 0xc5a   :  { %v757_v40 = vadd.f32 %v4457_v56, %v756_v59  ;;  %v4740_v60 = vpop.f32.mrb[7].mxu0 }
 0xc5c   :  { %v760_v23 = vadd.f32 %v757_v40, %v569_v2 }
 0xc5e   :  { %5612 = vtanh.f32 %v760_v23  ;;  %v761_v3 = vmul.f32 0.5, %v760_v23 }
 0xc60   :  { %5614 = vtanh.f32 %v761_v3 }
 0xc68   :  { %v5613_v62 = vpop.eup %5612 }
 0xc69   :  { %772 = vrot.lane.b32.xlu0 %v5613_v62, %s5777_s0 }
 0xc6a   :  { %v5615_v44 = vpop.eup %5614 }
 0xc6b   :  { %v763_v9 = vmul.f32 0.5, %v5615_v44 }
 0xc6d   :  { %v764_v25 = vadd.f32 0.5, %v763_v9 }
 0xc6f   :  { %v770_v10 = vmul.f32 %v768_v28, %v764_v25 }
 0xcdb   :  { %v773_v6 = vpop.permute.xlu0 %772 }
 0xcdc   :  { %v775_v46 = vmul.f32 %v773_v6, %v764_v25 }
 0xcde   :  { %777 = vrot.lane.b32.xlu0 %v775_v46, %s5779_s21 }
 0xd50   :  { %v778_v14 = vpop.permute.xlu0 %777 }
 0xd51   :  { %v6292_v15 = vadd.f32 %v778_v14, %v770_v10 }
 0xd53   :  { %5616 = vtanh.f32 %v6292_v15 }
 0xd5d   :  { %v5617_v2 = vpop.eup %5616 }
 0xd5e   :  { %783 = vrot.lane.b32.xlu1 %v5617_v2, %s5777_s0 }
 0xdd0   :  { %v784_v22 = vpop.permute.xlu1 %783 }
 0xdd1   :  { %v6296_v21 = vmul.f32 %v784_v22, %v764_v25  ;;  %v1227_v22 = vrot.slane %v6270_v31, 7  ;;  %v1255_v31 = vld [vmem:[%s7873_s2 + $0x18] sm:$0xff] }
 0xdd3   :  { %797 = vrot.lane.b32.xlu0 %v6296_v21, %s5779_s21 }
 0xdd7   :  { %878 = vrot.lane.b32.xlu0 %v5916_v61, %s5779_s21  ;;  %v4463_v61 = vld [vmem:[%s7872_s4 + $0x2] sm:$0x1] }
 0xe45   :  { %v798_v24 = vpop.permute.xlu0 %797 }
 0xe46   :  { %4750 = vmatmul.mubr.msk.f32.vlgmr.msra.gmra.mrb[6].mxu1 %vm38_vm1, %v798_v24 }
 0xe47   :  { %5081 = vmatpush1.bf16.msra.mxu1 %v5977_v29  ;;  %1139 = vmatprep.mubr.f32.mxu1 %v5776_v4 }
 0xe48   :  { %5083 = vmatprep.subr.bf16.mxu1 %v6002_v37 }
 0xe4b   :  { %5085 = vmatpush1.bf16.msra.mxu1 %v6016_v43 }
 0xe4c   :  { %5087 = vmatprep.subr.bf16.mxu1 %v6031_v50 }
 0xe4f   :  { %5089 = vmatpush1.bf16.msra.mxu1 %v6054_v58 }
 0xe50   :  { %5091 = vmatprep.subr.bf16.mxu1 %v6069_v1 }
 0xe53   :  { %5093 = vmatpush1.bf16.msra.mxu1 %v6102_v17 }
 0xe54   :  { %5095 = vmatprep.subr.bf16.mxu1 %v6108_v19 }
 0xe57   :  { %5097 = vmatpush1.bf16.msra.mxu1 %v6138_v35 }
 0xe58   :  { %5099 = vmatprep.subr.bf16.mxu1 %v6144_v39 }
 0xe5b   :  { %5101 = vmatpush1.bf16.msra.mxu1 %v6162_v51 }
 0xe5c   :  { %5103 = vmatprep.subr.bf16.mxu1 %v6183_v16  ;;  %v879_v16 = vpop.permute.xlu0 %878 }
 0xe5f   :  { %5105 = vmatpush1.bf16.msra.mxu1 %v6196_v13 }
 0xe60   :  { %5107 = vmatprep.subr.bf16.mxu1 %v6220_v30 }
 0xe63   :  { %5109 = vmatpush1.bf16.msra.mxu1 %v6233_v42 }
 0xe64   :  { %5142 = vmatprep.subr.bf16.mxu1 %v5774_v0 }
 0xf19   :  { %v867_v29 = vpop.f32.mrb[6].mxu1 }
 0xf1a   :  { %v868_v37 = vadd.f32 %v4463_v61, %v867_v29  ;;  %v4751_v43 = vpop.f32.mrb[7].mxu1  ;;  %v1252_v29 = vld [vmem:[%s7873_s2] sm:$0xff] }
 0xf1b   :  { %v1254_v43 = vld [vmem:[%s7873_s2 + $0x10] sm:$0xff] }
 0xf1c   :  { %v871_v50 = vadd.f32 %v868_v37, %v6263_v57  ;;  %v1253_v37 = vld [vmem:[%s7873_s2 + $0x8] sm:$0xff] }
 0xf1e   :  { %5618 = vtanh.f32 %v871_v50  ;;  %v872_v1 = vmul.f32 0.5, %v871_v50  ;;  %v6393_v50 = vpack.c.bf16 %v1253_v37, %v1252_v29 }
 0xf20   :  { %5620 = vtanh.f32 %v872_v1 }
 0xf28   :  { %v5619_v58 = vpop.eup %5618 }
 0xf29   :  { %883 = vrot.lane.b32.xlu1 %v5619_v58, %s5777_s0  ;;  %v6399_v58 = vpack.c.bf16 %v1255_v31, %v1254_v43  ;;  %v4483_v31 = vld [vmem:[%s7872_s4 + $0x3] sm:$0x1] }
 0xf2a   :  { %v5621_v17 = vpop.eup %5620 }
 0xf2b   :  { %v874_v19 = vmul.f32 0.5, %v5621_v17 }
 0xf2d   :  { %v875_v35 = vadd.f32 0.5, %v874_v19 }
 0xf2f   :  { %v881_v13 = vmul.f32 %v879_v16, %v875_v35 }
 0xf9b   :  { %v884_v39 = vpop.permute.xlu1 %883 }
 0xf9c   :  { %v886_v51 = vmul.f32 %v884_v39, %v875_v35 }
 0xf9e   :  { %888 = vrot.lane.b32.xlu1 %v886_v51, %s5779_s21  ;;  %v4471_v51 = vld [vmem:[%s7872_s4 + $0x1] sm:$0x1] }
0x1010   :  { %v889_v30 = vpop.permute.xlu1 %888 }
0x1011   :  { %v6326_v42 = vadd.f32 %v889_v30, %v881_v13 }
0x1013   :  { %5622 = vtanh.f32 %v6326_v42 }
0x101d   :  { %v5623_v57 = vpop.eup %5622 }
0x101e   :  { %894 = vrot.lane.b32.xlu0 %v5623_v57, %s5777_s0 }
0x1090   :  { %v895_v27 = vpop.permute.xlu0 %894 }
0x1091   :  { %v897_v32 = vmul.f32 %v895_v27, %v875_v35 }
0x1093   :  { %908 = vrot.lane.b32.xlu1 %v897_v32, %s5779_s21 }
0x1097   :  { %989 = vrot.lane.b32.xlu1 %v6181_v5, %s5779_s21 }
0x109b   :  { %675 = vrot.lane.b32.xlu1 %v6274_v47, %s5779_s21 }
0x1105   :  { %v909_v34 = vpop.permute.xlu1 %908 }
0x1106   :  { %4761 = vmatmul.mubr.msk.f32.vlgmr.msra.gmra.mrb[8].mxu0 %vm38_vm1, %v909_v34 }
0x1107   :  { %5113 = vmatpush1.bf16.msra.mxu0 %v5989_v33  ;;  %1210 = vmatprep.mubr.f32.mxu0 %v5776_v4  ;;  %v4469_v33 = vld [vmem:[%s7872_s4 + $0x3] sm:$0x1] }
0x1108   :  { %5115 = vmatprep.subr.bf16.mxu0 %v6004_v38 }
0x1109   :  { %v990_v48 = vpop.permute.xlu1 %989 }
0x110b   :  { %5117 = vmatpush1.bf16.msra.mxu0 %v6029_v49 }
0x110c   :  { %5119 = vmatprep.subr.bf16.mxu0 %v6042_v54 }
0x110d   :  { %v676_v55 = vpop.permute.xlu1 %675 }
0x110e   :  { %679 = vst.msk [vmem:[#allocation2 - $0x1] sm:$0x2] %vm678_vm6, %v676_v55 }
0x110f   :  { %5121 = vmatpush1.bf16.msra.mxu0 %v6067_v63 }
0x1110   :  { %5123 = vmatprep.subr.bf16.mxu0 %v6081_v8 }
0x1113   :  { %5125 = vmatpush1.bf16.msra.mxu0 %v6106_v18 }
0x1114   :  { %5127 = vmatprep.subr.bf16.mxu0 %v6120_v26 }
0x1117   :  { %5129 = vmatpush1.bf16.msra.mxu0 %v6142_v36 }
0x1118   :  { %5131 = vmatprep.subr.bf16.mxu0 %v6153_v45 }
0x111b   :  { %5133 = vmatpush1.bf16.msra.mxu0 %v6166_v52 }
0x111c   :  { %5135 = vmatprep.subr.bf16.mxu0 %v6194_v12 }
0x111f   :  { %5137 = vmatpush1.bf16.msra.mxu0 %v6206_v20 }
0x1120   :  { %5139 = vmatprep.subr.bf16.mxu0 %v6231_v41 }
0x1123   :  { %5141 = vmatpush1.bf16.msra.mxu0 %v6242_v53 }
0x1124   :  { %5148 = vmatprep.subr.bf16.mxu0 %v5774_v0 }
0x11d9   :  { %v978_v38 = vpop.f32.mrb[8].mxu0 }
0x11da   :  { %v979_v49 = vadd.f32 %v4469_v33, %v978_v38  ;;  %v4762_v54 = vpop.f32.mrb[9].mxu0 }
0x11dc   :  { %v982_v63 = vadd.f32 %v979_v49, %v6265_v7 }
0x11de   :  { %5624 = vtanh.f32 %v982_v63  ;;  %v983_v18 = vmul.f32 0.5, %v982_v63 }
0x11e0   :  { %5626 = vtanh.f32 %v983_v18  ;;  %v4474_v18 = vld [vmem:[%s7873_s2 + $0x28] sm:$0xff] }
0x11e8   :  { %v5625_v8 = vpop.eup %5624 }
0x11e9   :  { %994 = vrot.lane.b32.xlu0 %v5625_v8, %s5777_s0  ;;  %v4473_v8 = vld [vmem:[%s7873_s2 + $0x20] sm:$0xff] }
0x11ea   :  { %v5627_v26 = vpop.eup %5626 }
0x11eb   :  { %v985_v36 = vmul.f32 0.5, %v5627_v26  ;;  %v4475_v26 = vld [vmem:[%s7873_s2 + $0x30] sm:$0xff] }
0x11ed   :  { %v986_v45 = vadd.f32 0.5, %v985_v36  ;;  %v6430_v36 = vpack.c.bf16 %v4474_v18, %v4473_v8  ;;  %v1573_v18 = vld [vmem:[%s7874_s3 + $0x10] sm:$0xff] }
0x11ef   :  { %v992_v12 = vmul.f32 %v990_v48, %v986_v45 }
0x125b   :  { %v995_v52 = vpop.permute.xlu0 %994 }
0x125c   :  { %v997_v5 = vmul.f32 %v995_v52, %v986_v45 }
0x125e   :  { %999 = vrot.lane.b32.xlu0 %v997_v5, %s5779_s21 }
0x1262   :  { %788 = vrot.lane.b32.xlu0 %v6296_v21, %s5777_s0 }
0x1266   :  { %899 = vrot.lane.b32.xlu0 %v897_v32, %s5778_s20 }
0x12d0   :  { %v1000_v20 = vpop.permute.xlu0 %999 }
0x12d1   :  { %v6362_v41 = vadd.f32 %v1000_v20, %v992_v12 }
0x12d3   :  { %5628 = vtanh.f32 %v6362_v41 }
0x12d4   :  { %v789_v53 = vpop.permute.xlu0 %788 }
0x12d5   :  { %791 = vst.msk [vmem:[#allocation2] sm:$0x1] %vm232_vm3, %v789_v53  ;;  %v4477_v53 = vld [vmem:[%s7872_s4 + $0x2] sm:$0x1] }
0x12d8   :  { %v900_v7 = vpop.permute.xlu0 %899 }
0x12d9   :  { %902 = vst.msk [vmem:[#allocation2] sm:$0x1] %vm335_vm4, %v900_v7 }
0x12dd   :  { %v5629_v47 = vpop.eup %5628 }
0x12de   :  { %1005 = vrot.lane.b32.xlu1 %v5629_v47, %s5777_s0 }
0x1350   :  { %v1006_v56 = vpop.permute.xlu1 %1005 }
0x1351   :  { %v1008_v59 = vmul.f32 %v1006_v56, %v986_v45 }
0x1353   :  { %1009 = vst.msk [vmem:[#allocation2] sm:$0x1] %vm434_vm5, %v1008_v59 }
0x135a   :  { %v1010_v40 = vld [vmem:[#allocation2] sm:$0x1] }
0x135b   :  { %1140 = vmatmul.mubr.f32.vlgmr.msra.gmra.mrb[8].mxu1 %v1010_v40  ;;  %1211 = vmatmul.mubr.f32.vlgmr.msra.gmra.mrb[10].mxu0 %v1010_v40 }
0x135c   :  { %4771 = vmatprep.mubr.msk.f32.mxu1 %vm5775_vm0, %v5776_v4  ;;  %4782 = vmatprep.mubr.msk.f32.mxu0 %vm5775_vm0, %v5776_v4 }
0x135d   :  { %5144 = vmatpush3.bf16.msra.mxu1 %v6393_v50  ;;  %5150 = vmatpush3.bf16.msra.mxu0 %v6430_v36 }
0x135e   :  { %5145 = vmatprep.subr.bf16.mxu1 %v5774_v0  ;;  %5151 = vmatprep.subr.bf16.mxu0 %v5774_v0 }
0x1361   :  { %5147 = vmatpush3.bf16.msra.mxu1 %v6399_v58 }
0x1362   :  { %5154 = vmatprep.subr.bf16.mxu1 %v5774_v0 }
0x142e   :  { %v1141_v60 = vpop.f32.mrb[8].mxu1  ;;  %v6373_v23 = vpop.f32.mrb[10].mxu0 }
0x142f   :  { %v1218_v62 = vrot.slane %v1141_v60, 6  ;;  %v1143_v3 = vpop.f32.mrb[9].mxu1  ;;  %v6375_v44 = vpop.f32.mrb[11].mxu0 }
0x1431   :  { %v1220_v9 = vadd.f32 %v1218_v62, %v5849_v11 }
0x1433   :  { %5630 = vtanh.f32 %v1220_v9  ;;  %v1221_v6 = vmul.f32 0.5, %v1220_v9 }
0x1435   :  { %5632 = vtanh.f32 %v1221_v6 }
0x143d   :  { %v5631_v25 = vpop.eup %5630 }
0x143e   :  { %1231 = vrot.lane.b32.xlu1 %v5631_v25, %s5777_s0 }
0x143f   :  { %v5633_v46 = vpop.eup %5632 }
0x1440   :  { %v1223_v28 = vmul.f32 0.5, %v5633_v46 }
0x1442   :  { %v1224_v10 = vadd.f32 0.5, %v1223_v28 }
0x1444   :  { %v1229_v21 = vmul.f32 %v1227_v22, %v1224_v10 }
0x14b0   :  { %v1232_v14 = vpop.permute.xlu1 %1231 }
0x14b1   :  { %v1234_v2 = vmul.f32 %v1232_v14, %v1224_v10  ;;  %v4480_v14 = vld [vmem:[%s7873_s2 + $0x48] sm:$0xff] }
0x14b3   :  { %1236 = vrot.lane.b32.xlu0 %v1234_v2, %s5779_s21  ;;  %v4481_v2 = vld [vmem:[%s7873_s2 + $0x50] sm:$0xff] }
0x1525   :  { %v1237_v24 = vpop.permute.xlu0 %1236 }
0x1526   :  { %v6381_v61 = vadd.f32 %v1237_v24, %v1229_v21 }
0x1528   :  { %5634 = vtanh.f32 %v6381_v61 }
0x1532   :  { %v5635_v1 = vpop.eup %5634 }
0x1533   :  { %1242 = vrot.lane.b32.xlu1 %v5635_v1, %s5777_s0 }
0x15a5   :  { %v1243_v17 = vpop.permute.xlu1 %1242 }
0x15a6   :  { %v6405_v19 = vmul.f32 %v1243_v17, %v1224_v10 }
0x15a8   :  { %v1257_v35 = vrot.slane %v6405_v19, 2 }
0x15aa   :  { %1258 = vrot.lane.b32.xlu0 %v1257_v35, %s5779_s21 }
0x161c   :  { %v1259_v39 = vpop.permute.xlu0 %1258 }
0x161d   :  { %4772 = vmatmul.mubr.msk.f32.vlgmr.msra.gmra.mrb[10].mxu1 %vm38_vm1, %v1259_v39 }
0x161e   :  { %4793 = vmatprep.mubr.msk.f32.mxu1 %vm5775_vm0, %v5776_v4 }
0x16f0   :  { %v1328_v16 = vpop.f32.mrb[10].mxu1 }
0x16f1   :  { %v1329_v13 = vadd.f32 %v4471_v51, %v1328_v16  ;;  %v4773_v30 = vpop.f32.mrb[11].mxu1 }
0x16f3   :  { %v1332_v57 = vadd.f32 %v1329_v13, %v1143_v3 }
0x16f5   :  { %5636 = vtanh.f32 %v1332_v57  ;;  %v1333_v32 = vmul.f32 0.5, %v1332_v57 }
0x16f7   :  { %5638 = vtanh.f32 %v1333_v32 }
0x16ff   :  { %v5637_v27 = vpop.eup %5636 }
0x1700   :  { %1340 = vrot.lane.b32.xlu1 %v5637_v27, %s5777_s0 }
0x1701   :  { %v5639_v34 = vpop.eup %5638 }
0x1702   :  { %v1335_v48 = vmul.f32 0.5, %v5639_v34  ;;  %v1574_v34 = vld [vmem:[%s7874_s3 + $0x18] sm:$0xff] }
0x1704   :  { %v1336_v55 = vadd.f32 0.5, %v1335_v48 }
0x1706   :  { %v1338_v49 = vmul.f32 %v1336_v55, %v6292_v15  ;;  %v4476_v15 = vld [vmem:[%s7873_s2 + $0x38] sm:$0xff] }
0x1707   :  { %v6436_v45 = vpack.c.bf16 %v4476_v15, %v4475_v26  ;;  %v1577_v26 = vld [vmem:[%s7874_s3 + $0x30] sm:$0xff]  ;;  %v1580_v15 = vld [vmem:[%s7874_s3 + $0x48] sm:$0xff] }
0x1709   :  { %5153 = vmatpush3.bf16.msra.mxu0 %v6436_v45 }
0x1772   :  { %v1341_v33 = vpop.permute.xlu1 %1340 }
0x1773   :  { %v1343_v38 = vmul.f32 %v1341_v33, %v1336_v55  ;;  %v1578_v33 = vld [vmem:[%s7874_s3 + $0x38] sm:$0xff] }
0x1775   :  { %1345 = vrot.lane.b32.xlu0 %v1343_v38, %s5779_s21  ;;  %v1571_v38 = vld [vmem:[%s7874_s3] sm:$0xff] }
0x17e7   :  { %v1346_v54 = vpop.permute.xlu0 %1345 }
0x17e8   :  { %v6418_v63 = vadd.f32 %v1346_v54, %v1338_v49  ;;  %v1575_v49 = vld [vmem:[%s7874_s3 + $0x20] sm:$0xff]  ;;  %v6514_v54 = vpack.c.bf16 %v1578_v33, %v1574_v34 }
0x17e9   :  { %v6516_v8 = vpack.c.bf16 %v1575_v49, %v1571_v38  ;;  %v1607_v33 = vld [vmem:[%s7874_s3 + $0x120] sm:$0xff] }
0x17ea   :  { %5640 = vtanh.f32 %v6418_v63 }
0x17f4   :  { %v5641_v52 = vpop.eup %5640 }
0x17f5   :  { %1351 = vrot.lane.b32.xlu1 %v5641_v52, %s5777_s0  ;;  %v6528_v52 = vpack.c.bf16 %v1577_v26, %v1573_v18  ;;  %v1605_v18 = vld [vmem:[%s7874_s3 + $0x110] sm:$0xff] }
0x17f6   :  { %v1609_v26 = vld [vmem:[%s7874_s3 + $0x130] sm:$0xff] }
0x1867   :  { %v1352_v5 = vpop.permute.xlu1 %1351 }
0x1868   :  { %v6441_v12 = vmul.f32 %v1352_v5, %v1336_v55  ;;  %v1584_v5 = vld [vmem:[%s7874_s3 + $0x68] sm:$0xff] }
0x186a   :  { %1365 = vrot.lane.b32.xlu0 %v6441_v12, %s5779_s21 }
0x18dc   :  { %v1366_v20 = vpop.permute.xlu0 %1365 }
0x18dd   :  { %4783 = vmatmul.mubr.msk.f32.vlgmr.msra.gmra.mrb[12].mxu0 %vm38_vm1, %v1366_v20  ;;  %v1582_v20 = vld [vmem:[%s7874_s3 + $0x58] sm:$0xff] }
0x18de   :  { %1699 = vmatprep.mubr.f32.mxu0 %v5776_v4 }
0x19b0   :  { %v1435_v7 = vpop.f32.mrb[12].mxu0 }
0x19b1   :  { %v1436_v47 = vadd.f32 %v4477_v53, %v1435_v7  ;;  %v4784_v56 = vpop.f32.mrb[13].mxu0  ;;  %v1586_v53 = vld [vmem:[%s7874_s3 + $0x78] sm:$0xff]  ;;  %v6542_v7 = vpack.c.bf16 %v1584_v5, %v1580_v15  ;;  %v1612_v15 = vld [vmem:[%s7874_s3 + $0x148] sm:$0xff] }
0x19b2   :  { %v1579_v56 = vld [vmem:[%s7874_s3 + $0x40] sm:$0xff]  ;;  %v1616_v5 = vld [vmem:[%s7874_s3 + $0x168] sm:$0xff] }
0x19b3   :  { %v1439_v59 = vadd.f32 %v1436_v47, %v6373_v23  ;;  %v4479_v23 = vld [vmem:[%s7873_s2 + $0x40] sm:$0xff]  ;;  %v6544_v47 = vpack.c.bf16 %v1586_v53, %v1582_v20  ;;  %v1614_v20 = vld [vmem:[%s7874_s3 + $0x158] sm:$0xff] }
0x19b4   :  { %v6466_v22 = vpack.c.bf16 %v4480_v14, %v4479_v23  ;;  %v1591_v14 = vld [vmem:[%s7874_s3 + $0xa0] sm:$0xff]  ;;  %v1618_v53 = vld [vmem:[%s7874_s3 + $0x178] sm:$0xff] }
0x19b5   :  { %5642 = vtanh.f32 %v1439_v59  ;;  %v1440_v60 = vmul.f32 0.5, %v1439_v59  ;;  %v1583_v59 = vld [vmem:[%s7874_s3 + $0x60] sm:$0xff] }
0x19b6   :  { %5156 = vmatpush3.bf16.msra.mxu1 %v6466_v22 }
0x19b7   :  { %5644 = vtanh.f32 %v1440_v60  ;;  %5157 = vmatprep.subr.bf16.mxu1 %v5774_v0  ;;  %v1585_v60 = vld [vmem:[%s7874_s3 + $0x70] sm:$0xff] }
0x19bf   :  { %v5643_v40 = vpop.eup %5642 }
0x19c0   :  { %1447 = vrot.lane.b32.xlu1 %v5643_v40, %s5777_s0  ;;  %v1581_v40 = vld [vmem:[%s7874_s3 + $0x50] sm:$0xff] }
0x19c1   :  { %v5645_v62 = vpop.eup %5644 }
0x19c2   :  { %v1442_v3 = vmul.f32 0.5, %v5645_v62  ;;  %v1588_v62 = vld [vmem:[%s7874_s3 + $0x88] sm:$0xff] }
0x19c4   :  { %v1443_v9 = vadd.f32 0.5, %v1442_v3  ;;  %v1592_v3 = vld [vmem:[%s7874_s3 + $0xa8] sm:$0xff] }
0x19c6   :  { %v1445_v46 = vmul.f32 %v1443_v9, %v6326_v42  ;;  %v4482_v42 = vld [vmem:[%s7873_s2 + $0x58] sm:$0xff] }
0x19c7   :  { %v6472_v21 = vpack.c.bf16 %v4482_v42, %v4481_v2  ;;  %v1589_v2 = vld [vmem:[%s7874_s3 + $0x90] sm:$0xff] }
0x19c8   :  { %v1593_v42 = vld [vmem:[%s7874_s3 + $0xb0] sm:$0xff] }
0x19c9   :  { %5159 = vmatpush3.bf16.msra.mxu1 %v6472_v21 }
0x19ca   :  { %5193 = vmatprep.subr.bf16.mxu1 %v6514_v54 }
0x1a32   :  { %v1448_v25 = vpop.permute.xlu1 %1447 }
0x1a33   :  { %v1450_v6 = vmul.f32 %v1448_v25, %v1443_v9  ;;  %v6572_v25 = vpack.c.bf16 %v1592_v3, %v1588_v62  ;;  %v6693_v62 = vpack.c.bf16 %v1618_v53, %v1614_v20  ;;  %v1615_v3 = vld [vmem:[%s7874_s3 + $0x160] sm:$0xff] }
0x1a34   :  { %v1627_v20 = vld [vmem:[%s7874_s3 + $0x1c0] sm:$0xff] }
0x1a35   :  { %1452 = vrot.lane.b32.xlu0 %v1450_v6, %s5779_s21  ;;  %v1590_v6 = vld [vmem:[%s7874_s3 + $0x98] sm:$0xff]  ;;  %v1631_v53 = vld [vmem:[%s7874_s3 + $0x1e0] sm:$0xff] }
0x1aa7   :  { %v1453_v28 = vpop.permute.xlu0 %1452 }
0x1aa8   :  { %v6454_v10 = vadd.f32 %v1453_v28, %v1445_v46  ;;  %v1594_v46 = vld [vmem:[%s7874_s3 + $0xb8] sm:$0xff]  ;;  %v1587_v28 = vld [vmem:[%s7874_s3 + $0x80] sm:$0xff] }
0x1aa9   :  { %v6583_v23 = vpack.c.bf16 %v1594_v46, %v1590_v6  ;;  %v1613_v6 = vld [vmem:[%s7874_s3 + $0x150] sm:$0xff] }
0x1aaa   :  { %5646 = vtanh.f32 %v6454_v10  ;;  %v1617_v46 = vld [vmem:[%s7874_s3 + $0x170] sm:$0xff] }
0x1ab4   :  { %v5647_v24 = vpop.eup %5646 }
0x1ab5   :  { %1458 = vrot.lane.b32.xlu1 %v5647_v24, %s5777_s0  ;;  %v1596_v24 = vld [vmem:[%s7874_s3 + $0xc8] sm:$0xff] }
0x1b27   :  { %v1459_v29 = vpop.permute.xlu1 %1458 }
0x1b28   :  { %v6477_v37 = vmul.f32 %v1459_v29, %v1443_v9  ;;  %v6570_v9 = vpack.c.bf16 %v1585_v60, %v1581_v40  ;;  %v1600_v29 = vld [vmem:[%s7874_s3 + $0xe8] sm:$0xff]  ;;  %v1611_v40 = vld [vmem:[%s7874_s3 + $0x140] sm:$0xff]  ;;  %v6691_v60 = vpack.c.bf16 %v1616_v5, %v1612_v15  ;;  %v1634_v5 = vld [vmem:[%s7874_s3 + $0x1f8] sm:$0xff] }
0x1b2a   :  { %1472 = vrot.lane.b32.xlu0 %v6477_v37, %s5779_s21 }
0x1b9c   :  { %v1473_v43 = vpop.permute.xlu0 %1472 }
0x1b9d   :  { %4794 = vmatmul.mubr.msk.f32.vlgmr.msra.gmra.mrb[12].mxu1 %vm38_vm1, %v1473_v43  ;;  %v1598_v43 = vld [vmem:[%s7874_s3 + $0xd8] sm:$0xff] }
0x1b9e   :  { %1770 = vmatprep.mubr.f32.mxu1 %v5776_v4  ;;  %5195 = vmatpush1.bf16.msra.mxu1 %v6528_v52 }
0x1b9f   :  { %5197 = vmatprep.subr.bf16.mxu1 %v6544_v47 }
0x1ba2   :  { %5199 = vmatpush1.bf16.msra.mxu1 %v6570_v9 }
0x1ba3   :  { %5201 = vmatprep.subr.bf16.mxu1 %v6583_v23 }
0x1c70   :  { %v1542_v1 = vpop.f32.mrb[12].mxu1 }
0x1c71   :  { %v1543_v17 = vadd.f32 %v4483_v31, %v1542_v1  ;;  %v4795_v35 = vpop.f32.mrb[13].mxu1  ;;  %v6607_v31 = vpack.c.bf16 %v1591_v14, %v1587_v28  ;;  %v6609_v1 = vpack.c.bf16 %v1593_v42, %v1589_v2  ;;  %v6706_v28 = vpack.c.bf16 %v1615_v3, %v1611_v40 }
0x1c72   :  { %v1599_v35 = vld [vmem:[%s7874_s3 + $0xe0] sm:$0xff]  ;;  %v6708_v14 = vpack.c.bf16 %v1617_v46, %v1613_v6  ;;  %v6778_v3 = vpack.c.bf16 %v1631_v53, %v1627_v20  ;;  %v1629_v6 = vld [vmem:[%s7874_s3 + $0x1d0] sm:$0xff] }
0x1c73   :  { %v1546_v39 = vadd.f32 %v1543_v17, %v6375_v44  ;;  %v1572_v44 = vld [vmem:[%s7874_s3 + $0x8] sm:$0xff]  ;;  %v1595_v17 = vld [vmem:[%s7874_s3 + $0xc0] sm:$0xff]  ;;  %5203 = vmatpush1.bf16.msra.mxu1 %v6609_v1  ;;  %v1633_v46 = vld [vmem:[%s7874_s3 + $0x1f0] sm:$0xff] }
0x1c75   :  { %5648 = vtanh.f32 %v1546_v39  ;;  %v1547_v16 = vmul.f32 0.5, %v1546_v39  ;;  %v6622_v39 = vpack.c.bf16 %v1600_v29, %v1596_v24  ;;  %v1620_v24 = vld [vmem:[%s7874_s3 + $0x188] sm:$0xff] }
0x1c76   :  { %v1624_v29 = vld [vmem:[%s7874_s3 + $0x1a8] sm:$0xff] }
0x1c77   :  { %5650 = vtanh.f32 %v1547_v16  ;;  %v1597_v16 = vld [vmem:[%s7874_s3 + $0xd0] sm:$0xff] }
0x1c7f   :  { %v5649_v51 = vpop.eup %5648 }
0x1c80   :  { %1554 = vrot.lane.b32.xlu1 %v5649_v51, %s5777_s0 }
0x1c81   :  { %v5651_v13 = vpop.eup %5650 }
0x1c82   :  { %v1549_v30 = vmul.f32 0.5, %v5651_v13  ;;  %v1601_v13 = vld [vmem:[%s7874_s3 + $0xf0] sm:$0xff] }
0x1c83   :  { %v6648_v34 = vpack.c.bf16 %v1601_v13, %v1597_v16  ;;  %v1623_v16 = vld [vmem:[%s7874_s3 + $0x1a0] sm:$0xff] }
0x1c84   :  { %1247 = vrot.lane.b32.xlu1 %v6405_v19, %s5779_s21  ;;  %v6490_v57 = vadd.f32 0.5, %v1549_v30  ;;  %v1576_v19 = vld [vmem:[%s7874_s3 + $0x28] sm:$0xff] }
0x1c85   :  { %v6503_v55 = vpack.c.bf16 %v1576_v19, %v1572_v44  ;;  %v1604_v30 = vld [vmem:[%s7874_s3 + $0x108] sm:$0xff]  ;;  %v1610_v44 = vld [vmem:[%s7874_s3 + $0x138] sm:$0xff]  ;;  %v6646_v19 = vpack.c.bf16 %v1599_v35, %v1595_v17  ;;  %v6727_v17 = vpack.c.bf16 %v1624_v29, %v1620_v24  ;;  %v1619_v35 = vld [vmem:[%s7874_s3 + $0x180] sm:$0xff] }
0x1c86   :  { %v1552_v2 = vmul.f32 %v6490_v57, %v6362_v41  ;;  %v1626_v41 = vld [vmem:[%s7874_s3 + $0x1b8] sm:$0xff] }
0x1c87   :  { %5161 = vmatprep.subr.bf16.mxu0 %v6503_v55 }
0x1c88   :  { %5163 = vmatpush1.bf16.msra.mxu0 %v6516_v8 }
0x1c89   :  { %5165 = vmatprep.subr.bf16.mxu0 %v6542_v7 }
0x1cf2   :  { %v1555_v27 = vpop.permute.xlu1 %1554 }
0x1cf3   :  { %v1557_v32 = vmul.f32 %v1555_v27, %v6490_v57  ;;  %v1608_v27 = vld [vmem:[%s7874_s3 + $0x128] sm:$0xff] }
0x1cf4   :  { %v6658_v38 = vpack.c.bf16 %v1608_v27, %v1604_v30  ;;  %v6740_v30 = vpack.c.bf16 %v1623_v16, %v1619_v35  ;;  %v1621_v27 = vld [vmem:[%s7874_s3 + $0x190] sm:$0xff] }
0x1cf5   :  { %1559 = vrot.lane.b32.xlu0 %v1557_v32, %s5779_s21  ;;  %v1606_v32 = vld [vmem:[%s7874_s3 + $0x118] sm:$0xff] }
0x1cf6   :  { %v1248_v48 = vpop.permute.xlu1 %1247  ;;  %v6660_v49 = vpack.c.bf16 %v1610_v44, %v1606_v32  ;;  %v1625_v32 = vld [vmem:[%s7874_s3 + $0x1b0] sm:$0xff] }
0x1cf7   :  { %1251 = vst.msk [vmem:[#allocation2 - $0x2] sm:$0x4] %vm1250_vm7, %v1248_v48  ;;  %v1603_v48 = vld [vmem:[%s7874_s3 + $0x100] sm:$0xff]  ;;  %v6750_v44 = vpack.c.bf16 %v1625_v32, %v1621_v27 }
0x1cf9   :  { %1356 = vrot.lane.b32.xlu0 %v6441_v12, %s5777_s0  ;;  %v6557_v12 = vpack.c.bf16 %v1583_v59, %v1579_v56  ;;  %v6682_v56 = vpack.c.bf16 %v1607_v33, %v1603_v48  ;;  %v6684_v59 = vpack.c.bf16 %v1609_v26, %v1605_v18  ;;  %v1628_v33 = vld [vmem:[%s7874_s3 + $0x1c8] sm:$0xff]  ;;  %v1630_v26 = vld [vmem:[%s7874_s3 + $0x1d8] sm:$0xff] }
0x1cfa   :  { %v1632_v18 = vld [vmem:[%s7874_s3 + $0x1e8] sm:$0xff]  ;;  %v6776_v40 = vpack.c.bf16 %v1634_v5, %v1630_v26  ;;  %v1787_v26 = vrot.slane %v6381_v61, 7  ;;  %v4485_v61 = vld [vmem:[%s7872_s4 + $0x1] sm:$0x1] }
0x1cfb   :  { %5167 = vmatpush1.bf16.msra.mxu0 %v6557_v12  ;;  %v6765_v15 = vpack.c.bf16 %v1632_v18, %v1628_v33 }
0x1cfc   :  { %5169 = vmatprep.subr.bf16.mxu0 %v6572_v25 }
0x1cfd   :  { %1463 = vrot.lane.b32.xlu0 %v6477_v37, %s5778_s20  ;;  %v1602_v37 = vld [vmem:[%s7874_s3 + $0xf8] sm:$0xff] }
0x1cfe   :  { %v6624_v51 = vpack.c.bf16 %v1602_v37, %v1598_v43  ;;  %v1622_v43 = vld [vmem:[%s7874_s3 + $0x198] sm:$0xff] }
0x1cff   :  { %5171 = vmatpush1.bf16.msra.mxu0 %v6607_v31  ;;  %v6738_v13 = vpack.c.bf16 %v1626_v41, %v1622_v43 }
0x1d00   :  { %5173 = vmatprep.subr.bf16.mxu0 %v6622_v39  ;;  %5205 = vmatprep.subr.bf16.mxu1 %v6624_v51 }
0x1d01   :  { %5207 = vmatpush1.bf16.msra.mxu1 %v6648_v34 }
0x1d02   :  { %5209 = vmatprep.subr.bf16.mxu1 %v6660_v49 }
0x1d03   :  { %5175 = vmatpush1.bf16.msra.mxu0 %v6646_v19 }
0x1d04   :  { %5177 = vmatprep.subr.bf16.mxu0 %v6658_v38 }
0x1d05   :  { %5211 = vmatpush1.bf16.msra.mxu1 %v6684_v59 }
0x1d06   :  { %5213 = vmatprep.subr.bf16.mxu1 %v6693_v62 }
0x1d07   :  { %5179 = vmatpush1.bf16.msra.mxu0 %v6682_v56 }
0x1d08   :  { %5181 = vmatprep.subr.bf16.mxu0 %v6691_v60 }
0x1d09   :  { %5215 = vmatpush1.bf16.msra.mxu1 %v6708_v14 }
0x1d0a   :  { %5217 = vmatprep.subr.bf16.mxu1 %v6738_v13 }
0x1d0b   :  { %5183 = vmatpush1.bf16.msra.mxu0 %v6706_v28 }
0x1d0c   :  { %5185 = vmatprep.subr.bf16.mxu0 %v6727_v17 }
0x1d0d   :  { %5219 = vmatpush1.bf16.msra.mxu1 %v6750_v44 }
0x1d0e   :  { %5221 = vmatprep.subr.bf16.mxu1 %v6776_v40 }
0x1d0f   :  { %5187 = vmatpush1.bf16.msra.mxu0 %v6740_v30 }
0x1d10   :  { %5189 = vmatprep.subr.bf16.mxu0 %v6765_v15 }
0x1d13   :  { %5191 = vmatpush1.bf16.msra.mxu0 %v6778_v3 }
0x1d14   :  { %5224 = vmatprep.subr.bf16.mxu0 %v5774_v0 }
0x1d67   :  { %v1560_v42 = vpop.permute.xlu0 %1559 }
0x1d68   :  { %v6725_v37 = vadd.f32 %v1560_v42, %v1552_v2  ;;  %v6787_v2 = vpack.c.bf16 %v1633_v46, %v1629_v6 }
0x1d6a   :  { %5652 = vtanh.f32 %v6725_v37  ;;  %5223 = vmatpush1.bf16.msra.mxu1 %v6787_v2 }
0x1d6b   :  { %v1357_v48 = vpop.permute.xlu0 %1356  ;;  %5230 = vmatprep.subr.bf16.mxu1 %v5774_v0 }
0x1d6c   :  { %1359 = vst.msk [vmem:[#allocation2] sm:$0x1] %vm232_vm3, %v1357_v48 }
0x1d6f   :  { %v1464_v42 = vpop.permute.xlu0 %1463 }
0x1d70   :  { %1466 = vst.msk [vmem:[#allocation2] sm:$0x1] %vm335_vm4, %v1464_v42 }
0x1d74   :  { %v5653_v24 = vpop.eup %5652 }
0x1d75   :  { %1565 = vrot.lane.b32.xlu1 %v5653_v24, %s5777_s0 }
0x1de7   :  { %v1566_v29 = vpop.permute.xlu1 %1565 }
0x1de8   :  { %v1568_v43 = vmul.f32 %v1566_v29, %v6490_v57 }
0x1dea   :  { %1569 = vst.msk [vmem:[#allocation2] sm:$0x1] %vm434_vm5, %v1568_v43 }
0x1df1   :  { %v1570_v41 = vld [vmem:[#allocation2] sm:$0x1] }
0x1df2   :  { %1700 = vmatmul.mubr.f32.vlgmr.msra.gmra.mrb[14].mxu0 %v1570_v41  ;;  %1771 = vmatmul.mubr.f32.vlgmr.msra.gmra.mrb[14].mxu1 %v1570_v41 }
0x1df3   :  { %5226 = vmatpush3.bf16.msra.mxu0 %v6393_v50  ;;  %4804 = vmatprep.mubr.msk.f32.mxu0 %vm5775_vm0, %v5776_v4 }
0x1df4   :  { %5227 = vmatprep.subr.bf16.mxu0 %v5774_v0  ;;  %5232 = vmatpush3.bf16.msra.mxu1 %v6430_v36 }
0x1df5   :  { %5233 = vmatprep.subr.bf16.mxu1 %v5774_v0  ;;  %4815 = vmatprep.mubr.msk.f32.mxu1 %vm5775_vm0, %v5776_v4 }
0x1df7   :  { %5229 = vmatpush3.bf16.msra.mxu0 %v6399_v58 }
0x1df8   :  { %5235 = vmatpush3.bf16.msra.mxu1 %v6436_v45  ;;  %5236 = vmatprep.subr.bf16.mxu0 %v5774_v0 }
0x1df9   :  { %5243 = vmatprep.subr.bf16.mxu1 %v6503_v55 }
0x1ec5   :  { %v1701_v50 = vpop.f32.mrb[14].mxu0  ;;  %v6810_v57 = vpop.f32.mrb[14].mxu1 }
0x1ec6   :  { %v1778_v35 = vrot.slane %v1701_v50, 5  ;;  %v1703_v16 = vpop.f32.mrb[15].mxu0  ;;  %v6812_v27 = vpop.f32.mrb[15].mxu1 }
0x1ec8   :  { %v1780_v36 = vadd.f32 %v1778_v35, %v5849_v11 }
0x1eca   :  { %5654 = vtanh.f32 %v1780_v36  ;;  %v1781_v58 = vmul.f32 0.5, %v1780_v36 }
0x1ecc   :  { %5656 = vtanh.f32 %v1781_v58 }
0x1ed4   :  { %v5655_v32 = vpop.eup %5654 }
0x1ed5   :  { %1791 = vrot.lane.b32.xlu1 %v5655_v32, %s5777_s0 }
0x1ed6   :  { %v5657_v45 = vpop.eup %5656 }
0x1ed7   :  { %v1783_v48 = vmul.f32 0.5, %v5657_v45 }
0x1ed9   :  { %v1784_v33 = vadd.f32 0.5, %v1783_v48 }
0x1edb   :  { %v1789_v5 = vmul.f32 %v1787_v26, %v1784_v33 }
0x1f47   :  { %v1792_v18 = vpop.permute.xlu1 %1791 }
0x1f48   :  { %v1794_v55 = vmul.f32 %v1792_v18, %v1784_v33 }
0x1f4a   :  { %1796 = vrot.lane.b32.xlu0 %v1794_v55, %s5779_s21 }
0x1fbc   :  { %v1797_v20 = vpop.permute.xlu0 %1796 }
0x1fbd   :  { %v6818_v53 = vadd.f32 %v1797_v20, %v1789_v5 }
0x1fbf   :  { %5658 = vtanh.f32 %v6818_v53 }
0x1fc9   :  { %v5659_v6 = vpop.eup %5658 }
0x1fca   :  { %1802 = vrot.lane.b32.xlu1 %v5659_v6, %s5777_s0 }
0x203c   :  { %v1803_v46 = vpop.permute.xlu1 %1802 }
0x203d   :  { %v6822_v42 = vmul.f32 %v1803_v46, %v1784_v33 }
0x203f   :  { %v1817_v24 = vrot.slane %v6822_v42, 3 }
0x2041   :  { %1818 = vrot.lane.b32.xlu0 %v1817_v24, %s5779_s21 }
0x20b3   :  { %v1819_v29 = vpop.permute.xlu0 %1818 }
0x20b4   :  { %4805 = vmatmul.mubr.msk.f32.vlgmr.msra.gmra.mrb[16].mxu0 %vm38_vm1, %v1819_v29 }
0x20b5   :  { %5238 = vmatpush3.bf16.msra.mxu0 %v6466_v22  ;;  %4826 = vmatprep.mubr.msk.f32.mxu0 %vm5775_vm0, %v5776_v4 }
0x20b6   :  { %5239 = vmatprep.subr.bf16.mxu0 %v5774_v0 }
0x20b9   :  { %5241 = vmatpush3.bf16.msra.mxu0 %v6472_v21 }
0x20ba   :  { %5275 = vmatprep.subr.bf16.mxu0 %v6514_v54 }
0x2187   :  { %v1888_v43 = vpop.f32.mrb[16].mxu0 }
0x2188   :  { %v1889_v41 = vadd.f32 %v4485_v61, %v1888_v43  ;;  %v4806_v50 = vpop.f32.mrb[17].mxu0 }
0x218a   :  { %v1892_v35 = vadd.f32 %v1889_v41, %v1703_v16 }
0x218c   :  { %5660 = vtanh.f32 %v1892_v35  ;;  %v1893_v22 = vmul.f32 0.5, %v1892_v35 }
0x218e   :  { %5662 = vtanh.f32 %v1893_v22 }
0x2196   :  { %v5661_v36 = vpop.eup %5660 }
0x2197   :  { %1900 = vrot.lane.b32.xlu1 %v5661_v36, %s5777_s0 }
0x2198   :  { %v5663_v32 = vpop.eup %5662 }
0x2199   :  { %v1895_v58 = vmul.f32 0.5, %v5663_v32 }
0x219b   :  { %v1896_v45 = vadd.f32 0.5, %v1895_v58 }
0x219d   :  { %v1898_v54 = vmul.f32 %v1896_v45, %v6418_v63  ;;  %v4491_v63 = vld [vmem:[%s7872_s4 + $0x2] sm:$0x1] }
0x2209   :  { %v1901_v21 = vpop.permute.xlu1 %1900 }
0x220a   :  { %v1903_v48 = vmul.f32 %v1901_v21, %v1896_v45 }
0x220c   :  { %1905 = vrot.lane.b32.xlu0 %v1903_v48, %s5779_s21 }
0x227e   :  { %v1906_v33 = vpop.permute.xlu0 %1905 }
0x227f   :  { %v6839_v18 = vadd.f32 %v1906_v33, %v1898_v54  ;;  %v2347_v33 = vrot.slane %v6818_v53, 7  ;;  %v2375_v53 = vld [vmem:[%s7873_s2 + $0x18] sm:$0xff] }
0x2281   :  { %5664 = vtanh.f32 %v6839_v18 }
0x228b   :  { %v5665_v16 = vpop.eup %5664 }
0x228c   :  { %1911 = vrot.lane.b32.xlu1 %v5665_v16, %s5777_s0 }
0x22fe   :  { %v1912_v55 = vpop.permute.xlu1 %1911 }
0x22ff   :  { %v6843_v26 = vmul.f32 %v1912_v55, %v1896_v45 }
0x2301   :  { %1925 = vrot.lane.b32.xlu0 %v6843_v26, %s5779_s21 }
0x2373   :  { %v1926_v5 = vpop.permute.xlu0 %1925 }
0x2374   :  { %4816 = vmatmul.mubr.msk.f32.vlgmr.msra.gmra.mrb[16].mxu1 %vm38_vm1, %v1926_v5  ;;  %v2372_v5 = vld [vmem:[%s7873_s2] sm:$0xff] }
0x2375   :  { %5245 = vmatpush1.bf16.msra.mxu1 %v6516_v8  ;;  %2259 = vmatprep.mubr.f32.mxu1 %v5776_v4 }
0x2376   :  { %5247 = vmatprep.subr.bf16.mxu1 %v6542_v7 }
0x2379   :  { %5249 = vmatpush1.bf16.msra.mxu1 %v6557_v12 }
0x237a   :  { %5251 = vmatprep.subr.bf16.mxu1 %v6572_v25 }
0x237d   :  { %5253 = vmatpush1.bf16.msra.mxu1 %v6607_v31 }
0x237e   :  { %5255 = vmatprep.subr.bf16.mxu1 %v6622_v39 }
0x2381   :  { %5257 = vmatpush1.bf16.msra.mxu1 %v6646_v19 }
0x2382   :  { %5259 = vmatprep.subr.bf16.mxu1 %v6658_v38 }
0x2385   :  { %5261 = vmatpush1.bf16.msra.mxu1 %v6682_v56 }
0x2386   :  { %5263 = vmatprep.subr.bf16.mxu1 %v6691_v60 }
0x2389   :  { %5265 = vmatpush1.bf16.msra.mxu1 %v6706_v28 }
0x238a   :  { %5267 = vmatprep.subr.bf16.mxu1 %v6727_v17 }
0x238d   :  { %5269 = vmatpush1.bf16.msra.mxu1 %v6740_v30 }
0x238e   :  { %5271 = vmatprep.subr.bf16.mxu1 %v6765_v15 }
0x2391   :  { %5273 = vmatpush1.bf16.msra.mxu1 %v6778_v3 }
0x2392   :  { %5306 = vmatprep.subr.bf16.mxu1 %v5774_v0 }
0x2447   :  { %v1995_v8 = vpop.f32.mrb[16].mxu1 }
0x2448   :  { %v1996_v7 = vadd.f32 %v4491_v63, %v1995_v8  ;;  %v4817_v12 = vpop.f32.mrb[17].mxu1  ;;  %v2373_v63 = vld [vmem:[%s7873_s2 + $0x8] sm:$0xff]  ;;  %v2374_v8 = vld [vmem:[%s7873_s2 + $0x10] sm:$0xff] }
0x2449   :  { %v6944_v12 = vpack.c.bf16 %v2375_v53, %v2374_v8  ;;  %v4511_v53 = vld [vmem:[%s7872_s4 + $0x3] sm:$0x1] }
0x244a   :  { %v1999_v25 = vadd.f32 %v1996_v7, %v6810_v57  ;;  %v6938_v7 = vpack.c.bf16 %v2373_v63, %v2372_v5 }
0x244c   :  { %5666 = vtanh.f32 %v1999_v25  ;;  %v2000_v39 = vmul.f32 0.5, %v1999_v25 }
0x244e   :  { %5668 = vtanh.f32 %v2000_v39 }
0x2456   :  { %v5667_v31 = vpop.eup %5666 }
0x2457   :  { %2007 = vrot.lane.b32.xlu1 %v5667_v31, %s5777_s0 }
0x2458   :  { %v5669_v19 = vpop.eup %5668 }
0x2459   :  { %v2002_v38 = vmul.f32 0.5, %v5669_v19 }
0x245b   :  { %v2003_v56 = vadd.f32 0.5, %v2002_v38 }
0x245d   :  { %v2005_v17 = vmul.f32 %v2003_v56, %v6454_v10  ;;  %v4497_v10 = vld [vmem:[%s7872_s4 + $0x3] sm:$0x1] }
0x24c9   :  { %v2008_v60 = vpop.permute.xlu1 %2007 }
0x24ca   :  { %v2010_v28 = vmul.f32 %v2008_v60, %v2003_v56 }
0x24cc   :  { %2012 = vrot.lane.b32.xlu0 %v2010_v28, %s5779_s21 }
0x253e   :  { %v2013_v30 = vpop.permute.xlu0 %2012 }
0x253f   :  { %v6872_v15 = vadd.f32 %v2013_v30, %v2005_v17 }
0x2541   :  { %5670 = vtanh.f32 %v6872_v15 }
0x254b   :  { %v5671_v3 = vpop.eup %5670 }
0x254c   :  { %2018 = vrot.lane.b32.xlu1 %v5671_v3, %s5777_s0 }
0x25be   :  { %v2019_v57 = vpop.permute.xlu1 %2018 }
0x25bf   :  { %v2021_v20 = vmul.f32 %v2019_v57, %v2003_v56  ;;  %v4499_v56 = vld [vmem:[%s7872_s4 + $0x1] sm:$0x1] }
0x25c1   :  { %2032 = vrot.lane.b32.xlu0 %v2021_v20, %s5779_s21 }
0x2633   :  { %v2033_v6 = vpop.permute.xlu0 %2032 }
0x2634   :  { %4827 = vmatmul.mubr.msk.f32.vlgmr.msra.gmra.mrb[18].mxu0 %vm38_vm1, %v2033_v6 }
0x2635   :  { %5277 = vmatpush1.bf16.msra.mxu0 %v6528_v52  ;;  %2330 = vmatprep.mubr.f32.mxu0 %v5776_v4 }
0x2636   :  { %5279 = vmatprep.subr.bf16.mxu0 %v6544_v47 }
0x2639   :  { %5281 = vmatpush1.bf16.msra.mxu0 %v6570_v9 }
0x263a   :  { %5283 = vmatprep.subr.bf16.mxu0 %v6583_v23 }
0x263d   :  { %5285 = vmatpush1.bf16.msra.mxu0 %v6609_v1 }
0x263e   :  { %5287 = vmatprep.subr.bf16.mxu0 %v6624_v51 }
0x2641   :  { %5289 = vmatpush1.bf16.msra.mxu0 %v6648_v34 }
0x2642   :  { %5291 = vmatprep.subr.bf16.mxu0 %v6660_v49 }
0x2645   :  { %5293 = vmatpush1.bf16.msra.mxu0 %v6684_v59 }
0x2646   :  { %5295 = vmatprep.subr.bf16.mxu0 %v6693_v62 }
0x2649   :  { %5297 = vmatpush1.bf16.msra.mxu0 %v6708_v14 }
0x264a   :  { %5299 = vmatprep.subr.bf16.mxu0 %v6738_v13 }
0x264d   :  { %5301 = vmatpush1.bf16.msra.mxu0 %v6750_v44 }
0x264e   :  { %5303 = vmatprep.subr.bf16.mxu0 %v6776_v40 }
0x2651   :  { %5305 = vmatpush1.bf16.msra.mxu0 %v6787_v2 }
0x2652   :  { %5312 = vmatprep.subr.bf16.mxu0 %v5774_v0 }
0x2707   :  { %v2102_v52 = vpop.f32.mrb[18].mxu0 }
0x2708   :  { %v2103_v47 = vadd.f32 %v4497_v10, %v2102_v52  ;;  %v4828_v9 = vpop.f32.mrb[19].mxu0 }
0x270a   :  { %v2106_v23 = vadd.f32 %v2103_v47, %v6812_v27 }
0x270c   :  { %5672 = vtanh.f32 %v2106_v23  ;;  %v2107_v51 = vmul.f32 0.5, %v2106_v23 }
0x270e   :  { %5674 = vtanh.f32 %v2107_v51  ;;  %v4501_v51 = vld [vmem:[%s7873_s2 + $0x20] sm:$0xff] }
0x2716   :  { %v5673_v1 = vpop.eup %5672 }
0x2717   :  { %2114 = vrot.lane.b32.xlu1 %v5673_v1, %s5777_s0 }
0x2718   :  { %v5675_v34 = vpop.eup %5674 }
0x2719   :  { %v2109_v49 = vmul.f32 0.5, %v5675_v34  ;;  %v4502_v34 = vld [vmem:[%s7873_s2 + $0x28] sm:$0xff] }
0x271b   :  { %1807 = vrot.lane.b32.xlu1 %v6822_v42, %s5779_s21  ;;  %v2110_v59 = vadd.f32 0.5, %v2109_v49  ;;  %v4503_v49 = vld [vmem:[%s7873_s2 + $0x30] sm:$0xff] }
0x271d   :  { %v2112_v44 = vmul.f32 %v2110_v59, %v6725_v37 }
0x2789   :  { %v2115_v62 = vpop.permute.xlu1 %2114 }
0x278a   :  { %v2117_v14 = vmul.f32 %v2115_v62, %v2110_v59 }
0x278c   :  { %2119 = vrot.lane.b32.xlu0 %v2117_v14, %s5779_s21 }
0x278d   :  { %v1808_v13 = vpop.permute.xlu1 %1807 }
0x278e   :  { %1811 = vst.msk [vmem:[#allocation2 - $0x3] sm:$0x8] %vm1810_vm8, %v1808_v13 }
0x2790   :  { %1916 = vrot.lane.b32.xlu0 %v6843_v26, %s5777_s0 }
0x2794   :  { %2023 = vrot.lane.b32.xlu0 %v2021_v20, %s5778_s20 }
0x27fe   :  { %v2120_v40 = vpop.permute.xlu0 %2119 }
0x27ff   :  { %v6907_v2 = vadd.f32 %v2120_v40, %v2112_v44 }
0x2801   :  { %5676 = vtanh.f32 %v6907_v2 }
0x2802   :  { %v1917_v27 = vpop.permute.xlu0 %1916 }
0x2803   :  { %1919 = vst.msk [vmem:[#allocation2] sm:$0x1] %vm232_vm3, %v1917_v27  ;;  %v4505_v27 = vld [vmem:[%s7872_s4 + $0x2] sm:$0x1] }
0x2806   :  { %v2024_v46 = vpop.permute.xlu0 %2023 }
0x2807   :  { %2026 = vst.msk [vmem:[#allocation2] sm:$0x1] %vm335_vm4, %v2024_v46 }
0x280b   :  { %v5677_v42 = vpop.eup %5676 }
0x280c   :  { %2125 = vrot.lane.b32.xlu1 %v5677_v42, %s5777_s0 }
0x287e   :  { %v2126_v24 = vpop.permute.xlu1 %2125 }
0x287f   :  { %v2128_v29 = vmul.f32 %v2126_v24, %v2110_v59  ;;  %v6975_v59 = vpack.c.bf16 %v4502_v34, %v4501_v51  ;;  %v2693_v34 = vld [vmem:[%s7874_s3 + $0x10] sm:$0xff] }
0x2881   :  { %2129 = vst.msk [vmem:[#allocation2] sm:$0x1] %vm434_vm5, %v2128_v29 }
0x2888   :  { %v2130_v61 = vld [vmem:[#allocation2] sm:$0x1] }
0x2889   :  { %2260 = vmatmul.mubr.f32.vlgmr.msra.gmra.mrb[18].mxu1 %v2130_v61  ;;  %2331 = vmatmul.mubr.f32.vlgmr.msra.gmra.mrb[20].mxu0 %v2130_v61 }
0x288a   :  { %4837 = vmatprep.mubr.msk.f32.mxu1 %vm5775_vm0, %v5776_v4  ;;  %4848 = vmatprep.mubr.msk.f32.mxu0 %vm5775_vm0, %v5776_v4 }
0x288b   :  { %5308 = vmatpush3.bf16.msra.mxu1 %v6938_v7  ;;  %5314 = vmatpush3.bf16.msra.mxu0 %v6975_v59 }
0x288c   :  { %5309 = vmatprep.subr.bf16.mxu1 %v5774_v0  ;;  %5315 = vmatprep.subr.bf16.mxu0 %v5774_v0 }
0x288f   :  { %5311 = vmatpush3.bf16.msra.mxu1 %v6944_v12 }
0x2890   :  { %5318 = vmatprep.subr.bf16.mxu1 %v5774_v0 }
0x295c   :  { %v2261_v37 = vpop.f32.mrb[18].mxu1  ;;  %v6918_v43 = vpop.f32.mrb[20].mxu0 }
0x295d   :  { %v2338_v41 = vrot.slane %v2261_v37, 4  ;;  %v2263_v50 = vpop.f32.mrb[19].mxu1  ;;  %v6920_v35 = vpop.f32.mrb[21].mxu0 }
0x295f   :  { %v2340_v36 = vadd.f32 %v2338_v41, %v5849_v11 }
0x2961   :  { %5678 = vtanh.f32 %v2340_v36  ;;  %v2341_v32 = vmul.f32 0.5, %v2340_v36 }
0x2963   :  { %5680 = vtanh.f32 %v2341_v32 }
0x296b   :  { %v5679_v22 = vpop.eup %5678 }
0x296c   :  { %2351 = vrot.lane.b32.xlu1 %v5679_v22, %s5777_s0 }
0x296d   :  { %v5681_v58 = vpop.eup %5680 }
0x296e   :  { %v2343_v45 = vmul.f32 0.5, %v5681_v58 }
0x2970   :  { %v2344_v21 = vadd.f32 0.5, %v2343_v45 }
0x2972   :  { %v2349_v16 = vmul.f32 %v2347_v33, %v2344_v21 }
0x29de   :  { %v2352_v48 = vpop.permute.xlu1 %2351 }
0x29df   :  { %v2354_v54 = vmul.f32 %v2352_v48, %v2344_v21  ;;  %v4508_v48 = vld [vmem:[%s7873_s2 + $0x48] sm:$0xff] }
0x29e1   :  { %2356 = vrot.lane.b32.xlu0 %v2354_v54, %s5779_s21  ;;  %v4509_v54 = vld [vmem:[%s7873_s2 + $0x50] sm:$0xff] }
0x2a53   :  { %v2357_v55 = vpop.permute.xlu0 %2356 }
0x2a54   :  { %v6926_v26 = vadd.f32 %v2357_v55, %v2349_v16 }
0x2a56   :  { %5682 = vtanh.f32 %v6926_v26 }
0x2a60   :  { %v5683_v25 = vpop.eup %5682 }
0x2a61   :  { %2362 = vrot.lane.b32.xlu1 %v5683_v25, %s5777_s0 }
0x2ad3   :  { %v2363_v31 = vpop.permute.xlu1 %2362 }
0x2ad4   :  { %v6950_v39 = vmul.f32 %v2363_v31, %v2344_v21 }
0x2ad6   :  { %v2377_v19 = vrot.slane %v6950_v39, 4 }
0x2ad8   :  { %2378 = vrot.lane.b32.xlu0 %v2377_v19, %s5779_s21 }
0x2b4a   :  { %v2379_v38 = vpop.permute.xlu0 %2378 }
0x2b4b   :  { %4838 = vmatmul.mubr.msk.f32.vlgmr.msra.gmra.mrb[20].mxu1 %vm38_vm1, %v2379_v38 }
0x2b4c   :  { %4859 = vmatprep.mubr.msk.f32.mxu1 %vm5775_vm0, %v5776_v4 }
0x2c1e   :  { %v2448_v60 = vpop.f32.mrb[20].mxu1 }
0x2c1f   :  { %v2449_v28 = vadd.f32 %v4499_v56, %v2448_v60  ;;  %v4839_v17 = vpop.f32.mrb[21].mxu1 }
0x2c21   :  { %v2452_v30 = vadd.f32 %v2449_v28, %v2263_v50 }
0x2c23   :  { %5684 = vtanh.f32 %v2452_v30  ;;  %v2453_v57 = vmul.f32 0.5, %v2452_v30 }
0x2c25   :  { %5686 = vtanh.f32 %v2453_v57 }
0x2c2d   :  { %v5685_v3 = vpop.eup %5684 }
0x2c2e   :  { %2460 = vrot.lane.b32.xlu1 %v5685_v3, %s5777_s0 }
0x2c2f   :  { %v5687_v20 = vpop.eup %5686 }
0x2c30   :  { %v2455_v6 = vmul.f32 0.5, %v5687_v20  ;;  %v2694_v20 = vld [vmem:[%s7874_s3 + $0x18] sm:$0xff] }
0x2c32   :  { %v2456_v10 = vadd.f32 0.5, %v2455_v6 }
0x2c34   :  { %v2458_v9 = vmul.f32 %v2456_v10, %v6839_v18  ;;  %v4504_v18 = vld [vmem:[%s7873_s2 + $0x38] sm:$0xff] }
0x2c35   :  { %v6981_v62 = vpack.c.bf16 %v4504_v18, %v4503_v49  ;;  %v2697_v49 = vld [vmem:[%s7874_s3 + $0x30] sm:$0xff]  ;;  %v2700_v18 = vld [vmem:[%s7874_s3 + $0x48] sm:$0xff] }
0x2c37   :  { %5317 = vmatpush3.bf16.msra.mxu0 %v6981_v62 }
0x2ca0   :  { %v2461_v52 = vpop.permute.xlu1 %2460 }
0x2ca1   :  { %v2463_v47 = vmul.f32 %v2461_v52, %v2456_v10  ;;  %v2698_v52 = vld [vmem:[%s7874_s3 + $0x38] sm:$0xff] }
0x2ca3   :  { %2465 = vrot.lane.b32.xlu0 %v2463_v47, %s5779_s21  ;;  %v2691_v47 = vld [vmem:[%s7874_s3] sm:$0xff] }
0x2d15   :  { %v2466_v23 = vpop.permute.xlu0 %2465 }
0x2d16   :  { %v6963_v1 = vadd.f32 %v2466_v23, %v2458_v9  ;;  %v2695_v9 = vld [vmem:[%s7874_s3 + $0x20] sm:$0xff]  ;;  %v7059_v23 = vpack.c.bf16 %v2698_v52, %v2694_v20 }
0x2d17   :  { %v7061_v51 = vpack.c.bf16 %v2695_v9, %v2691_v47  ;;  %v2727_v52 = vld [vmem:[%s7874_s3 + $0x120] sm:$0xff] }
0x2d18   :  { %5688 = vtanh.f32 %v6963_v1 }
0x2d22   :  { %v5689_v14 = vpop.eup %5688 }
0x2d23   :  { %2471 = vrot.lane.b32.xlu1 %v5689_v14, %s5777_s0  ;;  %v7073_v14 = vpack.c.bf16 %v2697_v49, %v2693_v34  ;;  %v2725_v34 = vld [vmem:[%s7874_s3 + $0x110] sm:$0xff] }
0x2d24   :  { %v2729_v49 = vld [vmem:[%s7874_s3 + $0x130] sm:$0xff] }
0x2d95   :  { %v2472_v13 = vpop.permute.xlu1 %2471 }
0x2d96   :  { %v6986_v44 = vmul.f32 %v2472_v13, %v2456_v10  ;;  %v2704_v13 = vld [vmem:[%s7874_s3 + $0x68] sm:$0xff] }
0x2d98   :  { %2485 = vrot.lane.b32.xlu0 %v6986_v44, %s5779_s21 }
0x2e0a   :  { %v2486_v40 = vpop.permute.xlu0 %2485 }
0x2e0b   :  { %4849 = vmatmul.mubr.msk.f32.vlgmr.msra.gmra.mrb[22].mxu0 %vm38_vm1, %v2486_v40  ;;  %v2702_v40 = vld [vmem:[%s7874_s3 + $0x58] sm:$0xff] }
0x2e0c   :  { %2819 = vmatprep.mubr.f32.mxu0 %v5776_v4 }
0x2ede   :  { %v2555_v46 = vpop.f32.mrb[22].mxu0 }
0x2edf   :  { %v2556_v42 = vadd.f32 %v4505_v27, %v2555_v46  ;;  %v4850_v24 = vpop.f32.mrb[23].mxu0  ;;  %v2706_v27 = vld [vmem:[%s7874_s3 + $0x78] sm:$0xff]  ;;  %v7087_v46 = vpack.c.bf16 %v2704_v13, %v2700_v18  ;;  %v2732_v18 = vld [vmem:[%s7874_s3 + $0x148] sm:$0xff] }
0x2ee0   :  { %v2699_v24 = vld [vmem:[%s7874_s3 + $0x40] sm:$0xff]  ;;  %v2736_v13 = vld [vmem:[%s7874_s3 + $0x168] sm:$0xff] }
0x2ee1   :  { %v2559_v29 = vadd.f32 %v2556_v42, %v6918_v43  ;;  %v4507_v43 = vld [vmem:[%s7873_s2 + $0x40] sm:$0xff]  ;;  %v7089_v42 = vpack.c.bf16 %v2706_v27, %v2702_v40  ;;  %v2734_v40 = vld [vmem:[%s7874_s3 + $0x158] sm:$0xff] }
0x2ee2   :  { %v7011_v33 = vpack.c.bf16 %v4508_v48, %v4507_v43  ;;  %v2711_v48 = vld [vmem:[%s7874_s3 + $0xa0] sm:$0xff]  ;;  %v2738_v27 = vld [vmem:[%s7874_s3 + $0x178] sm:$0xff] }
0x2ee3   :  { %5690 = vtanh.f32 %v2559_v29  ;;  %v2560_v37 = vmul.f32 0.5, %v2559_v29  ;;  %v2703_v29 = vld [vmem:[%s7874_s3 + $0x60] sm:$0xff] }
0x2ee4   :  { %5320 = vmatpush3.bf16.msra.mxu1 %v7011_v33 }
0x2ee5   :  { %5692 = vtanh.f32 %v2560_v37  ;;  %5321 = vmatprep.subr.bf16.mxu1 %v5774_v0  ;;  %v2705_v37 = vld [vmem:[%s7874_s3 + $0x70] sm:$0xff] }
0x2eed   :  { %v5691_v61 = vpop.eup %5690 }
0x2eee   :  { %2567 = vrot.lane.b32.xlu1 %v5691_v61, %s5777_s0  ;;  %v2701_v61 = vld [vmem:[%s7874_s3 + $0x50] sm:$0xff] }
0x2eef   :  { %v5693_v41 = vpop.eup %5692 }
0x2ef0   :  { %v2562_v50 = vmul.f32 0.5, %v5693_v41  ;;  %v2708_v41 = vld [vmem:[%s7874_s3 + $0x88] sm:$0xff] }
0x2ef2   :  { %v2563_v36 = vadd.f32 0.5, %v2562_v50  ;;  %v2712_v50 = vld [vmem:[%s7874_s3 + $0xa8] sm:$0xff] }
0x2ef4   :  { %v2565_v58 = vmul.f32 %v2563_v36, %v6872_v15  ;;  %v4510_v15 = vld [vmem:[%s7873_s2 + $0x58] sm:$0xff] }
0x2ef5   :  { %v7017_v16 = vpack.c.bf16 %v4510_v15, %v4509_v54  ;;  %v2709_v54 = vld [vmem:[%s7874_s3 + $0x90] sm:$0xff] }
0x2ef6   :  { %v2713_v15 = vld [vmem:[%s7874_s3 + $0xb0] sm:$0xff] }
0x2ef7   :  { %5323 = vmatpush3.bf16.msra.mxu1 %v7017_v16 }
0x2ef8   :  { %5357 = vmatprep.subr.bf16.mxu1 %v7059_v23 }
0x2f60   :  { %v2568_v22 = vpop.permute.xlu1 %2567 }
0x2f61   :  { %v2570_v32 = vmul.f32 %v2568_v22, %v2563_v36  ;;  %v7117_v22 = vpack.c.bf16 %v2712_v50, %v2708_v41  ;;  %v7238_v41 = vpack.c.bf16 %v2738_v27, %v2734_v40  ;;  %v2735_v50 = vld [vmem:[%s7874_s3 + $0x160] sm:$0xff] }
0x2f62   :  { %v2747_v40 = vld [vmem:[%s7874_s3 + $0x1c0] sm:$0xff] }
0x2f63   :  { %2572 = vrot.lane.b32.xlu0 %v2570_v32, %s5779_s21  ;;  %v2710_v32 = vld [vmem:[%s7874_s3 + $0x98] sm:$0xff]  ;;  %v2751_v27 = vld [vmem:[%s7874_s3 + $0x1e0] sm:$0xff] }
0x2fd5   :  { %v2573_v45 = vpop.permute.xlu0 %2572 }
0x2fd6   :  { %v6999_v21 = vadd.f32 %v2573_v45, %v2565_v58  ;;  %v2714_v58 = vld [vmem:[%s7874_s3 + $0xb8] sm:$0xff]  ;;  %v2707_v45 = vld [vmem:[%s7874_s3 + $0x80] sm:$0xff] }
0x2fd7   :  { %v7128_v43 = vpack.c.bf16 %v2714_v58, %v2710_v32  ;;  %v2733_v32 = vld [vmem:[%s7874_s3 + $0x150] sm:$0xff] }
0x2fd8   :  { %5694 = vtanh.f32 %v6999_v21  ;;  %v2737_v58 = vld [vmem:[%s7874_s3 + $0x170] sm:$0xff] }
0x2fe2   :  { %v5695_v55 = vpop.eup %5694 }
0x2fe3   :  { %2578 = vrot.lane.b32.xlu1 %v5695_v55, %s5777_s0  ;;  %v2716_v55 = vld [vmem:[%s7874_s3 + $0xc8] sm:$0xff] }
0x3055   :  { %v2579_v5 = vpop.permute.xlu1 %2578 }
0x3056   :  { %v7022_v63 = vmul.f32 %v2579_v5, %v2563_v36  ;;  %v7115_v36 = vpack.c.bf16 %v2705_v37, %v2701_v61  ;;  %v2720_v5 = vld [vmem:[%s7874_s3 + $0xe8] sm:$0xff]  ;;  %v2731_v61 = vld [vmem:[%s7874_s3 + $0x140] sm:$0xff]  ;;  %v7236_v37 = vpack.c.bf16 %v2736_v13, %v2732_v18  ;;  %v2754_v13 = vld [vmem:[%s7874_s3 + $0x1f8] sm:$0xff] }
0x3058   :  { %2592 = vrot.lane.b32.xlu0 %v7022_v63, %s5779_s21 }
0x30ca   :  { %v2593_v8 = vpop.permute.xlu0 %2592 }
0x30cb   :  { %4860 = vmatmul.mubr.msk.f32.vlgmr.msra.gmra.mrb[22].mxu1 %vm38_vm1, %v2593_v8  ;;  %v2718_v8 = vld [vmem:[%s7874_s3 + $0xd8] sm:$0xff] }
0x30cc   :  { %2890 = vmatprep.mubr.f32.mxu1 %v5776_v4  ;;  %5359 = vmatpush1.bf16.msra.mxu1 %v7073_v14 }
0x30cd   :  { %5361 = vmatprep.subr.bf16.mxu1 %v7089_v42 }
0x30d0   :  { %5363 = vmatpush1.bf16.msra.mxu1 %v7115_v36 }
0x30d1   :  { %5365 = vmatprep.subr.bf16.mxu1 %v7128_v43 }
0x319e   :  { %v2662_v25 = vpop.f32.mrb[22].mxu1 }
0x319f   :  { %v2663_v31 = vadd.f32 %v4511_v53, %v2662_v25  ;;  %v4861_v19 = vpop.f32.mrb[23].mxu1  ;;  %v7152_v53 = vpack.c.bf16 %v2711_v48, %v2707_v45  ;;  %v7154_v25 = vpack.c.bf16 %v2713_v15, %v2709_v54  ;;  %v7251_v45 = vpack.c.bf16 %v2735_v50, %v2731_v61 }
0x31a0   :  { %v2719_v19 = vld [vmem:[%s7874_s3 + $0xe0] sm:$0xff]  ;;  %v7253_v48 = vpack.c.bf16 %v2737_v58, %v2733_v32  ;;  %v7323_v50 = vpack.c.bf16 %v2751_v27, %v2747_v40  ;;  %v2749_v32 = vld [vmem:[%s7874_s3 + $0x1d0] sm:$0xff] }
0x31a1   :  { %v2666_v38 = vadd.f32 %v2663_v31, %v6920_v35  ;;  %v2692_v35 = vld [vmem:[%s7874_s3 + $0x8] sm:$0xff]  ;;  %v2715_v31 = vld [vmem:[%s7874_s3 + $0xc0] sm:$0xff]  ;;  %5367 = vmatpush1.bf16.msra.mxu1 %v7154_v25  ;;  %v2753_v58 = vld [vmem:[%s7874_s3 + $0x1f0] sm:$0xff] }
0x31a3   :  { %5696 = vtanh.f32 %v2666_v38  ;;  %v2667_v60 = vmul.f32 0.5, %v2666_v38  ;;  %v7167_v38 = vpack.c.bf16 %v2720_v5, %v2716_v55  ;;  %v2740_v55 = vld [vmem:[%s7874_s3 + $0x188] sm:$0xff] }
0x31a4   :  { %v2744_v5 = vld [vmem:[%s7874_s3 + $0x1a8] sm:$0xff] }
0x31a5   :  { %5698 = vtanh.f32 %v2667_v60  ;;  %v2717_v60 = vld [vmem:[%s7874_s3 + $0xd0] sm:$0xff] }
0x31ad   :  { %v5697_v56 = vpop.eup %5696 }
0x31ae   :  { %2674 = vrot.lane.b32.xlu1 %v5697_v56, %s5777_s0 }
0x31af   :  { %v5699_v28 = vpop.eup %5698 }
0x31b0   :  { %v2669_v17 = vmul.f32 0.5, %v5699_v28  ;;  %v2721_v28 = vld [vmem:[%s7874_s3 + $0xf0] sm:$0xff] }
0x31b1   :  { %v7193_v20 = vpack.c.bf16 %v2721_v28, %v2717_v60  ;;  %v2743_v60 = vld [vmem:[%s7874_s3 + $0x1a0] sm:$0xff] }
0x31b2   :  { %2367 = vrot.lane.b32.xlu1 %v6950_v39, %s5779_s21  ;;  %v7035_v30 = vadd.f32 0.5, %v2669_v17  ;;  %v2696_v39 = vld [vmem:[%s7874_s3 + $0x28] sm:$0xff] }
0x31b3   :  { %v7048_v10 = vpack.c.bf16 %v2696_v39, %v2692_v35  ;;  %v2724_v17 = vld [vmem:[%s7874_s3 + $0x108] sm:$0xff]  ;;  %v2730_v35 = vld [vmem:[%s7874_s3 + $0x138] sm:$0xff]  ;;  %v7191_v39 = vpack.c.bf16 %v2719_v19, %v2715_v31  ;;  %v7272_v31 = vpack.c.bf16 %v2744_v5, %v2740_v55  ;;  %v2739_v19 = vld [vmem:[%s7874_s3 + $0x180] sm:$0xff] }
0x31b4   :  { %v2672_v54 = vmul.f32 %v7035_v30, %v6907_v2  ;;  %v2746_v2 = vld [vmem:[%s7874_s3 + $0x1b8] sm:$0xff] }
0x31b5   :  { %5325 = vmatprep.subr.bf16.mxu0 %v7048_v10 }
0x31b6   :  { %5327 = vmatpush1.bf16.msra.mxu0 %v7061_v51 }
0x31b7   :  { %5329 = vmatprep.subr.bf16.mxu0 %v7087_v46 }
0x3220   :  { %v2675_v3 = vpop.permute.xlu1 %2674 }
0x3221   :  { %v2677_v57 = vmul.f32 %v2675_v3, %v7035_v30  ;;  %v2728_v3 = vld [vmem:[%s7874_s3 + $0x128] sm:$0xff] }
0x3222   :  { %v7203_v47 = vpack.c.bf16 %v2728_v3, %v2724_v17  ;;  %v7285_v17 = vpack.c.bf16 %v2743_v60, %v2739_v19  ;;  %v2741_v3 = vld [vmem:[%s7874_s3 + $0x190] sm:$0xff] }
0x3223   :  { %2679 = vrot.lane.b32.xlu0 %v2677_v57, %s5779_s21  ;;  %v2726_v57 = vld [vmem:[%s7874_s3 + $0x118] sm:$0xff] }
0x3224   :  { %v2368_v6 = vpop.permute.xlu1 %2367  ;;  %v7205_v9 = vpack.c.bf16 %v2730_v35, %v2726_v57  ;;  %v2745_v57 = vld [vmem:[%s7874_s3 + $0x1b0] sm:$0xff] }
0x3225   :  { %2371 = vst.msk [vmem:[#allocation2 - $0x4] sm:$0x10] %vm2370_vm9, %v2368_v6  ;;  %v2723_v6 = vld [vmem:[%s7874_s3 + $0x100] sm:$0xff]  ;;  %v7295_v35 = vpack.c.bf16 %v2745_v57, %v2741_v3 }
0x3227   :  { %2476 = vrot.lane.b32.xlu0 %v6986_v44, %s5777_s0  ;;  %v7102_v44 = vpack.c.bf16 %v2703_v29, %v2699_v24  ;;  %v7227_v24 = vpack.c.bf16 %v2727_v52, %v2723_v6  ;;  %v7229_v29 = vpack.c.bf16 %v2729_v49, %v2725_v34  ;;  %v2748_v6 = vld [vmem:[%s7874_s3 + $0x1c8] sm:$0xff]  ;;  %v2750_v34 = vld [vmem:[%s7874_s3 + $0x1d8] sm:$0xff] }
0x3228   :  { %v2752_v52 = vld [vmem:[%s7874_s3 + $0x1e8] sm:$0xff]  ;;  %v7321_v61 = vpack.c.bf16 %v2754_v13, %v2750_v34 }
0x3229   :  { %5331 = vmatpush1.bf16.msra.mxu0 %v7102_v44  ;;  %v7308_v18 = vpack.c.bf16 %v2752_v52, %v2748_v6 }
0x322a   :  { %5333 = vmatprep.subr.bf16.mxu0 %v7117_v22 }
0x322b   :  { %2583 = vrot.lane.b32.xlu0 %v7022_v63, %s5778_s20  ;;  %v2722_v63 = vld [vmem:[%s7874_s3 + $0xf8] sm:$0xff] }
0x322c   :  { %v7169_v56 = vpack.c.bf16 %v2722_v63, %v2718_v8  ;;  %v2742_v8 = vld [vmem:[%s7874_s3 + $0x198] sm:$0xff] }
0x322d   :  { %5335 = vmatpush1.bf16.msra.mxu0 %v7152_v53  ;;  %v7283_v28 = vpack.c.bf16 %v2746_v2, %v2742_v8 }
0x322e   :  { %5337 = vmatprep.subr.bf16.mxu0 %v7167_v38  ;;  %5369 = vmatprep.subr.bf16.mxu1 %v7169_v56 }
0x322f   :  { %5371 = vmatpush1.bf16.msra.mxu1 %v7193_v20 }
0x3230   :  { %5373 = vmatprep.subr.bf16.mxu1 %v7205_v9 }
0x3231   :  { %5339 = vmatpush1.bf16.msra.mxu0 %v7191_v39 }
0x3232   :  { %5341 = vmatprep.subr.bf16.mxu0 %v7203_v47 }
0x3233   :  { %5375 = vmatpush1.bf16.msra.mxu1 %v7229_v29 }
0x3234   :  { %5377 = vmatprep.subr.bf16.mxu1 %v7238_v41 }
0x3235   :  { %5343 = vmatpush1.bf16.msra.mxu0 %v7227_v24 }
0x3236   :  { %5345 = vmatprep.subr.bf16.mxu0 %v7236_v37 }
0x3237   :  { %5379 = vmatpush1.bf16.msra.mxu1 %v7253_v48 }
0x3238   :  { %5381 = vmatprep.subr.bf16.mxu1 %v7283_v28 }
0x3239   :  { %5347 = vmatpush1.bf16.msra.mxu0 %v7251_v45 }
0x323a   :  { %5349 = vmatprep.subr.bf16.mxu0 %v7272_v31 }
0x323b   :  { %5383 = vmatpush1.bf16.msra.mxu1 %v7295_v35 }
0x323c   :  { %5385 = vmatprep.subr.bf16.mxu1 %v7321_v61 }
0x323d   :  { %5351 = vmatpush1.bf16.msra.mxu0 %v7285_v17 }
0x323e   :  { %5353 = vmatprep.subr.bf16.mxu0 %v7308_v18 }
0x3241   :  { %5355 = vmatpush1.bf16.msra.mxu0 %v7323_v50 }
0x3242   :  { %5388 = vmatprep.subr.bf16.mxu0 %v5774_v0 }
0x3295   :  { %v2680_v15 = vpop.permute.xlu0 %2679 }
0x3296   :  { %v7270_v63 = vadd.f32 %v2680_v15, %v2672_v54  ;;  %v7332_v54 = vpack.c.bf16 %v2753_v58, %v2749_v32 }
0x3298   :  { %5700 = vtanh.f32 %v7270_v63  ;;  %5387 = vmatpush1.bf16.msra.mxu1 %v7332_v54 }
0x3299   :  { %v2477_v49 = vpop.permute.xlu0 %2476  ;;  %5394 = vmatprep.subr.bf16.mxu1 %v5774_v0 }
0x329a   :  { %2479 = vst.msk [vmem:[#allocation2] sm:$0x1] %vm232_vm3, %v2477_v49  ;;  %v2907_v49 = vrot.slane %v6926_v26, 7  ;;  %v4513_v26 = vld [vmem:[%s7872_s4 + $0x1] sm:$0x1] }
0x329d   :  { %v2584_v15 = vpop.permute.xlu0 %2583 }
0x329e   :  { %2586 = vst.msk [vmem:[#allocation2] sm:$0x1] %vm335_vm4, %v2584_v15 }
0x32a2   :  { %v5701_v55 = vpop.eup %5700 }
0x32a3   :  { %2685 = vrot.lane.b32.xlu1 %v5701_v55, %s5777_s0 }
0x3315   :  { %v2686_v5 = vpop.permute.xlu1 %2685 }
0x3316   :  { %v2688_v8 = vmul.f32 %v2686_v5, %v7035_v30 }
0x3318   :  { %2689 = vst.msk [vmem:[#allocation2] sm:$0x1] %vm434_vm5, %v2688_v8 }
0x331f   :  { %v2690_v2 = vld [vmem:[#allocation2] sm:$0x1] }
0x3320   :  { %2820 = vmatmul.mubr.f32.vlgmr.msra.gmra.mrb[24].mxu0 %v2690_v2  ;;  %2891 = vmatmul.mubr.f32.vlgmr.msra.gmra.mrb[24].mxu1 %v2690_v2 }
0x3321   :  { %5390 = vmatpush3.bf16.msra.mxu0 %v6938_v7  ;;  %4870 = vmatprep.mubr.msk.f32.mxu0 %vm5775_vm0, %v5776_v4 }
0x3322   :  { %5391 = vmatprep.subr.bf16.mxu0 %v5774_v0  ;;  %5396 = vmatpush3.bf16.msra.mxu1 %v6975_v59 }
0x3323   :  { %5397 = vmatprep.subr.bf16.mxu1 %v5774_v0  ;;  %4881 = vmatprep.mubr.msk.f32.mxu1 %vm5775_vm0, %v5776_v4 }
0x3325   :  { %5393 = vmatpush3.bf16.msra.mxu0 %v6944_v12 }
0x3326   :  { %5399 = vmatpush3.bf16.msra.mxu1 %v6981_v62  ;;  %5400 = vmatprep.subr.bf16.mxu0 %v5774_v0 }
0x3327   :  { %5407 = vmatprep.subr.bf16.mxu1 %v7048_v10 }
0x33f3   :  { %v2821_v7 = vpop.f32.mrb[24].mxu0  ;;  %v7355_v30 = vpop.f32.mrb[24].mxu1 }
0x33f4   :  { %v2898_v19 = vrot.slane %v2821_v7, 3  ;;  %v2823_v60 = vpop.f32.mrb[25].mxu0  ;;  %v7357_v3 = vpop.f32.mrb[25].mxu1 }
0x33f6   :  { %v2900_v59 = vadd.f32 %v2898_v19, %v5849_v11 }
0x33f8   :  { %5702 = vtanh.f32 %v2900_v59  ;;  %v2901_v12 = vmul.f32 0.5, %v2900_v59 }
0x33fa   :  { %5704 = vtanh.f32 %v2901_v12 }
0x3402   :  { %v5703_v57 = vpop.eup %5702 }
0x3403   :  { %2911 = vrot.lane.b32.xlu1 %v5703_v57, %s5777_s0 }
0x3404   :  { %v5705_v62 = vpop.eup %5704 }
0x3405   :  { %v2903_v6 = vmul.f32 0.5, %v5705_v62 }
0x3407   :  { %v2904_v52 = vadd.f32 0.5, %v2903_v6 }
0x3409   :  { %v2909_v13 = vmul.f32 %v2907_v49, %v2904_v52 }
0x3475   :  { %v2912_v34 = vpop.permute.xlu1 %2911 }
0x3476   :  { %v2914_v10 = vmul.f32 %v2912_v34, %v2904_v52 }
0x3478   :  { %2916 = vrot.lane.b32.xlu0 %v2914_v10, %s5779_s21 }
0x34ea   :  { %v2917_v40 = vpop.permute.xlu0 %2916 }
0x34eb   :  { %v7363_v27 = vadd.f32 %v2917_v40, %v2909_v13 }
0x34ed   :  { %5706 = vtanh.f32 %v7363_v27 }
0x34f7   :  { %v5707_v32 = vpop.eup %5706 }
0x34f8   :  { %2922 = vrot.lane.b32.xlu1 %v5707_v32, %s5777_s0 }
0x356a   :  { %v2923_v58 = vpop.permute.xlu1 %2922 }
0x356b   :  { %v7367_v15 = vmul.f32 %v2923_v58, %v2904_v52 }
0x356d   :  { %v2937_v55 = vrot.slane %v7367_v15, 5 }
0x356f   :  { %2938 = vrot.lane.b32.xlu0 %v2937_v55, %s5779_s21 }
0x35e1   :  { %v2939_v5 = vpop.permute.xlu0 %2938 }
0x35e2   :  { %4871 = vmatmul.mubr.msk.f32.vlgmr.msra.gmra.mrb[26].mxu0 %vm38_vm1, %v2939_v5 }
0x35e3   :  { %5402 = vmatpush3.bf16.msra.mxu0 %v7011_v33  ;;  %4892 = vmatprep.mubr.msk.f32.mxu0 %vm5775_vm0, %v5776_v4 }
0x35e4   :  { %5403 = vmatprep.subr.bf16.mxu0 %v5774_v0 }
0x35e7   :  { %5405 = vmatpush3.bf16.msra.mxu0 %v7017_v16 }
0x35e8   :  { %5439 = vmatprep.subr.bf16.mxu0 %v7059_v23 }
0x36b5   :  { %v3008_v8 = vpop.f32.mrb[26].mxu0 }
0x36b6   :  { %v3009_v2 = vadd.f32 %v4513_v26, %v3008_v8  ;;  %v4872_v7 = vpop.f32.mrb[27].mxu0 }
0x36b8   :  { %v3012_v19 = vadd.f32 %v3009_v2, %v2823_v60 }
0x36ba   :  { %5708 = vtanh.f32 %v3012_v19  ;;  %v3013_v33 = vmul.f32 0.5, %v3012_v19 }
0x36bc   :  { %5710 = vtanh.f32 %v3013_v33 }
0x36c4   :  { %v5709_v59 = vpop.eup %5708 }
0x36c5   :  { %3020 = vrot.lane.b32.xlu1 %v5709_v59, %s5777_s0 }
0x36c6   :  { %v5711_v57 = vpop.eup %5710 }
0x36c7   :  { %v3015_v12 = vmul.f32 0.5, %v5711_v57 }
0x36c9   :  { %v3016_v62 = vadd.f32 0.5, %v3015_v12 }
0x36cb   :  { %v3018_v23 = vmul.f32 %v3016_v62, %v6963_v1  ;;  %v4519_v1 = vld [vmem:[%s7872_s4 + $0x2] sm:$0x1] }
0x3737   :  { %v3021_v16 = vpop.permute.xlu1 %3020 }
0x3738   :  { %v3023_v6 = vmul.f32 %v3021_v16, %v3016_v62 }
0x373a   :  { %3025 = vrot.lane.b32.xlu0 %v3023_v6, %s5779_s21 }
0x37ac   :  { %v3026_v52 = vpop.permute.xlu0 %3025 }
0x37ad   :  { %v7384_v34 = vadd.f32 %v3026_v52, %v3018_v23  ;;  %v3467_v52 = vrot.slane %v7363_v27, 7  ;;  %v3495_v27 = vld [vmem:[%s7873_s2 + $0x18] sm:$0xff] }
0x37af   :  { %5712 = vtanh.f32 %v7384_v34 }
0x37b9   :  { %v5713_v60 = vpop.eup %5712 }
0x37ba   :  { %3031 = vrot.lane.b32.xlu1 %v5713_v60, %s5777_s0 }
0x382c   :  { %v3032_v10 = vpop.permute.xlu1 %3031 }
0x382d   :  { %v7388_v49 = vmul.f32 %v3032_v10, %v3016_v62 }
0x382f   :  { %3045 = vrot.lane.b32.xlu0 %v7388_v49, %s5779_s21 }
0x38a1   :  { %v3046_v13 = vpop.permute.xlu0 %3045 }
0x38a2   :  { %4882 = vmatmul.mubr.msk.f32.vlgmr.msra.gmra.mrb[26].mxu1 %vm38_vm1, %v3046_v13  ;;  %v3492_v13 = vld [vmem:[%s7873_s2] sm:$0xff] }
0x38a3   :  { %5409 = vmatpush1.bf16.msra.mxu1 %v7061_v51  ;;  %3379 = vmatprep.mubr.f32.mxu1 %v5776_v4 }
0x38a4   :  { %5411 = vmatprep.subr.bf16.mxu1 %v7087_v46 }
0x38a7   :  { %5413 = vmatpush1.bf16.msra.mxu1 %v7102_v44 }
0x38a8   :  { %5415 = vmatprep.subr.bf16.mxu1 %v7117_v22 }
0x38ab   :  { %5417 = vmatpush1.bf16.msra.mxu1 %v7152_v53 }
0x38ac   :  { %5419 = vmatprep.subr.bf16.mxu1 %v7167_v38 }
0x38af   :  { %5421 = vmatpush1.bf16.msra.mxu1 %v7191_v39 }
0x38b0   :  { %5423 = vmatprep.subr.bf16.mxu1 %v7203_v47 }
0x38b3   :  { %5425 = vmatpush1.bf16.msra.mxu1 %v7227_v24 }
0x38b4   :  { %5427 = vmatprep.subr.bf16.mxu1 %v7236_v37 }
0x38b7   :  { %5429 = vmatpush1.bf16.msra.mxu1 %v7251_v45 }
0x38b8   :  { %5431 = vmatprep.subr.bf16.mxu1 %v7272_v31 }
0x38bb   :  { %5433 = vmatpush1.bf16.msra.mxu1 %v7285_v17 }
0x38bc   :  { %5435 = vmatprep.subr.bf16.mxu1 %v7308_v18 }
0x38bf   :  { %5437 = vmatpush1.bf16.msra.mxu1 %v7323_v50 }
0x38c0   :  { %5470 = vmatprep.subr.bf16.mxu1 %v5774_v0 }
0x3975   :  { %v3115_v51 = vpop.f32.mrb[26].mxu1 }
0x3976   :  { %v3116_v46 = vadd.f32 %v4519_v1, %v3115_v51  ;;  %v4883_v44 = vpop.f32.mrb[27].mxu1  ;;  %v3493_v1 = vld [vmem:[%s7873_s2 + $0x8] sm:$0xff]  ;;  %v3494_v51 = vld [vmem:[%s7873_s2 + $0x10] sm:$0xff] }
0x3977   :  { %v7489_v44 = vpack.c.bf16 %v3495_v27, %v3494_v51  ;;  %v4539_v27 = vld [vmem:[%s7872_s4 + $0x3] sm:$0x1] }
0x3978   :  { %v3119_v22 = vadd.f32 %v3116_v46, %v7355_v30  ;;  %v7483_v46 = vpack.c.bf16 %v3493_v1, %v3492_v13 }
0x397a   :  { %5714 = vtanh.f32 %v3119_v22  ;;  %v3120_v38 = vmul.f32 0.5, %v3119_v22 }
0x397c   :  { %5716 = vtanh.f32 %v3120_v38 }
0x3984   :  { %v5715_v53 = vpop.eup %5714 }
0x3985   :  { %3127 = vrot.lane.b32.xlu1 %v5715_v53, %s5777_s0 }
0x3986   :  { %v5717_v39 = vpop.eup %5716 }
0x3987   :  { %v3122_v47 = vmul.f32 0.5, %v5717_v39 }
0x3989   :  { %v3123_v24 = vadd.f32 0.5, %v3122_v47 }
0x398b   :  { %v3125_v31 = vmul.f32 %v3123_v24, %v6999_v21  ;;  %v4525_v21 = vld [vmem:[%s7872_s4 + $0x3] sm:$0x1] }
0x39f7   :  { %v3128_v37 = vpop.permute.xlu1 %3127 }
0x39f8   :  { %v3130_v45 = vmul.f32 %v3128_v37, %v3123_v24 }
0x39fa   :  { %3132 = vrot.lane.b32.xlu0 %v3130_v45, %s5779_s21 }
0x3a6c   :  { %v3133_v17 = vpop.permute.xlu0 %3132 }
0x3a6d   :  { %v7417_v18 = vadd.f32 %v3133_v17, %v3125_v31 }
0x3a6f   :  { %5718 = vtanh.f32 %v7417_v18 }
0x3a79   :  { %v5719_v50 = vpop.eup %5718 }
0x3a7a   :  { %3138 = vrot.lane.b32.xlu1 %v5719_v50, %s5777_s0 }
0x3aec   :  { %v3139_v30 = vpop.permute.xlu1 %3138 }
0x3aed   :  { %v3141_v40 = vmul.f32 %v3139_v30, %v3123_v24  ;;  %v4527_v24 = vld [vmem:[%s7872_s4 + $0x1] sm:$0x1] }
0x3aef   :  { %3152 = vrot.lane.b32.xlu0 %v3141_v40, %s5779_s21 }
0x3b61   :  { %v3153_v32 = vpop.permute.xlu0 %3152 }
0x3b62   :  { %4893 = vmatmul.mubr.msk.f32.vlgmr.msra.gmra.mrb[28].mxu0 %vm38_vm1, %v3153_v32 }
0x3b63   :  { %5441 = vmatpush1.bf16.msra.mxu0 %v7073_v14  ;;  %3450 = vmatprep.mubr.f32.mxu0 %v5776_v4 }
0x3b64   :  { %5443 = vmatprep.subr.bf16.mxu0 %v7089_v42 }
0x3b67   :  { %5445 = vmatpush1.bf16.msra.mxu0 %v7115_v36 }
0x3b68   :  { %5447 = vmatprep.subr.bf16.mxu0 %v7128_v43 }
0x3b6b   :  { %5449 = vmatpush1.bf16.msra.mxu0 %v7154_v25 }
0x3b6c   :  { %5451 = vmatprep.subr.bf16.mxu0 %v7169_v56 }
0x3b6f   :  { %5453 = vmatpush1.bf16.msra.mxu0 %v7193_v20 }
0x3b70   :  { %5455 = vmatprep.subr.bf16.mxu0 %v7205_v9 }
0x3b73   :  { %5457 = vmatpush1.bf16.msra.mxu0 %v7229_v29 }
0x3b74   :  { %5459 = vmatprep.subr.bf16.mxu0 %v7238_v41 }
0x3b77   :  { %5461 = vmatpush1.bf16.msra.mxu0 %v7253_v48 }
0x3b78   :  { %5463 = vmatprep.subr.bf16.mxu0 %v7283_v28 }
0x3b7b   :  { %5465 = vmatpush1.bf16.msra.mxu0 %v7295_v35 }
0x3b7c   :  { %5467 = vmatprep.subr.bf16.mxu0 %v7321_v61 }
0x3b7f   :  { %5469 = vmatpush1.bf16.msra.mxu0 %v7332_v54 }
0x3b80   :  { %5476 = vmatprep.subr.bf16.mxu0 %v5774_v0 }
0x3c35   :  { %v3222_v14 = vpop.f32.mrb[28].mxu0 }
0x3c36   :  { %v3223_v42 = vadd.f32 %v4525_v21, %v3222_v14  ;;  %v4894_v36 = vpop.f32.mrb[29].mxu0 }
0x3c38   :  { %v3226_v43 = vadd.f32 %v3223_v42, %v7357_v3 }
0x3c3a   :  { %5720 = vtanh.f32 %v3226_v43  ;;  %v3227_v56 = vmul.f32 0.5, %v3226_v43 }
0x3c3c   :  { %5722 = vtanh.f32 %v3227_v56  ;;  %v4529_v56 = vld [vmem:[%s7873_s2 + $0x20] sm:$0xff] }
0x3c44   :  { %v5721_v25 = vpop.eup %5720 }
0x3c45   :  { %3234 = vrot.lane.b32.xlu1 %v5721_v25, %s5777_s0 }
0x3c46   :  { %v5723_v20 = vpop.eup %5722 }
0x3c47   :  { %v3229_v9 = vmul.f32 0.5, %v5723_v20  ;;  %v4530_v20 = vld [vmem:[%s7873_s2 + $0x28] sm:$0xff] }
0x3c49   :  { %2927 = vrot.lane.b32.xlu1 %v7367_v15, %s5779_s21  ;;  %v3230_v29 = vadd.f32 0.5, %v3229_v9  ;;  %v4531_v9 = vld [vmem:[%s7873_s2 + $0x30] sm:$0xff] }
0x3c4b   :  { %v3232_v35 = vmul.f32 %v3230_v29, %v7270_v63 }
0x3cb7   :  { %v3235_v41 = vpop.permute.xlu1 %3234 }
0x3cb8   :  { %v3237_v48 = vmul.f32 %v3235_v41, %v3230_v29 }
0x3cba   :  { %3239 = vrot.lane.b32.xlu0 %v3237_v48, %s5779_s21 }
0x3cbb   :  { %v2928_v28 = vpop.permute.xlu1 %2927 }
0x3cbc   :  { %2931 = vst.msk [vmem:[#allocation2 - $0x5] sm:$0x20] %vm2930_vm10, %v2928_v28 }
0x3cbe   :  { %3036 = vrot.lane.b32.xlu0 %v7388_v49, %s5777_s0 }
0x3cc2   :  { %3143 = vrot.lane.b32.xlu0 %v3141_v40, %s5778_s20 }
0x3d2c   :  { %v3240_v61 = vpop.permute.xlu0 %3239 }
0x3d2d   :  { %v7452_v54 = vadd.f32 %v3240_v61, %v3232_v35 }
0x3d2f   :  { %5724 = vtanh.f32 %v7452_v54 }
0x3d30   :  { %v3037_v3 = vpop.permute.xlu0 %3036 }
0x3d31   :  { %3039 = vst.msk [vmem:[#allocation2] sm:$0x1] %vm232_vm3, %v3037_v3  ;;  %v4533_v3 = vld [vmem:[%s7872_s4 + $0x2] sm:$0x1] }
0x3d34   :  { %v3144_v58 = vpop.permute.xlu0 %3143 }
0x3d35   :  { %3146 = vst.msk [vmem:[#allocation2] sm:$0x1] %vm335_vm4, %v3144_v58 }
0x3d39   :  { %v5725_v15 = vpop.eup %5724 }
0x3d3a   :  { %3245 = vrot.lane.b32.xlu1 %v5725_v15, %s5777_s0 }
0x3dac   :  { %v3246_v55 = vpop.permute.xlu1 %3245 }
0x3dad   :  { %v3248_v5 = vmul.f32 %v3246_v55, %v3230_v29  ;;  %v7520_v29 = vpack.c.bf16 %v4530_v20, %v4529_v56  ;;  %v3813_v20 = vld [vmem:[%s7874_s3 + $0x10] sm:$0xff] }
0x3daf   :  { %3249 = vst.msk [vmem:[#allocation2] sm:$0x1] %vm434_vm5, %v3248_v5 }
0x3db6   :  { %v3250_v26 = vld [vmem:[#allocation2] sm:$0x1] }
0x3db7   :  { %3380 = vmatmul.mubr.f32.vlgmr.msra.gmra.mrb[28].mxu1 %v3250_v26  ;;  %3451 = vmatmul.mubr.f32.vlgmr.msra.gmra.mrb[30].mxu0 %v3250_v26 }
0x3db8   :  { %4903 = vmatprep.mubr.msk.f32.mxu1 %vm5775_vm0, %v5776_v4  ;;  %4914 = vmatprep.mubr.msk.f32.mxu0 %vm5775_vm0, %v5776_v4 }
0x3db9   :  { %5472 = vmatpush3.bf16.msra.mxu1 %v7483_v46  ;;  %5478 = vmatpush3.bf16.msra.mxu0 %v7520_v29 }
0x3dba   :  { %5473 = vmatprep.subr.bf16.mxu1 %v5774_v0  ;;  %5479 = vmatprep.subr.bf16.mxu0 %v5774_v0 }
0x3dbd   :  { %5475 = vmatpush3.bf16.msra.mxu1 %v7489_v44 }
0x3dbe   :  { %5482 = vmatprep.subr.bf16.mxu1 %v5774_v0 }
0x3e8a   :  { %v3381_v63 = vpop.f32.mrb[28].mxu1  ;;  %v7463_v8 = vpop.f32.mrb[30].mxu0 }
0x3e8b   :  { %v3458_v2 = vrot.slane %v3381_v63, 2  ;;  %v3383_v7 = vpop.f32.mrb[29].mxu1  ;;  %v7465_v19 = vpop.f32.mrb[31].mxu0 }
0x3e8d   :  { %v3460_v59 = vadd.f32 %v3458_v2, %v5849_v11 }
0x3e8f   :  { %5726 = vtanh.f32 %v3460_v59  ;;  %v3461_v57 = vmul.f32 0.5, %v3460_v59 }
0x3e91   :  { %5728 = vtanh.f32 %v3461_v57 }
0x3e99   :  { %v5727_v33 = vpop.eup %5726 }
0x3e9a   :  { %3471 = vrot.lane.b32.xlu1 %v5727_v33, %s5777_s0 }
0x3e9b   :  { %v5729_v12 = vpop.eup %5728 }
0x3e9c   :  { %v3463_v62 = vmul.f32 0.5, %v5729_v12 }
0x3e9e   :  { %v3464_v16 = vadd.f32 0.5, %v3463_v62 }
0x3ea0   :  { %v3469_v60 = vmul.f32 %v3467_v52, %v3464_v16 }
0x3f0c   :  { %v3472_v6 = vpop.permute.xlu1 %3471 }
0x3f0d   :  { %v3474_v23 = vmul.f32 %v3472_v6, %v3464_v16  ;;  %v4536_v6 = vld [vmem:[%s7873_s2 + $0x48] sm:$0xff] }
0x3f0f   :  { %3476 = vrot.lane.b32.xlu0 %v3474_v23, %s5779_s21  ;;  %v4537_v23 = vld [vmem:[%s7873_s2 + $0x50] sm:$0xff] }
0x3f81   :  { %v3477_v10 = vpop.permute.xlu0 %3476 }
0x3f82   :  { %v7471_v49 = vadd.f32 %v3477_v10, %v3469_v60 }
0x3f84   :  { %5730 = vtanh.f32 %v7471_v49 }
0x3f8e   :  { %v5731_v22 = vpop.eup %5730 }
0x3f8f   :  { %3482 = vrot.lane.b32.xlu1 %v5731_v22, %s5777_s0 }
0x4001   :  { %v3483_v53 = vpop.permute.xlu1 %3482 }
0x4002   :  { %v7495_v38 = vmul.f32 %v3483_v53, %v3464_v16 }
0x4004   :  { %v3497_v39 = vrot.slane %v7495_v38, 6 }
0x4006   :  { %3498 = vrot.lane.b32.xlu0 %v3497_v39, %s5779_s21 }
0x4078   :  { %v3499_v47 = vpop.permute.xlu0 %3498 }
0x4079   :  { %4904 = vmatmul.mubr.msk.f32.vlgmr.msra.gmra.mrb[30].mxu1 %vm38_vm1, %v3499_v47 }
0x407a   :  { %4925 = vmatprep.mubr.msk.f32.mxu1 %vm5775_vm0, %v5776_v4 }
0x414c   :  { %v3568_v37 = vpop.f32.mrb[30].mxu1 }
0x414d   :  { %v3569_v45 = vadd.f32 %v4527_v24, %v3568_v37  ;;  %v4905_v31 = vpop.f32.mrb[31].mxu1 }
0x414f   :  { %v3572_v17 = vadd.f32 %v3569_v45, %v3383_v7 }
0x4151   :  { %5732 = vtanh.f32 %v3572_v17  ;;  %v3573_v30 = vmul.f32 0.5, %v3572_v17 }
0x4153   :  { %5734 = vtanh.f32 %v3573_v30 }
0x415b   :  { %v5733_v50 = vpop.eup %5732 }
0x415c   :  { %3580 = vrot.lane.b32.xlu1 %v5733_v50, %s5777_s0 }
0x415d   :  { %v5735_v40 = vpop.eup %5734 }
0x415e   :  { %v3575_v32 = vmul.f32 0.5, %v5735_v40  ;;  %v3814_v40 = vld [vmem:[%s7874_s3 + $0x18] sm:$0xff] }
0x4160   :  { %v3576_v21 = vadd.f32 0.5, %v3575_v32 }
0x4162   :  { %v3578_v36 = vmul.f32 %v3576_v21, %v7384_v34  ;;  %v4532_v34 = vld [vmem:[%s7873_s2 + $0x38] sm:$0xff] }
0x4163   :  { %v7526_v41 = vpack.c.bf16 %v4532_v34, %v4531_v9  ;;  %v3817_v9 = vld [vmem:[%s7874_s3 + $0x30] sm:$0xff]  ;;  %v3820_v34 = vld [vmem:[%s7874_s3 + $0x48] sm:$0xff] }
0x4165   :  { %5481 = vmatpush3.bf16.msra.mxu0 %v7526_v41 }
0x41ce   :  { %v3581_v14 = vpop.permute.xlu1 %3580 }
0x41cf   :  { %v3583_v42 = vmul.f32 %v3581_v14, %v3576_v21  ;;  %v3818_v14 = vld [vmem:[%s7874_s3 + $0x38] sm:$0xff] }
0x41d1   :  { %3585 = vrot.lane.b32.xlu0 %v3583_v42, %s5779_s21  ;;  %v3811_v42 = vld [vmem:[%s7874_s3] sm:$0xff] }
0x4243   :  { %v3586_v43 = vpop.permute.xlu0 %3585 }
0x4244   :  { %v7508_v25 = vadd.f32 %v3586_v43, %v3578_v36  ;;  %v3815_v36 = vld [vmem:[%s7874_s3 + $0x20] sm:$0xff]  ;;  %v5520_v43 = vpack.c.bf16 %v3818_v14, %v3814_v40 }
0x4245   :  { %v5490_v56 = vpack.c.bf16 %v3815_v36, %v3811_v42  ;;  %v3845_v36 = vld [vmem:[%s7874_s3 + $0x110] sm:$0xff] }
0x4246   :  { %5736 = vtanh.f32 %v7508_v25 }
0x4250   :  { %v5737_v48 = vpop.eup %5736 }
0x4251   :  { %3591 = vrot.lane.b32.xlu1 %v5737_v48, %s5777_s0  ;;  %v5522_v48 = vpack.c.bf16 %v3817_v9, %v3813_v20  ;;  %v3856_v20 = vld [vmem:[%s7874_s3 + $0x168] sm:$0xff]  ;;  %v3854_v9 = vld [vmem:[%s7874_s3 + $0x158] sm:$0xff] }
0x42c3   :  { %v3592_v28 = vpop.permute.xlu1 %3591 }
0x42c4   :  { %v7531_v35 = vmul.f32 %v3592_v28, %v3576_v21  ;;  %v3824_v28 = vld [vmem:[%s7874_s3 + $0x68] sm:$0xff] }
0x42c6   :  { %3605 = vrot.lane.b32.xlu0 %v7531_v35, %s5779_s21 }
0x4338   :  { %v3606_v61 = vpop.permute.xlu0 %3605 }
0x4339   :  { %4915 = vmatmul.mubr.msk.f32.vlgmr.msra.gmra.mrb[32].mxu0 %vm38_vm1, %v3606_v61  ;;  %v3822_v61 = vld [vmem:[%s7874_s3 + $0x58] sm:$0xff] }
0x433a   :  { %3939 = vmatprep.mubr.f32.mxu0 %v5776_v4 }
0x440c   :  { %v3675_v58 = vpop.f32.mrb[32].mxu0 }
0x440d   :  { %v3676_v15 = vadd.f32 %v4533_v3, %v3675_v58  ;;  %v4916_v55 = vpop.f32.mrb[33].mxu0  ;;  %v3826_v3 = vld [vmem:[%s7874_s3 + $0x78] sm:$0xff]  ;;  %v5492_v58 = vpack.c.bf16 %v3824_v28, %v3820_v34 }
0x440e   :  { %v3819_v55 = vld [vmem:[%s7874_s3 + $0x40] sm:$0xff]  ;;  %v3858_v34 = vld [vmem:[%s7874_s3 + $0x178] sm:$0xff] }
0x440f   :  { %v3679_v5 = vadd.f32 %v3676_v15, %v7463_v8  ;;  %v4535_v8 = vld [vmem:[%s7873_s2 + $0x40] sm:$0xff]  ;;  %v5524_v15 = vpack.c.bf16 %v3826_v3, %v3822_v61 }
0x4410   :  { %v7556_v52 = vpack.c.bf16 %v4536_v6, %v4535_v8  ;;  %v3831_v6 = vld [vmem:[%s7874_s3 + $0xa0] sm:$0xff] }
0x4411   :  { %5738 = vtanh.f32 %v3679_v5  ;;  %v3680_v63 = vmul.f32 0.5, %v3679_v5  ;;  %v3823_v5 = vld [vmem:[%s7874_s3 + $0x60] sm:$0xff] }
0x4412   :  { %5484 = vmatpush3.bf16.msra.mxu1 %v7556_v52  ;;  %v3851_v61 = vld [vmem:[%s7874_s3 + $0x140] sm:$0xff] }
0x4413   :  { %5740 = vtanh.f32 %v3680_v63  ;;  %5485 = vmatprep.subr.bf16.mxu1 %v5774_v0  ;;  %v5494_v63 = vpack.c.bf16 %v3823_v5, %v3819_v55  ;;  %v3853_v55 = vld [vmem:[%s7874_s3 + $0x150] sm:$0xff] }
0x4414   :  { %v3857_v5 = vld [vmem:[%s7874_s3 + $0x170] sm:$0xff] }
0x441b   :  { %v5739_v26 = vpop.eup %5738 }
0x441c   :  { %3687 = vrot.lane.b32.xlu1 %v5739_v26, %s5777_s0  ;;  %v3821_v26 = vld [vmem:[%s7874_s3 + $0x50] sm:$0xff] }
0x441d   :  { %v5741_v2 = vpop.eup %5740 }
0x441e   :  { %v3682_v7 = vmul.f32 0.5, %v5741_v2  ;;  %v3828_v2 = vld [vmem:[%s7874_s3 + $0x88] sm:$0xff] }
0x4420   :  { %v3683_v59 = vadd.f32 0.5, %v3682_v7  ;;  %v3832_v7 = vld [vmem:[%s7874_s3 + $0xa8] sm:$0xff] }
0x4422   :  { %v3685_v12 = vmul.f32 %v3683_v59, %v7417_v18  ;;  %v4538_v18 = vld [vmem:[%s7873_s2 + $0x58] sm:$0xff] }
0x4423   :  { %v7562_v60 = vpack.c.bf16 %v4538_v18, %v4537_v23  ;;  %v3829_v23 = vld [vmem:[%s7874_s3 + $0x90] sm:$0xff] }
0x4424   :  { %v3833_v18 = vld [vmem:[%s7874_s3 + $0xb0] sm:$0xff] }
0x4425   :  { %5487 = vmatpush3.bf16.msra.mxu1 %v7562_v60 }
0x4426   :  { %5521 = vmatprep.subr.bf16.mxu1 %v5520_v43  ;;  %v3849_v43 = vld [vmem:[%s7874_s3 + $0x130] sm:$0xff] }
0x4427   :  { %v5538_v28 = vpack.c.bf16 %v3849_v43, %v3845_v36 }
0x448e   :  { %v3688_v33 = vpop.permute.xlu1 %3687 }
0x448f   :  { %v3690_v57 = vmul.f32 %v3688_v33, %v3683_v59  ;;  %v5496_v33 = vpack.c.bf16 %v3832_v7, %v3828_v2  ;;  %v3860_v7 = vld [vmem:[%s7874_s3 + $0x188] sm:$0xff] }
0x4491   :  { %3692 = vrot.lane.b32.xlu0 %v3690_v57, %s5779_s21  ;;  %v3830_v57 = vld [vmem:[%s7874_s3 + $0x98] sm:$0xff] }
0x4503   :  { %v3693_v62 = vpop.permute.xlu0 %3692 }
0x4504   :  { %v7544_v16 = vadd.f32 %v3693_v62, %v3685_v12  ;;  %v3834_v12 = vld [vmem:[%s7874_s3 + $0xb8] sm:$0xff]  ;;  %v3827_v62 = vld [vmem:[%s7874_s3 + $0x80] sm:$0xff] }
0x4505   :  { %v5528_v8 = vpack.c.bf16 %v3834_v12, %v3830_v57 }
0x4506   :  { %5742 = vtanh.f32 %v7544_v16 }
0x4510   :  { %v5743_v10 = vpop.eup %5742 }
0x4511   :  { %3698 = vrot.lane.b32.xlu1 %v5743_v10, %s5777_s0  ;;  %v3836_v10 = vld [vmem:[%s7874_s3 + $0xc8] sm:$0xff] }
0x4583   :  { %v3699_v13 = vpop.permute.xlu1 %3698 }
0x4584   :  { %v7567_v1 = vmul.f32 %v3699_v13, %v3683_v59  ;;  %v3840_v13 = vld [vmem:[%s7874_s3 + $0xe8] sm:$0xff] }
0x4586   :  { %3712 = vrot.lane.b32.xlu0 %v7567_v1, %s5779_s21 }
0x45f8   :  { %v3713_v51 = vpop.permute.xlu0 %3712 }
0x45f9   :  { %4926 = vmatmul.mubr.msk.f32.vlgmr.msra.gmra.mrb[32].mxu1 %vm38_vm1, %v3713_v51  ;;  %v3838_v51 = vld [vmem:[%s7874_s3 + $0xd8] sm:$0xff] }
0x45fa   :  { %4010 = vmatprep.mubr.f32.mxu1 %v5776_v4  ;;  %5523 = vmatpush1.bf16.msra.mxu1 %v5522_v48 }
0x45fb   :  { %5525 = vmatprep.subr.bf16.mxu1 %v5524_v15  ;;  %v3855_v15 = vld [vmem:[%s7874_s3 + $0x160] sm:$0xff] }
0x46cc   :  { %v3782_v22 = vpop.f32.mrb[32].mxu1 }
0x46cd   :  { %v3783_v53 = vadd.f32 %v4539_v27, %v3782_v22  ;;  %v4927_v39 = vpop.f32.mrb[33].mxu1  ;;  %v5498_v27 = vpack.c.bf16 %v3831_v6, %v3827_v62  ;;  %v5530_v22 = vpack.c.bf16 %v3833_v18, %v3829_v23  ;;  %v3859_v62 = vld [vmem:[%s7874_s3 + $0x180] sm:$0xff]  ;;  %v3861_v18 = vld [vmem:[%s7874_s3 + $0x190] sm:$0xff] }
0x46ce   :  { %v3839_v39 = vld [vmem:[%s7874_s3 + $0xe0] sm:$0xff] }
0x46cf   :  { %v3786_v47 = vadd.f32 %v3783_v53, %v7465_v19  ;;  %v3812_v19 = vld [vmem:[%s7874_s3 + $0x8] sm:$0xff]  ;;  %v3835_v53 = vld [vmem:[%s7874_s3 + $0xc0] sm:$0xff] }
0x46d1   :  { %5744 = vtanh.f32 %v3786_v47  ;;  %v3787_v37 = vmul.f32 0.5, %v3786_v47  ;;  %v5500_v47 = vpack.c.bf16 %v3840_v13, %v3836_v10  ;;  %v3865_v10 = vld [vmem:[%s7874_s3 + $0x1b0] sm:$0xff] }
0x46d2   :  { %v5546_v13 = vpack.c.bf16 %v3865_v10, %v3861_v18 }
0x46d3   :  { %5746 = vtanh.f32 %v3787_v37  ;;  %v3837_v37 = vld [vmem:[%s7874_s3 + $0xd0] sm:$0xff] }
0x46db   :  { %v5745_v24 = vpop.eup %5744 }
0x46dc   :  { %3794 = vrot.lane.b32.xlu1 %v5745_v24, %s5777_s0 }
0x46dd   :  { %v5747_v45 = vpop.eup %5746 }
0x46de   :  { %v3789_v31 = vmul.f32 0.5, %v5747_v45  ;;  %v3841_v45 = vld [vmem:[%s7874_s3 + $0xf0] sm:$0xff] }
0x46df   :  { %v5534_v40 = vpack.c.bf16 %v3841_v45, %v3837_v37 }
0x46e0   :  { %3487 = vrot.lane.b32.xlu1 %v7495_v38, %s5779_s21  ;;  %v7580_v17 = vadd.f32 0.5, %v3789_v31  ;;  %v3816_v38 = vld [vmem:[%s7874_s3 + $0x28] sm:$0xff] }
0x46e1   :  { %v5488_v21 = vpack.c.bf16 %v3816_v38, %v3812_v19  ;;  %v3844_v31 = vld [vmem:[%s7874_s3 + $0x108] sm:$0xff]  ;;  %v3850_v19 = vld [vmem:[%s7874_s3 + $0x138] sm:$0xff]  ;;  %v5502_v38 = vpack.c.bf16 %v3839_v39, %v3835_v53 }
0x46e2   :  { %v3874_v39 = vld [vmem:[%s7874_s3 + $0x1f8] sm:$0xff] }
0x46e3   :  { %5489 = vmatprep.subr.bf16.mxu0 %v5488_v21  ;;  %v3847_v21 = vld [vmem:[%s7874_s3 + $0x120] sm:$0xff] }
0x46e4   :  { %5491 = vmatpush1.bf16.msra.mxu0 %v5490_v56  ;;  %v3852_v56 = vld [vmem:[%s7874_s3 + $0x148] sm:$0xff] }
0x46e5   :  { %5493 = vmatprep.subr.bf16.mxu0 %v5492_v58  ;;  %v5508_v3 = vpack.c.bf16 %v3856_v20, %v3852_v56  ;;  %v5540_v58 = vpack.c.bf16 %v3858_v34, %v3854_v9 }
0x46e8   :  { %5495 = vmatpush1.bf16.msra.mxu0 %v5494_v63  ;;  %v5542_v63 = vpack.c.bf16 %v3857_v5, %v3853_v55 }
0x46e9   :  { %5497 = vmatprep.subr.bf16.mxu0 %v5496_v33  ;;  %v3862_v33 = vld [vmem:[%s7874_s3 + $0x198] sm:$0xff] }
0x46ec   :  { %5499 = vmatpush1.bf16.msra.mxu0 %v5498_v27  ;;  %v3872_v27 = vld [vmem:[%s7874_s3 + $0x1e8] sm:$0xff] }
0x46ed   :  { %5501 = vmatprep.subr.bf16.mxu0 %v5500_v47  ;;  %v3867_v47 = vld [vmem:[%s7874_s3 + $0x1c0] sm:$0xff] }
0x46f0   :  { %5503 = vmatpush1.bf16.msra.mxu0 %v5502_v38 }
0x474e   :  { %v3795_v50 = vpop.permute.xlu1 %3794 }
0x474f   :  { %v3797_v30 = vmul.f32 %v3795_v50, %v7580_v17  ;;  %v3848_v50 = vld [vmem:[%s7874_s3 + $0x128] sm:$0xff] }
0x4750   :  { %v5504_v14 = vpack.c.bf16 %v3848_v50, %v3844_v31  ;;  %v3869_v31 = vld [vmem:[%s7874_s3 + $0x1d0] sm:$0xff] }
0x4751   :  { %3799 = vrot.lane.b32.xlu0 %v3797_v30, %s5779_s21  ;;  %v3846_v30 = vld [vmem:[%s7874_s3 + $0x118] sm:$0xff]  ;;  %v3873_v50 = vld [vmem:[%s7874_s3 + $0x1f0] sm:$0xff] }
0x4752   :  { %v3488_v32 = vpop.permute.xlu1 %3487  ;;  %v5536_v42 = vpack.c.bf16 %v3850_v19, %v3846_v30  ;;  %5505 = vmatprep.subr.bf16.mxu0 %v5504_v14  ;;  %v5550_v30 = vpack.c.bf16 %v3873_v50, %v3869_v31 }
0x4753   :  { %3491 = vst.msk [vmem:[#allocation2 - $0x6] sm:$0x40] %vm3490_vm11, %v3488_v32  ;;  %v3843_v32 = vld [vmem:[%s7874_s3 + $0x100] sm:$0xff] }
0x4754   :  { %v5506_v48 = vpack.c.bf16 %v3847_v21, %v3843_v32 }
0x4755   :  { %3596 = vrot.lane.b32.xlu0 %v7531_v35, %s5777_s0  ;;  %v3825_v35 = vld [vmem:[%s7874_s3 + $0x70] sm:$0xff] }
0x4756   :  { %v5526_v59 = vpack.c.bf16 %v3825_v35, %v3821_v26  ;;  %5507 = vmatpush1.bf16.msra.mxu0 %v5506_v48  ;;  %v5510_v26 = vpack.c.bf16 %v3855_v15, %v3851_v61  ;;  %v3792_v35 = vmul.f32 %v7580_v17, %v7452_v54  ;;  %v3866_v54 = vld [vmem:[%s7874_s3 + $0x1b8] sm:$0xff]  ;;  %v4027_v48 = vrot.slane %v7471_v49, 7  ;;  %v4541_v49 = vld [vmem:[%s7872_s4 + $0x1] sm:$0x1] }
0x4757   :  { %5509 = vmatprep.subr.bf16.mxu0 %v5508_v3  ;;  %v5544_v6 = vpack.c.bf16 %v3866_v54, %v3862_v33 }
0x4758   :  { %5527 = vmatpush1.bf16.msra.mxu1 %v5526_v59  ;;  %v3864_v59 = vld [vmem:[%s7874_s3 + $0x1a8] sm:$0xff] }
0x4759   :  { %3703 = vrot.lane.b32.xlu0 %v7567_v1, %s5778_s20  ;;  %v3842_v1 = vld [vmem:[%s7874_s3 + $0xf8] sm:$0xff]  ;;  %5529 = vmatprep.subr.bf16.mxu1 %v5528_v8  ;;  %v5512_v12 = vpack.c.bf16 %v3864_v59, %v3860_v7  ;;  %v3863_v8 = vld [vmem:[%s7874_s3 + $0x1a0] sm:$0xff] }
0x475a   :  { %v5532_v24 = vpack.c.bf16 %v3842_v1, %v3838_v51  ;;  %5511 = vmatpush1.bf16.msra.mxu0 %v5510_v26  ;;  %v5514_v23 = vpack.c.bf16 %v3863_v8, %v3859_v62  ;;  %v3868_v51 = vld [vmem:[%s7874_s3 + $0x1c8] sm:$0xff] }
0x475b   :  { %5513 = vmatprep.subr.bf16.mxu0 %v5512_v12  ;;  %v5516_v53 = vpack.c.bf16 %v3872_v27, %v3868_v51 }
0x475c   :  { %5531 = vmatpush1.bf16.msra.mxu1 %v5530_v22  ;;  %v3870_v22 = vld [vmem:[%s7874_s3 + $0x1d8] sm:$0xff] }
0x475d   :  { %5533 = vmatprep.subr.bf16.mxu1 %v5532_v24  ;;  %v3871_v24 = vld [vmem:[%s7874_s3 + $0x1e0] sm:$0xff]  ;;  %v5548_v37 = vpack.c.bf16 %v3874_v39, %v3870_v22 }
0x475e   :  { %5515 = vmatpush1.bf16.msra.mxu0 %v5514_v23  ;;  %v5518_v45 = vpack.c.bf16 %v3871_v24, %v3867_v47 }
0x475f   :  { %5517 = vmatprep.subr.bf16.mxu0 %v5516_v53 }
0x4760   :  { %5535 = vmatpush1.bf16.msra.mxu1 %v5534_v40 }
0x4761   :  { %5537 = vmatprep.subr.bf16.mxu1 %v5536_v42 }
0x4762   :  { %5519 = vmatpush1.bf16.msra.mxu0 %v5518_v45 }
0x4763   :  { %5552 = vmatprep.subr.bf16.mxu0 %v5774_v0 }
0x4764   :  { %5539 = vmatpush1.bf16.msra.mxu1 %v5538_v28 }
0x4765   :  { %5541 = vmatprep.subr.bf16.mxu1 %v5540_v58 }
0x4768   :  { %5543 = vmatpush1.bf16.msra.mxu1 %v5542_v63 }
0x4769   :  { %5545 = vmatprep.subr.bf16.mxu1 %v5544_v6 }
0x476c   :  { %5547 = vmatpush1.bf16.msra.mxu1 %v5546_v13 }
0x476d   :  { %5549 = vmatprep.subr.bf16.mxu1 %v5548_v37 }
0x4770   :  { %5551 = vmatpush1.bf16.msra.mxu1 %v5550_v30 }
0x4771   :  { %5558 = vmatprep.subr.bf16.mxu1 %v5774_v0 }
0x47c3   :  { %v3800_v2 = vpop.permute.xlu0 %3799 }
0x47c4   :  { %v7743_v57 = vadd.f32 %v3800_v2, %v3792_v35 }
0x47c6   :  { %5748 = vtanh.f32 %v7743_v57 }
0x47c7   :  { %v3597_v1 = vpop.permute.xlu0 %3596 }
0x47c8   :  { %3599 = vst.msk [vmem:[#allocation2] sm:$0x1] %vm232_vm3, %v3597_v1 }
0x47cb   :  { %v3704_v19 = vpop.permute.xlu0 %3703 }
0x47cc   :  { %3706 = vst.msk [vmem:[#allocation2] sm:$0x1] %vm335_vm4, %v3704_v19 }
0x47d0   :  { %v5749_v38 = vpop.eup %5748 }
0x47d1   :  { %3805 = vrot.lane.b32.xlu1 %v5749_v38, %s5777_s0 }
0x4843   :  { %v3806_v40 = vpop.permute.xlu1 %3805 }
0x4844   :  { %v3808_v32 = vmul.f32 %v3806_v40, %v7580_v17 }
0x4846   :  { %3809 = vst.msk [vmem:[#allocation2] sm:$0x1] %vm434_vm5, %v3808_v32 }
0x484d   :  { %v3810_v21 = vld [vmem:[#allocation2] sm:$0x1] }
0x484e   :  { %3940 = vmatmul.mubr.f32.vlgmr.msra.gmra.mrb[34].mxu0 %v3810_v21  ;;  %4011 = vmatmul.mubr.f32.vlgmr.msra.gmra.mrb[34].mxu1 %v3810_v21  ;;  %v4553_v21 = vld [vmem:[%s7872_s4 + $0x3] sm:$0x1] }
0x484f   :  { %5554 = vmatpush3.bf16.msra.mxu0 %v7483_v46  ;;  %4936 = vmatprep.mubr.msk.f32.mxu0 %vm5775_vm0, %v5776_v4 }
0x4850   :  { %5555 = vmatprep.subr.bf16.mxu0 %v5774_v0  ;;  %5560 = vmatpush3.bf16.msra.mxu1 %v7520_v29 }
0x4851   :  { %5561 = vmatprep.subr.bf16.mxu1 %v5774_v0  ;;  %4947 = vmatprep.mubr.msk.f32.mxu1 %vm5775_vm0, %v5776_v4 }
0x4853   :  { %5557 = vmatpush3.bf16.msra.mxu0 %v7489_v44 }
0x4854   :  { %5563 = vmatpush3.bf16.msra.mxu1 %v7526_v41  ;;  %5564 = vmatprep.subr.bf16.mxu0 %v5774_v0 }
0x4855   :  { %5570 = vmatprep.subr.bf16.mxu1 %v5774_v0 }
0x4921   :  { %v3941_v46 = vpop.f32.mrb[34].mxu0  ;;  %v7804_v17 = vpop.f32.mrb[34].mxu1 }
0x4922   :  { %v4018_v14 = vrot.slane %v3941_v46, 1  ;;  %v3943_v42 = vpop.f32.mrb[35].mxu0  ;;  %v7806_v36 = vpop.f32.mrb[35].mxu1 }
0x4924   :  { %v4020_v29 = vadd.f32 %v4018_v14, %v5849_v11 }
0x4926   :  { %5750 = vtanh.f32 %v4020_v29  ;;  %v4021_v44 = vmul.f32 0.5, %v4020_v29 }
0x4928   :  { %5752 = vtanh.f32 %v4021_v44 }
0x4930   :  { %v5751_v43 = vpop.eup %5750 }
0x4931   :  { %4031 = vrot.lane.b32.xlu1 %v5751_v43, %s5777_s0 }
0x4932   :  { %v5753_v41 = vpop.eup %5752 }
0x4933   :  { %v4023_v56 = vmul.f32 0.5, %v5753_v41 }
0x4935   :  { %v4024_v20 = vadd.f32 0.5, %v4023_v56 }
0x4937   :  { %v4029_v28 = vmul.f32 %v4027_v48, %v4024_v20 }
0x49a3   :  { %v4032_v9 = vpop.permute.xlu1 %4031 }
0x49a4   :  { %v4034_v34 = vmul.f32 %v4032_v9, %v4024_v20 }
0x49a6   :  { %4036 = vrot.lane.b32.xlu0 %v4034_v34, %s5779_s21 }
0x4a18   :  { %v4037_v61 = vpop.permute.xlu0 %4036 }
0x4a19   :  { %v4039_v3 = vadd.f32 %v4037_v61, %v4029_v28  ;;  %v4357_v28 = vld [vmem:[%s7875_s5 + $0x8] sm:$0xff]  ;;  %v4358_v61 = vld [vmem:[%s7875_s5 + $0x10] sm:$0xff] }
0x4a1b   :  { %5754 = vtanh.f32 %v4039_v3 }
0x4a25   :  { %v5755_v11 = vpop.eup %5754 }
0x4a26   :  { %4042 = vrot.lane.b32.xlu1 %v5755_v11, %s5777_s0 }
0x4a98   :  { %v4043_v58 = vpop.permute.xlu1 %4042 }
0x4a99   :  { %v4045_v15 = vmul.f32 %v4043_v58, %v4024_v20 }
0x4a9b   :  { %v4052_v55 = vrot.slane %v4045_v15, 7 }
0x4a9d   :  { %4053 = vrot.lane.b32.xlu0 %v4052_v55, %s5779_s21 }
0x4b0f   :  { %v4054_v5 = vpop.permute.xlu0 %4053 }
0x4b10   :  { %4937 = vmatmul.mubr.msk.f32.vlgmr.msra.gmra.mrb[36].mxu0 %vm38_vm1, %v4054_v5 }
0x4b11   :  { %5566 = vmatpush3.bf16.msra.mxu0 %v7556_v52  ;;  %4958 = vmatprep.mubr.msk.f32.mxu0 %vm5775_vm0, %v5776_v4 }
0x4b12   :  { %5567 = vmatprep.subr.bf16.mxu0 %v5774_v0 }
0x4b15   :  { %5569 = vmatpush3.bf16.msra.mxu0 %v7562_v60 }
0x4be3   :  { %v4123_v26 = vpop.f32.mrb[36].mxu0 }
0x4be4   :  { %v4124_v63 = vadd.f32 %v4541_v49, %v4123_v26  ;;  %v4938_v35 = vpop.f32.mrb[37].mxu0  ;;  %v4360_v49 = vld [vmem:[%s7876_s6] sm:$0x1] }
0x4be6   :  { %v4127_v2 = vadd.f32 %v4124_v63, %v3943_v42 }
0x4be8   :  { %5756 = vtanh.f32 %v4127_v2  ;;  %v4128_v52 = vmul.f32 0.5, %v4127_v2 }
0x4bea   :  { %5758 = vtanh.f32 %v4128_v52 }
0x4bf2   :  { %v5757_v7 = vpop.eup %5756 }
0x4bf3   :  { %4135 = vrot.lane.b32.xlu1 %v5757_v7, %s5777_s0 }
0x4bf4   :  { %v5759_v59 = vpop.eup %5758 }
0x4bf5   :  { %v4130_v33 = vmul.f32 0.5, %v5759_v59 }
0x4bf7   :  { %v4131_v12 = vadd.f32 0.5, %v4130_v33 }
0x4bf9   :  { %v4133_v60 = vmul.f32 %v4131_v12, %v7508_v25  ;;  %v4547_v25 = vld [vmem:[%s7872_s4 + $0x2] sm:$0x1] }
0x4c65   :  { %v4136_v54 = vpop.permute.xlu1 %4135 }
0x4c66   :  { %v4138_v62 = vmul.f32 %v4136_v54, %v4131_v12 }
0x4c68   :  { %4140 = vrot.lane.b32.xlu0 %v4138_v62, %s5779_s21 }
0x4cda   :  { %v4141_v8 = vpop.permute.xlu0 %4140 }
0x4cdb   :  { %v4143_v6 = vadd.f32 %v4141_v8, %v4133_v60 }
0x4cdd   :  { %5760 = vtanh.f32 %v4143_v6 }
0x4ce7   :  { %v5761_v23 = vpop.eup %5760 }
0x4ce8   :  { %4146 = vrot.lane.b32.xlu1 %v5761_v23, %s5777_s0 }
0x4d5a   :  { %v4147_v18 = vpop.permute.xlu1 %4146 }
0x4d5b   :  { %v4149_v10 = vmul.f32 %v4147_v18, %v4131_v12 }
0x4d5d   :  { %4156 = vrot.lane.b32.xlu0 %v4149_v10, %s5779_s21 }
0x4dcf   :  { %v4157_v13 = vpop.permute.xlu0 %4156 }
0x4dd0   :  { %4948 = vmatmul.mubr.msk.f32.vlgmr.msra.gmra.mrb[36].mxu1 %vm38_vm1, %v4157_v13 }
0x4dd1   :  { %4969 = vmatprep.mubr.msk.f32.mxu1 %vm5775_vm0, %v5776_v4 }
0x4ea3   :  { %v4226_v51 = vpop.f32.mrb[36].mxu1 }
0x4ea4   :  { %v4227_v27 = vadd.f32 %v4547_v25, %v4226_v51  ;;  %v4949_v22 = vpop.f32.mrb[37].mxu1 }
0x4ea6   :  { %v4230_v1 = vadd.f32 %v4227_v27, %v7804_v17 }
0x4ea8   :  { %5762 = vtanh.f32 %v4230_v1  ;;  %v4231_v39 = vmul.f32 0.5, %v4230_v1 }
0x4eaa   :  { %5764 = vtanh.f32 %v4231_v39 }
0x4eb2   :  { %v5763_v53 = vpop.eup %5762 }
0x4eb3   :  { %4238 = vrot.lane.b32.xlu1 %v5763_v53, %s5777_s0 }
0x4eb4   :  { %v5765_v47 = vpop.eup %5764 }
0x4eb5   :  { %v4233_v24 = vmul.f32 0.5, %v5765_v47 }
0x4eb7   :  { %v4234_v37 = vadd.f32 0.5, %v4233_v24 }
0x4eb9   :  { %v4236_v31 = vmul.f32 %v4234_v37, %v7544_v16 }
0x4f25   :  { %v4239_v45 = vpop.permute.xlu1 %4238 }
0x4f26   :  { %v4241_v4 = vmul.f32 %v4239_v45, %v4234_v37 }
0x4f28   :  { %4243 = vrot.lane.b32.xlu0 %v4241_v4, %s5779_s21 }
0x4f9a   :  { %v4244_v50 = vpop.permute.xlu0 %4243 }
0x4f9b   :  { %v4246_v30 = vadd.f32 %v4244_v50, %v4236_v31 }
0x4f9d   :  { %5766 = vtanh.f32 %v4246_v30 }
0x4fa7   :  { %v5767_v19 = vpop.eup %5766 }
0x4fa8   :  { %4249 = vrot.lane.b32.xlu1 %v5767_v19, %s5777_s0 }
0x501a   :  { %v4250_v38 = vpop.permute.xlu1 %4249 }
0x501b   :  { %v4252_v40 = vmul.f32 %v4250_v38, %v4234_v37 }
0x501d   :  { %4259 = vrot.lane.b32.xlu0 %v4252_v40, %s5779_s21 }
0x508f   :  { %v4260_v32 = vpop.permute.xlu0 %4259 }
0x5090   :  { %4959 = vmatmul.mubr.msk.f32.vlgmr.msra.gmra.mrb[38].mxu0 %vm38_vm1, %v4260_v32 }
0x5163   :  { %v4329_v46 = vpop.f32.mrb[38].mxu0 }
0x5164   :  { %v4330_v17 = vadd.f32 %v4553_v21, %v4329_v46  ;;  %v4960_v16 = vpop.f32.mrb[39].mxu0 }
0x5166   :  { %v4333_v14 = vadd.f32 %v4330_v17, %v7806_v36  ;;  %v4356_v36 = vld [vmem:[%s7875_s5] sm:$0xff] }
0x5167   :  { %v5571_v3 = vpack.c.bf16 %v4357_v28, %v4356_v36 }
0x5168   :  { %5768 = vtanh.f32 %v4333_v14  ;;  %v4334_v29 = vmul.f32 0.5, %v4333_v14 }
0x5169   :  { %5572 = vmatpush3.bf16.msra.mxu1 %v5571_v3 }
0x516a   :  { %5770 = vtanh.f32 %v4334_v29  ;;  %5573 = vmatprep.subr.bf16.mxu1 %v5774_v0 }
0x5172   :  { %v5769_v42 = vpop.eup %5768 }
0x5173   :  { %4341 = vrot.lane.b32.xlu1 %v5769_v42, %s5777_s0 }
0x5174   :  { %v5771_v43 = vpop.eup %5770 }
0x5175   :  { %v4336_v44 = vmul.f32 0.5, %v5771_v43 }
0x5177   :  { %v4337_v41 = vadd.f32 0.5, %v4336_v44 }
0x5179   :  { %v4339_v9 = vmul.f32 %v4337_v41, %v7743_v57  ;;  %v4359_v57 = vld [vmem:[%s7875_s5 + $0x18] sm:$0xff] }
0x517a   :  { %v5574_v11 = vpack.c.bf16 %v4359_v57, %v4358_v61 }
0x517c   :  { %5575 = vmatpush3.bf16.msra.mxu1 %v5574_v11 }
0x51e5   :  { %v4342_v56 = vpop.permute.xlu1 %4341 }
0x51e6   :  { %v4344_v20 = vmul.f32 %v4342_v56, %v4337_v41 }
0x51e8   :  { %4346 = vrot.lane.b32.xlu0 %v4344_v20, %s5779_s21 }
0x525a   :  { %v4347_v34 = vpop.permute.xlu0 %4346 }
0x525b   :  { %v4349_v48 = vadd.f32 %v4347_v34, %v4339_v9 }
0x525d   :  { %5772 = vtanh.f32 %v4349_v48 }
0x5267   :  { %v5773_v58 = vpop.eup %5772 }
0x5268   :  { %4352 = vrot.lane.b32.xlu1 %v5773_v58, %s5777_s0 }
0x52da   :  { %v4353_v15 = vpop.permute.xlu1 %4352 }
0x52db   :  { %v4355_v55 = vmul.f32 %v4353_v15, %v4337_v41 }
0x52dd   :  { %4362 = vrot.lane.b32.xlu0 %v4355_v55, %s5779_s21 }
0x534f   :  { %v4363_v5 = vpop.permute.xlu0 %4362 }
0x5350   :  { %4970 = vmatmul.mubr.msk.f32.vlgmr.msra.gmra.mrb[38].mxu1 %vm38_vm1, %v4363_v5 }
0x5423   :  { %v4432_v26 = vpop.f32.mrb[38].mxu1 }
0x5424   :  { %v4433_v63 = vadd.f32 %v4432_v26, %v4360_v49  ;;  %v4971_v35 = vpop.f32.mrb[39].mxu1 }
0x5426   :  { %4436 = vst [vmem:[%s7877_s7] sm:$0x1] %v4433_v63 }

</bundles_post_ra>
